<compile_context>
chip_gen: v6e
topology: v6e:2x2x1
jax: 0.10.0
libtpu: 0.0.40
codegen_flags: <defaults>
</compile_context>

<pallas_src>
import functools

import jax
import jax.numpy as jnp
from jax import lax
from jax.experimental import pallas as pl
from jax.experimental.pallas import tpu as pltpu


def _silu(x):
    return x * jax.nn.sigmoid(x)


@functools.lru_cache(maxsize=1)
def _tpu_memory_profile():
    """(vmem_limit_bytes, tile_budget_bytes, bf16_elementwise_ok) for the local TPU."""
    kind = ""
    try:
        kind = jax.devices()[0].device_kind.lower()
    except Exception:
        pass
    phys = None
    try:
        phys = int(pltpu.get_tpu_info().vmem_capacity_bytes)
    except Exception:
        phys = None
    if phys is None:
        if "v7" in kind:
            phys = 64 << 20
        elif "v5" in kind or "v6" in kind:
            phys = 128 << 20
    if phys is None:                        # unknown chip: stay conservative
        vmem_limit, budget = 32 << 20, 18 << 20
    elif phys <= 80 << 20:                  # v7x-class: 64 MiB per TensorCore
        vmem_limit, budget = 44 << 20, 24 << 20
    else:                                   # v5e / v6e: 128 MiB physical VMEM
        vmem_limit, budget = 80 << 20, 48 << 20
    # bf16 VPU/EUP only on v6e/v7x; v5e (and older) silently widen -> keep f32 there.
    bf16_ew_ok = bool(kind) and not any(v in kind for v in ("v2", "v3", "v4", "v5"))
    return vmem_limit, budget, bf16_ew_ok


def _divisor_tile(n, limit, gran):
    """Largest multiple of `gran` dividing n and <= max(limit, gran); fallback n."""
    best = None
    t = gran
    cap = max(limit, gran)
    while t <= n:
        if n % t == 0 and t <= cap:
            best = t
        t += gran
    return best if best is not None else n


def _pick_tile_i(N, per_row_bytes, budget_bytes, *, want_split=False):
    """Receiver-axis tile: biggest sublane-aligned divisor of N within budget."""
    if N % 8:
        return N                       # blocks must be (8,128)-aligned or full
    gran = 16 if N % 16 == 0 else 8
    limit = int(budget_bytes // max(per_row_bytes, 1))
    if want_split and N >= 2 * gran:   # keep >= 2 grid steps (2 TCs on v7x) when B == 1
        limit = min(limit, N // 2)
    return _divisor_tile(N, limit, gran)


def egcl_kernel(
    feat_ref, coord_i_ref, coord_jT_ref, adj_ref, mask_i_ref, mask_j_ref,
    wm1a_ref, wm1b_ref, wm1c_ref, bm1_ref,
    wm2_ref, bm2_ref,
    wc1_ref, bc1_ref, wc2_ref,
    wf1_ref, bf1_ref, wf2_ref, bf2_ref,
    feat_out_ref, coord_out_ref,
    *, layout, elementwise_dtype, matmul_dtype,
):
    N = feat_ref.shape[1]
    TI = mask_i_ref.shape[1]
    H = wm2_ref.shape[0]
    cdt = matmul_dtype
    ew = elementwise_dtype

    it = pl.program_id(1)
    row0 = pl.multiple_of(it * TI, TI)

    feat_full = feat_ref[0]                            # (N, D)  sender features (cdt)
    feat_i = feat_ref[0, pl.ds(row0, TI), :]           # (TI, D) receiver tile

    # ---- displacement / radial recomputed in-kernel from coordinates (lane-dense (TI,N))
    ci = coord_i_ref[0]                                # (TI, 3) f32 receiver coords
    cjT = coord_jT_ref[0]                              # (3, N)  f32 sender coords
    d0 = ci[:, 0:1] - cjT[0:1, :]
    d1 = ci[:, 1:2] - cjT[1:2, :]
    d2 = ci[:, 2:3] - cjT[2:3, :]
    radial = d0 * d0 + d1 * d1 + d2 * d2               # (TI, N)

    # ---- masks recomputed in-kernel (mask2d == outer(mask); binary 0/1 mask assumed)
    mask_i = mask_i_ref[0]                             # (TI, 1)
    mask_j = mask_j_ref[0]                             # (1, N)
    mask2d = mask_i * mask_j                           # (TI, N)
    ii = lax.broadcasted_iota(jnp.int32, (TI, N), 0) + it * TI
    jj = lax.broadcasted_iota(jnp.int32, (TI, N), 1)
    mask2d_ne = mask2d * (ii != jj).astype(jnp.float32)
    w2d = mask2d * adj_ref[0].astype(jnp.float32)      # feature-branch edge weights (TI,N)

    if layout == "j":
        # Pairwise intermediates as (TI, H, N): j on the 128 lanes, H on sublanes.
        # Good lane occupancy for H < 128; H x H layers are (H,H)@(H,N) batched matmuls.
        a_i = jnp.dot(feat_i, wm1a_ref[...],
                      preferred_element_type=jnp.float32).astype(ew)            # (TI, H)
        b_jT = lax.dot_general(wm1b_ref[...], feat_full,                        # (H,D)x(N,D)^T
                               (((1,), (1,)), ((), ())),
                               preferred_element_type=jnp.float32).astype(ew)   # (H, N)
        h1 = _silu(a_i[:, :, None] + b_jT[None, :, :]
                   + wm1c_ref[...].astype(ew)[None] * radial.astype(ew)[:, None, :]
                   + bm1_ref[...].astype(ew)[None])                             # (TI, H, N)

        wm2b = jnp.broadcast_to(wm2_ref[...], (TI,) + wm2_ref.shape)            # (TI, H, H)
        msg = _silu((lax.dot_general(wm2b, h1.astype(cdt),
                                     (((2,), (1,)), ((0,), (0,))),
                                     preferred_element_type=jnp.float32)
                     + bm2_ref[...][None]).astype(ew))                           # (TI, H, N)

        wc1b = jnp.broadcast_to(wc1_ref[...], (TI,) + wc1_ref.shape)
        c1 = _silu((lax.dot_general(wc1b, msg.astype(cdt),
                                    (((2,), (1,)), ((0,), (0,))),
                                    preferred_element_type=jnp.float32)
                    + bc1_ref[...][None]).astype(ew))                            # (TI, H, N)

        # H -> 1 projection and the j-weighted sum accumulate in f32.
        upd = jnp.sum(c1 * wc2_ref[...][None], axis=1)                           # (TI, N)
        msg_sum = jnp.sum(msg * w2d[:, None, :], axis=2)                         # (TI, H)
    else:
        # Original layout: (TI, N, H) with H on lanes; one (TI*N,H)@(H,H) matmul per layer.
        a_i = jnp.dot(feat_i, wm1a_ref[...],
                      preferred_element_type=jnp.float32).astype(ew)             # (TI, H)
        b_j = jnp.dot(feat_full, wm1b_ref[...],
                      preferred_element_type=jnp.float32).astype(ew)              # (N, H)
        h1 = _silu(a_i[:, None, :] + b_j[None, :, :]
                   + wm1c_ref[...].astype(ew)[None] * radial.astype(ew)[:, :, None]
                   + bm1_ref[...].astype(ew)[None])                               # (TI, N, H)

        h1f = h1.reshape(TI * N, H)
        msg = _silu((jnp.dot(h1f.astype(cdt), wm2_ref[...],
                             preferred_element_type=jnp.float32)
                     + bm2_ref[...]).astype(ew))                                   # (TI*N, H)
        c1 = _silu((jnp.dot(msg.astype(cdt), wc1_ref[...],
                            preferred_element_type=jnp.float32)
                    + bc1_ref[...]).astype(ew))                                    # (TI*N, H)

        upd = jnp.sum((c1 * wc2_ref[...]).reshape(TI, N, H), axis=-1)              # (TI, N)
        msg_sum = jnp.sum(msg.reshape(TI, N, H) * w2d[:, :, None], axis=1)         # (TI, H)

    # ---- coordinate update ('paper' branch; C from receiver row 0, binary mask assumed)
    m0 = mask_j[:, 0:1]                                                 # (1, 1)
    C = m0 * (jnp.sum(mask_j, axis=-1, keepdims=True) - m0)             # (1, 1)
    updm = upd * mask2d_ne                                              # mask hoisted once

    def coord_component(d_c):
        return jnp.sum(jnp.clip(updm * d_c, -100.0, 100.0),
                       axis=-1, keepdims=True)                          # (TI, 1)

    new_coord = C * jnp.concatenate(
        [coord_component(d0), coord_component(d1), coord_component(d2)], axis=-1)

    # ---- feature MLP (single fused concat matmul for layer 1)
    nf_in = jnp.concatenate([feat_i.astype(cdt), msg_sum.astype(cdt)], axis=-1)  # (TI, D+H)
    f1 = _silu(jnp.dot(nf_in, wf1_ref[...],
                       preferred_element_type=jnp.float32) + bf1_ref[...])       # (TI, H)
    new_feat = jnp.dot(f1.astype(cdt), wf2_ref[...],
                       preferred_element_type=jnp.float32) + bf2_ref[...]        # (TI, out)

    feat_out_ref[0] = (new_feat * mask_i).astype(feat_out_ref.dtype)
    coord_out_ref[0] = (new_coord * mask_i).astype(coord_out_ref.dtype)


def egcl_forward(params, feat, coord, radial, disp, adj_mat, mask, mask2d,
                 *, matmul_dtype=jnp.bfloat16, elementwise_dtype=None,
                 pairwise_layout=None, tile_i=None):
    # radial / disp / mask2d are recomputed in-kernel from coord / mask (assumed
    # radial == ||coord_i - coord_j||^2 and mask2d == outer(mask), the standard EGNN
    # construction) to remove all avoidable O(N^2) HBM streams.
    del radial, disp, mask2d

    B, N, D = feat.shape
    H = params["wm2"].shape[0]
    out_dim = params["wf2"].shape[1]

    vmem_limit, tile_budget, bf16_ew_ok = _tpu_memory_profile()

    cdt = jnp.dtype(matmul_dtype)
    if elementwise_dtype is None:
        ew = (jnp.dtype(jnp.bfloat16)
              if (bf16_ew_ok and cdt == jnp.dtype(jnp.bfloat16))
              else jnp.dtype(jnp.float32))
    else:
        ew = jnp.dtype(elementwise_dtype)
    layout = pairwise_layout if pairwise_layout is not None else ("j" if H < 128 else "h")
    assert layout in ("j", "h")

    # ---- receiver-axis tile: per-i-row live VMEM estimate (includes double-buffered
    # adjacency block, elementwise intermediates and matmul-dtype copies).
    ew_b, cdt_b, adj_b = ew.itemsize, cdt.itemsize, 2
    per_row = N * (3 * H * ew_b
                   + (2 * H * cdt_b if ew != cdt else 0)
                   + 2 * adj_b + 48)
    if layout == "j":
        per_row += 2 * H * H * cdt_b          # broadcast weight copies for batched matmuls
    TI = tile_i if tile_i is not None else _pick_tile_i(
        N, per_row, tile_budget, want_split=(B < 2))
    assert N % TI == 0, f"tile_i={TI} must divide N={N}"
    nI = N // TI

    # ---- data streams: feat in matmul dtype, adjacency as bf16, coords both ways (O(N)).
    if adj_mat.ndim == 4:                      # (B,N,N,1) -> (B,N,N), lane-dense
        adj_mat = adj_mat[..., 0]
    adj_bf16 = adj_mat.astype(jnp.bfloat16)
    coord_f = coord.astype(jnp.float32)                              # (B, N, 3)
    coordT = jnp.transpose(coord, (0, 2, 1)).astype(jnp.float32)     # (B, 3, N)
    mask_i = mask.astype(jnp.float32)[..., None]                     # (B, N, 1)
    mask_j = mask.astype(jnp.float32)[:, None, :]                    # (B, 1, N)

    wm1 = params["wm1"]                                              # (2D+1, H)
    wm1a, wm1b, wm1c = wm1[:D], wm1[D:2 * D], wm1[2 * D:]
    f32 = jnp.float32
    if layout == "j":
        weight_args = [
            wm1a.astype(cdt),                         # (D, H)
            wm1b.T.astype(cdt),                       # (H, D)
            wm1c.reshape(H, 1).astype(f32),
            params["bm1"].reshape(H, 1).astype(f32),
            params["wm2"].T.astype(cdt),              # (H, H) = W2^T
            params["bm2"].reshape(H, 1).astype(f32),
            params["wc1"].T.astype(cdt),              # (H, H) = Wc1^T
            params["bc1"].reshape(H, 1).astype(f32),
            params["wc2"].reshape(H, 1).astype(f32),
            params["wf1"].astype(cdt),
            params["bf1"].reshape(1, H).astype(f32),
            params["wf2"].astype(cdt),
            params["bf2"].reshape(1, out_dim).astype(f32),
        ]
    else:
        weight_args = [
            wm1a.astype(cdt), wm1b.astype(cdt),
            wm1c.reshape(1, H).astype(f32),
            params["bm1"].reshape(1, H).astype(f32),
            params["wm2"].astype(cdt),
            params["bm2"].reshape(1, H).astype(f32),
            params["wc1"].astype(cdt),
            params["bc1"].reshape(1, H).astype(f32),
            params["wc2"].reshape(1, H).astype(f32),
            params["wf1"].astype(cdt),
            params["bf1"].reshape(1, H).astype(f32),
            params["wf2"].astype(cdt),
            params["bf2"].reshape(1, out_dim).astype(f32),
        ]

    data_args = [feat.astype(cdt), coord_f, coordT, adj_bf16, mask_i, mask_j]
    data_specs = [
        pl.BlockSpec((1, N, D), lambda b, it: (b, 0, 0)),      # full feat (sender side)
        pl.BlockSpec((1, TI, 3), lambda b, it: (b, it, 0)),    # receiver coords tile
        pl.BlockSpec((1, 3, N), lambda b, it: (b, 0, 0)),      # sender coords (transposed)
        pl.BlockSpec((1, TI, N), lambda b, it: (b, it, 0)),    # adjacency (bf16)
        pl.BlockSpec((1, TI, 1), lambda b, it: (b, it, 0)),    # mask rows (receiver)
        pl.BlockSpec((1, 1, N), lambda b, it: (b, 0, 0)),      # mask cols (sender)
    ]
    weight_specs = [pl.BlockSpec(w.shape, lambda b, it: (0, 0)) for w in weight_args]

    out_shape = (jax.ShapeDtypeStruct((B, N, out_dim), feat.dtype),
                 jax.ShapeDtypeStruct((B, N, 3), feat.dtype))
    out_specs = (pl.BlockSpec((1, TI, out_dim), lambda b, it: (b, it, 0)),
                 pl.BlockSpec((1, TI, 3), lambda b, it: (b, it, 0)))

    kernel = functools.partial(egcl_kernel, layout=layout,
                               elementwise_dtype=ew, matmul_dtype=cdt)

    return pl.pallas_call(
        kernel,
        grid=(B, nI),
        in_specs=data_specs + weight_specs,
        out_specs=out_specs,
        out_shape=out_shape,
        compiler_params=pltpu.CompilerParams(
            dimension_semantics=("parallel", "parallel"),
            vmem_limit_bytes=vmem_limit,
        ),
    )(*data_args, *weight_args)


def egcl_reference(params, feat, radial, disp, adj_mat, mask, mask2d):
    """Pure-JAX reference mirroring the PyTorch forward ('paper' branch)."""
    B, N, D = feat.shape
    fi = jnp.broadcast_to(feat[:, :, None, :], (B, N, N, D))
    fj = jnp.broadcast_to(feat[:, None, :, :], (B, N, N, D))
    x = jnp.concatenate([fi, fj, radial], axis=-1)
    h1 = jax.nn.silu(x @ params["wm1"] + params["bm1"])
    msg = jax.nn.silu(h1 @ params["wm2"] + params["bm2"])

    c1 = jax.nn.silu(msg @ params["wc1"] + params["bc1"])
    upd = c1 @ params["wc2"]
    upd = jnp.clip(upd * disp, -100.0, 100.0) * mask2d
    eye = jnp.eye(N, dtype=bool)[None, :, :, None]
    mask2d_ne = mask2d * (~eye).astype(mask2d.dtype)
    C = jnp.sum(mask2d_ne[:, 0, :, 0], axis=-1, keepdims=True)[:, :, None]   # (B,1,1)
    new_coord = C * jnp.sum(upd * mask2d_ne, axis=2)

    msg_m = msg * mask2d * adj_mat
    msg_sum = jnp.sum(msg_m, axis=2)
    nf = jnp.concatenate([feat, msg_sum], axis=-1)
    f1 = jax.nn.silu(nf @ params["wf1"] + params["bf1"])
    new_feat = f1 @ params["wf2"] + params["bf2"]

    new_feat = new_feat * mask[..., None]
    new_coord = new_coord * mask[..., None]
    return new_feat, new_coord


def init_params(key, in_dim, out_dim, h_dim):
    ks = jax.random.split(key, 12)

    def xavier(k, shape, gain=1.0):
        fan_in, fan_out = shape
        a = gain * (6.0 / (fan_in + fan_out)) ** 0.5
        return jax.random.uniform(k, shape, jnp.float32, -a, a)

    def bias(k, n, fan_in):
        a = 1.0 / (fan_in ** 0.5)
        return jax.random.uniform(k, (n,), jnp.float32, -a, a)

    p = {}
    p["wm1"] = xavier(ks[0], (2 * in_dim + 1, h_dim))
    p["bm1"] = bias(ks[1], h_dim, 2 * in_dim + 1)
    p["wm2"] = xavier(ks[2], (h_dim, h_dim))
    p["bm2"] = bias(ks[3], h_dim, h_dim)
    p["wc1"] = xavier(ks[4], (h_dim, h_dim))
    p["bc1"] = bias(ks[5], h_dim, h_dim)
    p["wc2"] = xavier(ks[6], (h_dim, 1), gain=0.001)   # xavier_uniform_(gain=0.001), no bias
    p["wf1"] = xavier(ks[7], (in_dim + h_dim, h_dim))
    p["bf1"] = bias(ks[8], h_dim, in_dim + h_dim)
    p["wf2"] = xavier(ks[9], (h_dim, out_dim))
    p["bf2"] = bias(ks[10], out_dim, h_dim)
    return p


def build_inputs(key, B, N, D, H, OUT):
    kp, kf, kc, ka = jax.random.split(key, 4)
    params = init_params(kp, D, OUT, H)
    feat = jax.random.normal(kf, (B, N, D), jnp.float32)
    coord = jax.random.normal(kc, (B, N, 3), jnp.float32)
    disp = coord[:, :, None, :] - coord[:, None, :, :]            # (B, N, N, 3)
    radial = jnp.sum(disp ** 2, axis=-1, keepdims=True)           # (B, N, N, 1)
    adj = (jax.random.uniform(ka, (B, N, N, 1)) > 0.5).astype(jnp.float32)
    mask = jnp.ones((B, N), jnp.float32).at[1, (3 * N) // 4:].set(0.0)   # ragged batch
    mask2d = (mask[:, :, None] * mask[:, None, :])[..., None]     # (B, N, N, 1)
    return params, feat, coord, radial, disp, adj, mask, mask2d


if __name__ == "__main__":
    B, N, D, H, OUT = 2, 8, 16, 32, 16
    params, feat, coord, radial, disp, adj, mask, mask2d = build_inputs(
        jax.random.PRNGKey(0), B, N, D, H, OUT)
    ref_feat, ref_coord = egcl_reference(params, feat, radial, disp, adj, mask, mask2d)

    # 1) exact f32 run, auto layout (H < 128 -> lane-dense-in-j path): strict parity.
    f_j, c_j = egcl_forward(params, feat, coord, radial, disp, adj, mask, mask2d,
                            matmul_dtype=jnp.float32, elementwise_dtype=jnp.float32)
    jax.block_until_ready((f_j, c_j))
    assert f_j.shape == (B, N, OUT) and c_j.shape == (B, N, 3)
    assert jnp.allclose(f_j, ref_feat, atol=2e-4, rtol=2e-4)
    assert jnp.allclose(c_j, ref_coord, atol=2e-4, rtol=2e-4)

    # 2) exact f32 run, H-on-lanes layout (the path used when h_dim >= 128).
    f_h, c_h = egcl_forward(params, feat, coord, radial, disp, adj, mask, mask2d,
                            matmul_dtype=jnp.float32, elementwise_dtype=jnp.float32,
                            pairwise_layout="h")
    jax.block_until_ready((f_h, c_h))
    assert jnp.allclose(f_h, ref_feat, atol=2e-4, rtol=2e-4)
    assert jnp.allclose(c_h, ref_coord, atol=2e-4, rtol=2e-4)

    # 3) default fast run (bf16 MXU operands, generation-dependent element-wise dtype).
    f_b, c_b = egcl_forward(params, feat, coord, radial, disp, adj, mask, mask2d)
    jax.block_until_ready((f_b, c_b))
    assert bool(jnp.all(jnp.isfinite(f_b))) and bool(jnp.all(jnp.isfinite(c_b)))
    assert jnp.allclose(f_b, ref_feat, atol=1.0, rtol=0.15)
    assert jnp.allclose(c_b, ref_coord, atol=1.0, rtol=0.15)

    # 4) larger graph with a forced receiver tile (TI < N) to exercise the tiled path.
    p2, f2, c2, r2, d2, a2, m2, m2d2 = build_inputs(jax.random.PRNGKey(1), 2, 32, 8, 32, 8)
    rf2, rc2 = egcl_reference(p2, f2, r2, d2, a2, m2, m2d2)
    f_t, c_t = egcl_forward(p2, f2, c2, r2, d2, a2, m2, m2d2,
                            matmul_dtype=jnp.float32, elementwise_dtype=jnp.float32,
                            tile_i=8)
    jax.block_until_ready((f_t, c_t))
    assert jnp.allclose(f_t, rf2, atol=2e-4, rtol=2e-4)
    assert jnp.allclose(c_t, rc2, atol=2e-4, rtol=2e-4)

    print("KERNEL_OK")
</pallas_src>

<mosaic_0001>
module attributes {stable_mosaic.version = 11 : i64} {
  func.func @egcl_kernel(%arg0: i32, %arg1: i32, %arg2: memref<1x8x16xf32, #tpu.memory_space<vmem>>, %arg3: memref<1x8x3xf32, #tpu.memory_space<vmem>>, %arg4: memref<1x3x8xf32, #tpu.memory_space<vmem>>, %arg5: memref<1x8x8xbf16, #tpu.memory_space<vmem>>, %arg6: memref<1x8x1xf32, #tpu.memory_space<vmem>>, %arg7: memref<1x1x8xf32, #tpu.memory_space<vmem>>, %arg8: memref<16x32xf32, #tpu.memory_space<vmem>>, %arg9: memref<32x16xf32, #tpu.memory_space<vmem>>, %arg10: memref<32x1xf32, #tpu.memory_space<vmem>>, %arg11: memref<32x1xf32, #tpu.memory_space<vmem>>, %arg12: memref<32x32xf32, #tpu.memory_space<vmem>>, %arg13: memref<32x1xf32, #tpu.memory_space<vmem>>, %arg14: memref<32x32xf32, #tpu.memory_space<vmem>>, %arg15: memref<32x1xf32, #tpu.memory_space<vmem>>, %arg16: memref<32x1xf32, #tpu.memory_space<vmem>>, %arg17: memref<48x32xf32, #tpu.memory_space<vmem>>, %arg18: memref<1x32xf32, #tpu.memory_space<vmem>>, %arg19: memref<32x16xf32, #tpu.memory_space<vmem>>, %arg20: memref<1x16xf32, #tpu.memory_space<vmem>>, %arg21: memref<1x8x16xf32, #tpu.memory_space<vmem>>, %arg22: memref<1x8x3xf32, #tpu.memory_space<vmem>>) attributes {dimension_semantics = [#tpu.dimension_semantics<parallel>, #tpu.dimension_semantics<parallel>], iteration_bounds = array<i64: 2, 1>, scalar_prefetch = 0 : i64, scratch_operands = 0 : i64, tpu.core_type = #tpu.core_type<tc>, window_params = [{transform_indices = @transform_0, window_bounds = array<i64: 1, 8, 16>}, {transform_indices = @transform_1, window_bounds = array<i64: 1, 8, 3>}, {transform_indices = @transform_2, window_bounds = array<i64: 1, 3, 8>}, {transform_indices = @transform_3, window_bounds = array<i64: 1, 8, 8>}, {transform_indices = @transform_4, window_bounds = array<i64: 1, 8, 1>}, {transform_indices = @transform_5, window_bounds = array<i64: 1, 1, 8>}, {pipeline_mode = #tpu.pipeline_mode<synchronous>, transform_indices = @transform_6, window_bounds = array<i64: 16, 32>}, {pipeline_mode = #tpu.pipeline_mode<synchronous>, transform_indices = @transform_7, window_bounds = array<i64: 32, 16>}, {pipeline_mode = #tpu.pipeline_mode<synchronous>, transform_indices = @transform_8, window_bounds = array<i64: 32, 1>}, {pipeline_mode = #tpu.pipeline_mode<synchronous>, transform_indices = @transform_9, window_bounds = array<i64: 32, 1>}, {pipeline_mode = #tpu.pipeline_mode<synchronous>, transform_indices = @transform_10, window_bounds = array<i64: 32, 32>}, {pipeline_mode = #tpu.pipeline_mode<synchronous>, transform_indices = @transform_11, window_bounds = array<i64: 32, 1>}, {pipeline_mode = #tpu.pipeline_mode<synchronous>, transform_indices = @transform_12, window_bounds = array<i64: 32, 32>}, {pipeline_mode = #tpu.pipeline_mode<synchronous>, transform_indices = @transform_13, window_bounds = array<i64: 32, 1>}, {pipeline_mode = #tpu.pipeline_mode<synchronous>, transform_indices = @transform_14, window_bounds = array<i64: 32, 1>}, {pipeline_mode = #tpu.pipeline_mode<synchronous>, transform_indices = @transform_15, window_bounds = array<i64: 48, 32>}, {pipeline_mode = #tpu.pipeline_mode<synchronous>, transform_indices = @transform_16, window_bounds = array<i64: 1, 32>}, {pipeline_mode = #tpu.pipeline_mode<synchronous>, transform_indices = @transform_17, window_bounds = array<i64: 32, 16>}, {pipeline_mode = #tpu.pipeline_mode<synchronous>, transform_indices = @transform_18, window_bounds = array<i64: 1, 16>}, {transform_indices = @transform_19, window_bounds = array<i64: 1, 8, 16>}, {transform_indices = @transform_20, window_bounds = array<i64: 1, 8, 3>}]} {
    %c8_i32 = arith.constant 8 : i32
    %0 = arith.muli %arg1, %c8_i32 : i32
    %1 = tpu.assume_multiple %0, 8 : i32
    %c0 = arith.constant 0 : index
    %c0_0 = arith.constant 0 : index
    %c0_1 = arith.constant 0 : index
    %2 = vector.load %arg2[%c0, %c0_0, %c0_1] : memref<1x8x16xf32, #tpu.memory_space<vmem>>, vector<1x8x16xf32>
    %3 = vector.shape_cast %2 : vector<1x8x16xf32> to vector<8x16xf32>
    %c0_2 = arith.constant 0 : index
    %4 = arith.index_cast %1 : i32 to index
    %c0_3 = arith.constant 0 : index
    %5 = vector.load %arg2[%c0_2, %4, %c0_3] : memref<1x8x16xf32, #tpu.memory_space<vmem>>, vector<1x8x16xf32>
    %6 = vector.shape_cast %5 : vector<1x8x16xf32> to vector<8x16xf32>
    %c0_4 = arith.constant 0 : index
    %c0_5 = arith.constant 0 : index
    %c0_6 = arith.constant 0 : index
    %7 = vector.load %arg3[%c0_4, %c0_5, %c0_6] : memref<1x8x3xf32, #tpu.memory_space<vmem>>, vector<1x8x3xf32>
    %8 = vector.shape_cast %7 : vector<1x8x3xf32> to vector<8x3xf32>
    %c0_7 = arith.constant 0 : index
    %c0_8 = arith.constant 0 : index
    %c0_9 = arith.constant 0 : index
    %9 = vector.load %arg4[%c0_7, %c0_8, %c0_9] : memref<1x3x8xf32, #tpu.memory_space<vmem>>, vector<1x3x8xf32>
    %10 = vector.shape_cast %9 : vector<1x3x8xf32> to vector<3x8xf32>
    %11 = vector.extract_strided_slice %8 {offsets = [0, 0], sizes = [8, 1], strides = [1, 1]} : vector<8x3xf32> to vector<8x1xf32>
    %12 = vector.extract_strided_slice %10 {offsets = [0, 0], sizes = [1, 8], strides = [1, 1]} : vector<3x8xf32> to vector<1x8xf32>
    %13 = vector.broadcast %11 : vector<8x1xf32> to vector<8x8xf32>
    %14 = vector.broadcast %12 : vector<1x8xf32> to vector<8x8xf32>
    %15 = arith.subf %13, %14 : vector<8x8xf32>
    %16 = vector.extract_strided_slice %8 {offsets = [0, 1], sizes = [8, 1], strides = [1, 1]} : vector<8x3xf32> to vector<8x1xf32>
    %17 = vector.extract_strided_slice %10 {offsets = [1, 0], sizes = [1, 8], strides = [1, 1]} : vector<3x8xf32> to vector<1x8xf32>
    %18 = vector.broadcast %16 : vector<8x1xf32> to vector<8x8xf32>
    %19 = vector.broadcast %17 : vector<1x8xf32> to vector<8x8xf32>
    %20 = arith.subf %18, %19 : vector<8x8xf32>
    %21 = vector.extract_strided_slice %8 {offsets = [0, 2], sizes = [8, 1], strides = [1, 1]} : vector<8x3xf32> to vector<8x1xf32>
    %22 = vector.extract_strided_slice %10 {offsets = [2, 0], sizes = [1, 8], strides = [1, 1]} : vector<3x8xf32> to vector<1x8xf32>
    %23 = vector.broadcast %21 : vector<8x1xf32> to vector<8x8xf32>
    %24 = vector.broadcast %22 : vector<1x8xf32> to vector<8x8xf32>
    %25 = arith.subf %23, %24 : vector<8x8xf32>
    %26 = arith.mulf %15, %15 : vector<8x8xf32>
    %27 = arith.mulf %20, %20 : vector<8x8xf32>
    %28 = arith.addf %26, %27 : vector<8x8xf32>
    %29 = arith.mulf %25, %25 : vector<8x8xf32>
    %30 = arith.addf %28, %29 : vector<8x8xf32>
    %c0_10 = arith.constant 0 : index
    %c0_11 = arith.constant 0 : index
    %c0_12 = arith.constant 0 : index
    %31 = vector.load %arg6[%c0_10, %c0_11, %c0_12] : memref<1x8x1xf32, #tpu.memory_space<vmem>>, vector<1x8x1xf32>
    %32 = vector.shape_cast %31 : vector<1x8x1xf32> to vector<8x1xf32>
    %c0_13 = arith.constant 0 : index
    %c0_14 = arith.constant 0 : index
    %c0_15 = arith.constant 0 : index
    %33 = vector.load %arg7[%c0_13, %c0_14, %c0_15] : memref<1x1x8xf32, #tpu.memory_space<vmem>>, vector<1x1x8xf32>
    %34 = vector.shape_cast %33 : vector<1x1x8xf32> to vector<1x8xf32>
    %35 = vector.broadcast %32 : vector<8x1xf32> to vector<8x8xf32>
    %36 = vector.broadcast %34 : vector<1x8xf32> to vector<8x8xf32>
    %37 = arith.mulf %35, %36 : vector<8x8xf32>
    %38 = tpu.iota {dimensions = array<i32: 0>} : vector<8x8xi32>
    %c8_i32_16 = arith.constant 8 : i32
    %39 = arith.muli %arg1, %c8_i32_16 : i32
    %40 = vector.broadcast %39 : i32 to vector<8x8xi32>
    %41 = arith.addi %38, %40 : vector<8x8xi32>
    %42 = tpu.iota {dimensions = array<i32: 1>} : vector<8x8xi32>
    %43 = arith.cmpi ne, %41, %42 : vector<8x8xi32>
    %44 = arith.extui %43 : vector<8x8xi1> to vector<8x8xi32>
    %45 = arith.sitofp %44 : vector<8x8xi32> to vector<8x8xf32>
    %46 = arith.mulf %37, %45 : vector<8x8xf32>
    %c0_17 = arith.constant 0 : index
    %c0_18 = arith.constant 0 : index
    %c0_19 = arith.constant 0 : index
    %47 = vector.load %arg5[%c0_17, %c0_18, %c0_19] : memref<1x8x8xbf16, #tpu.memory_space<vmem>>, vector<1x8x8xbf16>
    %48 = vector.shape_cast %47 : vector<1x8x8xbf16> to vector<8x8xbf16>
    %49 = arith.extf %48 : vector<8x8xbf16> to vector<8x8xf32>
    %50 = arith.mulf %37, %49 : vector<8x8xf32>
    %c0_20 = arith.constant 0 : index
    %c0_21 = arith.constant 0 : index
    %51 = vector.load %arg8[%c0_20, %c0_21] : memref<16x32xf32, #tpu.memory_space<vmem>>, vector<16x32xf32>
    %cst = arith.constant dense<0.000000e+00> : vector<8x32xf32>
    %52 = tpu.matmul %6, %51, %cst {dimension_numbers = #tpu.dot_dimension_numbers<[1], [0], [0], [1], [0, 0, 1, 1], [], []>} : vector<8x16xf32>, vector<16x32xf32>, vector<8x32xf32> -> vector<8x32xf32>
    %c0_22 = arith.constant 0 : index
    %c0_23 = arith.constant 0 : index
    %53 = vector.load %arg9[%c0_22, %c0_23] : memref<32x16xf32, #tpu.memory_space<vmem>>, vector<32x16xf32>
    %cst_24 = arith.constant dense<0.000000e+00> : vector<32x8xf32>
    %54 = tpu.matmul %53, %3, %cst_24 {dimension_numbers = #tpu.dot_dimension_numbers<[1], [1], [0], [0], [0, 0, 1, 0], [], []>} : vector<32x16xf32>, vector<8x16xf32>, vector<32x8xf32> -> vector<32x8xf32>
    %55 = vector.shape_cast %52 : vector<8x32xf32> to vector<8x32x1xf32>
    %56 = vector.shape_cast %54 : vector<32x8xf32> to vector<1x32x8xf32>
    %57 = vector.broadcast %55 : vector<8x32x1xf32> to vector<8x32x8xf32>
    %58 = vector.broadcast %56 : vector<1x32x8xf32> to vector<8x32x8xf32>
    %59 = arith.addf %57, %58 : vector<8x32x8xf32>
    %c0_25 = arith.constant 0 : index
    %c0_26 = arith.constant 0 : index
    %60 = vector.load %arg10[%c0_25, %c0_26] : memref<32x1xf32, #tpu.memory_space<vmem>>, vector<32x1xf32>
    %61 = vector.shape_cast %60 : vector<32x1xf32> to vector<1x32x1xf32>
    %62 = vector.shape_cast %30 : vector<8x8xf32> to vector<8x1x8xf32>
    %63 = vector.broadcast %61 : vector<1x32x1xf32> to vector<8x32x8xf32>
    %64 = vector.broadcast %62 : vector<8x1x8xf32> to vector<8x32x8xf32>
    %65 = arith.mulf %63, %64 : vector<8x32x8xf32>
    %66 = arith.addf %59, %65 : vector<8x32x8xf32>
    %c0_27 = arith.constant 0 : index
    %c0_28 = arith.constant 0 : index
    %67 = vector.load %arg11[%c0_27, %c0_28] : memref<32x1xf32, #tpu.memory_space<vmem>>, vector<32x1xf32>
    %68 = vector.shape_cast %67 : vector<32x1xf32> to vector<1x32x1xf32>
    %69 = vector.broadcast %68 : vector<1x32x1xf32> to vector<8x32x8xf32>
    %70 = arith.addf %66, %69 : vector<8x32x8xf32>
    %71 = arith.negf %70 : vector<8x32x8xf32>
    %72 = math.exp %71 : vector<8x32x8xf32>
    %cst_29 = arith.constant 1.000000e+00 : f32
    %73 = vector.broadcast %cst_29 : f32 to vector<8x32x8xf32>
    %74 = arith.addf %73, %72 : vector<8x32x8xf32>
    %75 = arith.divf %73, %74 : vector<8x32x8xf32>
    %76 = arith.mulf %70, %75 : vector<8x32x8xf32>
    %c0_30 = arith.constant 0 : index
    %c0_31 = arith.constant 0 : index
    %77 = vector.load %arg12[%c0_30, %c0_31] : memref<32x32xf32, #tpu.memory_space<vmem>>, vector<32x32xf32>
    %78 = vector.shape_cast %77 : vector<32x32xf32> to vector<1x32x32xf32>
    %79 = vector.broadcast %78 : vector<1x32x32xf32> to vector<8x32x32xf32>
    %cst_32 = arith.constant dense<0.000000e+00> : vector<8x32x8xf32>
    %80 = tpu.matmul %79, %76, %cst_32 {dimension_numbers = #tpu.dot_dimension_numbers<[2], [1], [1], [2], [0, 0, 0, 1, 1, 2], [0], [0]>} : vector<8x32x32xf32>, vector<8x32x8xf32>, vector<8x32x8xf32> -> vector<8x32x8xf32>
    %c0_33 = arith.constant 0 : index
    %c0_34 = arith.constant 0 : index
    %81 = vector.load %arg13[%c0_33, %c0_34] : memref<32x1xf32, #tpu.memory_space<vmem>>, vector<32x1xf32>
    %82 = vector.shape_cast %81 : vector<32x1xf32> to vector<1x32x1xf32>
    %83 = vector.broadcast %82 : vector<1x32x1xf32> to vector<8x32x8xf32>
    %84 = arith.addf %80, %83 : vector<8x32x8xf32>
    %85 = arith.negf %84 : vector<8x32x8xf32>
    %86 = math.exp %85 : vector<8x32x8xf32>
    %cst_35 = arith.constant 1.000000e+00 : f32
    %87 = vector.broadcast %cst_35 : f32 to vector<8x32x8xf32>
    %88 = arith.addf %87, %86 : vector<8x32x8xf32>
    %89 = arith.divf %87, %88 : vector<8x32x8xf32>
    %90 = arith.mulf %84, %89 : vector<8x32x8xf32>
    %c0_36 = arith.constant 0 : index
    %c0_37 = arith.constant 0 : index
    %91 = vector.load %arg14[%c0_36, %c0_37] : memref<32x32xf32, #tpu.memory_space<vmem>>, vector<32x32xf32>
    %92 = vector.shape_cast %91 : vector<32x32xf32> to vector<1x32x32xf32>
    %93 = vector.broadcast %92 : vector<1x32x32xf32> to vector<8x32x32xf32>
    %cst_38 = arith.constant dense<0.000000e+00> : vector<8x32x8xf32>
    %94 = tpu.matmul %93, %90, %cst_38 {dimension_numbers = #tpu.dot_dimension_numbers<[2], [1], [1], [2], [0, 0, 0, 1, 1, 2], [0], [0]>} : vector<8x32x32xf32>, vector<8x32x8xf32>, vector<8x32x8xf32> -> vector<8x32x8xf32>
    %c0_39 = arith.constant 0 : index
    %c0_40 = arith.constant 0 : index
    %95 = vector.load %arg15[%c0_39, %c0_40] : memref<32x1xf32, #tpu.memory_space<vmem>>, vector<32x1xf32>
    %96 = vector.shape_cast %95 : vector<32x1xf32> to vector<1x32x1xf32>
    %97 = vector.broadcast %96 : vector<1x32x1xf32> to vector<8x32x8xf32>
    %98 = arith.addf %94, %97 : vector<8x32x8xf32>
    %99 = arith.negf %98 : vector<8x32x8xf32>
    %100 = math.exp %99 : vector<8x32x8xf32>
    %cst_41 = arith.constant 1.000000e+00 : f32
    %101 = vector.broadcast %cst_41 : f32 to vector<8x32x8xf32>
    %102 = arith.addf %101, %100 : vector<8x32x8xf32>
    %103 = arith.divf %101, %102 : vector<8x32x8xf32>
    %104 = arith.mulf %98, %103 : vector<8x32x8xf32>
    %c0_42 = arith.constant 0 : index
    %c0_43 = arith.constant 0 : index
    %105 = vector.load %arg16[%c0_42, %c0_43] : memref<32x1xf32, #tpu.memory_space<vmem>>, vector<32x1xf32>
    %106 = vector.shape_cast %105 : vector<32x1xf32> to vector<1x32x1xf32>
    %107 = vector.broadcast %106 : vector<1x32x1xf32> to vector<8x32x8xf32>
    %108 = arith.mulf %104, %107 : vector<8x32x8xf32>
    %cst_44 = arith.constant dense<0.000000e+00> : vector<8x8xf32>
    %109 = vector.multi_reduction <add>, %108, %cst_44 [1] : vector<8x32x8xf32> to vector<8x8xf32>
    %110 = vector.shape_cast %50 : vector<8x8xf32> to vector<8x1x8xf32>
    %111 = vector.broadcast %110 : vector<8x1x8xf32> to vector<8x32x8xf32>
    %112 = arith.mulf %90, %111 : vector<8x32x8xf32>
    %cst_45 = arith.constant dense<0.000000e+00> : vector<8x32xf32>
    %113 = vector.multi_reduction <add>, %112, %cst_45 [2] : vector<8x32x8xf32> to vector<8x32xf32>
    %114 = vector.extract_strided_slice %34 {offsets = [0, 0], sizes = [1, 1], strides = [1, 1]} : vector<1x8xf32> to vector<1x1xf32>
    %cst_46 = arith.constant dense<0.000000e+00> : vector<1xf32>
    %115 = vector.multi_reduction <add>, %34, %cst_46 [1] : vector<1x8xf32> to vector<1xf32>
    %116 = vector.shape_cast %115 : vector<1xf32> to vector<1x1xf32>
    %117 = arith.subf %116, %114 : vector<1x1xf32>
    %118 = arith.mulf %114, %117 : vector<1x1xf32>
    %119 = arith.mulf %109, %46 : vector<8x8xf32>
    %120 = arith.mulf %119, %15 : vector<8x8xf32>
    %cst_47 = arith.constant -1.000000e+02 : f32
    %cst_48 = arith.constant 1.000000e+02 : f32
    %121 = vector.broadcast %cst_47 : f32 to vector<8x8xf32>
    %122 = arith.maximumf %121, %120 : vector<8x8xf32>
    %123 = vector.broadcast %cst_48 : f32 to vector<8x8xf32>
    %124 = arith.minimumf %123, %122 : vector<8x8xf32>
    %cst_49 = arith.constant dense<0.000000e+00> : vector<8xf32>
    %125 = vector.multi_reduction <add>, %124, %cst_49 [1] : vector<8x8xf32> to vector<8xf32>
    %126 = vector.shape_cast %125 : vector<8xf32> to vector<8x1xf32>
    %127 = arith.mulf %119, %20 : vector<8x8xf32>
    %cst_50 = arith.constant -1.000000e+02 : f32
    %cst_51 = arith.constant 1.000000e+02 : f32
    %128 = vector.broadcast %cst_50 : f32 to vector<8x8xf32>
    %129 = arith.maximumf %128, %127 : vector<8x8xf32>
    %130 = vector.broadcast %cst_51 : f32 to vector<8x8xf32>
    %131 = arith.minimumf %130, %129 : vector<8x8xf32>
    %cst_52 = arith.constant dense<0.000000e+00> : vector<8xf32>
    %132 = vector.multi_reduction <add>, %131, %cst_52 [1] : vector<8x8xf32> to vector<8xf32>
    %133 = vector.shape_cast %132 : vector<8xf32> to vector<8x1xf32>
    %134 = arith.mulf %119, %25 : vector<8x8xf32>
    %cst_53 = arith.constant -1.000000e+02 : f32
    %cst_54 = arith.constant 1.000000e+02 : f32
    %135 = vector.broadcast %cst_53 : f32 to vector<8x8xf32>
    %136 = arith.maximumf %135, %134 : vector<8x8xf32>
    %137 = vector.broadcast %cst_54 : f32 to vector<8x8xf32>
    %138 = arith.minimumf %137, %136 : vector<8x8xf32>
    %cst_55 = arith.constant dense<0.000000e+00> : vector<8xf32>
    %139 = vector.multi_reduction <add>, %138, %cst_55 [1] : vector<8x8xf32> to vector<8xf32>
    %140 = vector.shape_cast %139 : vector<8xf32> to vector<8x1xf32>
    %141 = tpu.concatenate %126, %133, %140 in 1 : vector<8x1xf32>, vector<8x1xf32>, vector<8x1xf32> -> vector<8x3xf32>
    %142 = vector.broadcast %118 : vector<1x1xf32> to vector<8x3xf32>
    %143 = arith.mulf %142, %141 : vector<8x3xf32>
    %144 = tpu.concatenate %6, %113 in 1 : vector<8x16xf32>, vector<8x32xf32> -> vector<8x48xf32>
    %c0_56 = arith.constant 0 : index
    %c0_57 = arith.constant 0 : index
    %145 = vector.load %arg17[%c0_56, %c0_57] : memref<48x32xf32, #tpu.memory_space<vmem>>, vector<48x32xf32>
    %cst_58 = arith.constant dense<0.000000e+00> : vector<8x32xf32>
    %146 = tpu.matmul %144, %145, %cst_58 {dimension_numbers = #tpu.dot_dimension_numbers<[1], [0], [0], [1], [0, 0, 1, 1], [], []>} : vector<8x48xf32>, vector<48x32xf32>, vector<8x32xf32> -> vector<8x32xf32>
    %c0_59 = arith.constant 0 : index
    %c0_60 = arith.constant 0 : index
    %147 = vector.load %arg18[%c0_59, %c0_60] : memref<1x32xf32, #tpu.memory_space<vmem>>, vector<1x32xf32>
    %148 = vector.broadcast %147 : vector<1x32xf32> to vector<8x32xf32>
    %149 = arith.addf %146, %148 : vector<8x32xf32>
    %150 = arith.negf %149 : vector<8x32xf32>
    %151 = math.exp %150 : vector<8x32xf32>
    %cst_61 = arith.constant 1.000000e+00 : f32
    %152 = vector.broadcast %cst_61 : f32 to vector<8x32xf32>
    %153 = arith.addf %152, %151 : vector<8x32xf32>
    %154 = arith.divf %152, %153 : vector<8x32xf32>
    %155 = arith.mulf %149, %154 : vector<8x32xf32>
    %c0_62 = arith.constant 0 : index
    %c0_63 = arith.constant 0 : index
    %156 = vector.load %arg19[%c0_62, %c0_63] : memref<32x16xf32, #tpu.memory_space<vmem>>, vector<32x16xf32>
    %cst_64 = arith.constant dense<0.000000e+00> : vector<8x16xf32>
    %157 = tpu.matmul %155, %156, %cst_64 {dimension_numbers = #tpu.dot_dimension_numbers<[1], [0], [0], [1], [0, 0, 1, 1], [], []>} : vector<8x32xf32>, vector<32x16xf32>, vector<8x16xf32> -> vector<8x16xf32>
    %c0_65 = arith.constant 0 : index
    %c0_66 = arith.constant 0 : index
    %158 = vector.load %arg20[%c0_65, %c0_66] : memref<1x16xf32, #tpu.memory_space<vmem>>, vector<1x16xf32>
    %159 = vector.broadcast %158 : vector<1x16xf32> to vector<8x16xf32>
    %160 = arith.addf %157, %159 : vector<8x16xf32>
    %161 = vector.broadcast %32 : vector<8x1xf32> to vector<8x16xf32>
    %162 = arith.mulf %160, %161 : vector<8x16xf32>
    %c0_67 = arith.constant 0 : index
    %c0_68 = arith.constant 0 : index
    %c0_69 = arith.constant 0 : index
    %163 = vector.load %arg21[%c0_67, %c0_68, %c0_69] : memref<1x8x16xf32, #tpu.memory_space<vmem>>, vector<1x8x16xf32>
    %164 = vector.shape_cast %163 : vector<1x8x16xf32> to vector<8x16xf32>
    %165 = vector.shape_cast %162 : vector<8x16xf32> to vector<1x8x16xf32>
    tpu.vector_store %arg21[%c0_67, %c0_68, %c0_69], %165 {strides = array<i32>} : memref<1x8x16xf32, #tpu.memory_space<vmem>>, vector<1x8x16xf32>,
    %166 = vector.broadcast %32 : vector<8x1xf32> to vector<8x3xf32>
    %167 = arith.mulf %143, %166 : vector<8x3xf32>
    %c0_70 = arith.constant 0 : index
    %c0_71 = arith.constant 0 : index
    %c0_72 = arith.constant 0 : index
    %168 = vector.load %arg22[%c0_70, %c0_71, %c0_72] : memref<1x8x3xf32, #tpu.memory_space<vmem>>, vector<1x8x3xf32>
    %169 = vector.shape_cast %168 : vector<1x8x3xf32> to vector<8x3xf32>
    %170 = vector.shape_cast %167 : vector<8x3xf32> to vector<1x8x3xf32>
    tpu.vector_store %arg22[%c0_70, %c0_71, %c0_72], %170 {strides = array<i32>} : memref<1x8x3xf32, #tpu.memory_space<vmem>>, vector<1x8x3xf32>,
    return
  }
  func.func @transform_0(%arg0: i32, %arg1: i32) -> (i32, i32, i32) {
    %c0_i32 = arith.constant 0 : i32
    %c0_i32_0 = arith.constant 0 : i32
    %c0_i32_1 = arith.constant 0 : i32
    return %arg0, %c0_i32, %c0_i32_0 : i32, i32, i32
  }
  func.func @transform_1(%arg0: i32, %arg1: i32) -> (i32, i32, i32) {
    %c0_i32 = arith.constant 0 : i32
    %c0_i32_0 = arith.constant 0 : i32
    return %arg0, %arg1, %c0_i32 : i32, i32, i32
  }
  func.func @transform_2(%arg0: i32, %arg1: i32) -> (i32, i32, i32) {
    %c0_i32 = arith.constant 0 : i32
    %c0_i32_0 = arith.constant 0 : i32
    %c0_i32_1 = arith.constant 0 : i32
    return %arg0, %c0_i32, %c0_i32_0 : i32, i32, i32
  }
  func.func @transform_3(%arg0: i32, %arg1: i32) -> (i32, i32, i32) {
    %c0_i32 = arith.constant 0 : i32
    %c0_i32_0 = arith.constant 0 : i32
    return %arg0, %arg1, %c0_i32 : i32, i32, i32
  }
  func.func @transform_4(%arg0: i32, %arg1: i32) -> (i32, i32, i32) {
    %c0_i32 = arith.constant 0 : i32
    %c0_i32_0 = arith.constant 0 : i32
    return %arg0, %arg1, %c0_i32 : i32, i32, i32
  }
  func.func @transform_5(%arg0: i32, %arg1: i32) -> (i32, i32, i32) {
    %c0_i32 = arith.constant 0 : i32
    %c0_i32_0 = arith.constant 0 : i32
    %c0_i32_1 = arith.constant 0 : i32
    return %arg0, %c0_i32, %c0_i32_0 : i32, i32, i32
  }
  func.func @transform_6(%arg0: i32, %arg1: i32) -> (i32, i32) {
    %c0_i32 = arith.constant 0 : i32
    %c0_i32_0 = arith.constant 0 : i32
    %c0_i32_1 = arith.constant 0 : i32
    return %c0_i32, %c0_i32_0 : i32, i32
  }
  func.func @transform_7(%arg0: i32, %arg1: i32) -> (i32, i32) {
    %c0_i32 = arith.constant 0 : i32
    %c0_i32_0 = arith.constant 0 : i32
    %c0_i32_1 = arith.constant 0 : i32
    return %c0_i32, %c0_i32_0 : i32, i32
  }
  func.func @transform_8(%arg0: i32, %arg1: i32) -> (i32, i32) {
    %c0_i32 = arith.constant 0 : i32
    %c0_i32_0 = arith.constant 0 : i32
    %c0_i32_1 = arith.constant 0 : i32
    return %c0_i32, %c0_i32_0 : i32, i32
  }
  func.func @transform_9(%arg0: i32, %arg1: i32) -> (i32, i32) {
    %c0_i32 = arith.constant 0 : i32
    %c0_i32_0 = arith.constant 0 : i32
    %c0_i32_1 = arith.constant 0 : i32
    return %c0_i32, %c0_i32_0 : i32, i32
  }
  func.func @transform_10(%arg0: i32, %arg1: i32) -> (i32, i32) {
    %c0_i32 = arith.constant 0 : i32
    %c0_i32_0 = arith.constant 0 : i32
    %c0_i32_1 = arith.constant 0 : i32
    return %c0_i32, %c0_i32_0 : i32, i32
  }
  func.func @transform_11(%arg0: i32, %arg1: i32) -> (i32, i32) {
    %c0_i32 = arith.constant 0 : i32
    %c0_i32_0 = arith.constant 0 : i32
    %c0_i32_1 = arith.constant 0 : i32
    return %c0_i32, %c0_i32_0 : i32, i32
  }
  func.func @transform_12(%arg0: i32, %arg1: i32) -> (i32, i32) {
    %c0_i32 = arith.constant 0 : i32
    %c0_i32_0 = arith.constant 0 : i32
    %c0_i32_1 = arith.constant 0 : i32
    return %c0_i32, %c0_i32_0 : i32, i32
  }
  func.func @transform_13(%arg0: i32, %arg1: i32) -> (i32, i32) {
    %c0_i32 = arith.constant 0 : i32
    %c0_i32_0 = arith.constant 0 : i32
    %c0_i32_1 = arith.constant 0 : i32
    return %c0_i32, %c0_i32_0 : i32, i32
  }
  func.func @transform_14(%arg0: i32, %arg1: i32) -> (i32, i32) {
    %c0_i32 = arith.constant 0 : i32
    %c0_i32_0 = arith.constant 0 : i32
    %c0_i32_1 = arith.constant 0 : i32
    return %c0_i32, %c0_i32_0 : i32, i32
  }
  func.func @transform_15(%arg0: i32, %arg1: i32) -> (i32, i32) {
    %c0_i32 = arith.constant 0 : i32
    %c0_i32_0 = arith.constant 0 : i32
    %c0_i32_1 = arith.constant 0 : i32
    return %c0_i32, %c0_i32_0 : i32, i32
  }
  func.func @transform_16(%arg0: i32, %arg1: i32) -> (i32, i32) {
    %c0_i32 = arith.constant 0 : i32
    %c0_i32_0 = arith.constant 0 : i32
    %c0_i32_1 = arith.constant 0 : i32
    return %c0_i32, %c0_i32_0 : i32, i32
  }
  func.func @transform_17(%arg0: i32, %arg1: i32) -> (i32, i32) {
    %c0_i32 = arith.constant 0 : i32
    %c0_i32_0 = arith.constant 0 : i32
    %c0_i32_1 = arith.constant 0 : i32
    return %c0_i32, %c0_i32_0 : i32, i32
  }
  func.func @transform_18(%arg0: i32, %arg1: i32) -> (i32, i32) {
    %c0_i32 = arith.constant 0 : i32
    %c0_i32_0 = arith.constant 0 : i32
    %c0_i32_1 = arith.constant 0 : i32
    return %c0_i32, %c0_i32_0 : i32, i32
  }
  func.func @transform_19(%arg0: i32, %arg1: i32) -> (i32, i32, i32) {
    %c0_i32 = arith.constant 0 : i32
    %c0_i32_0 = arith.constant 0 : i32
    return %arg0, %arg1, %c0_i32 : i32, i32, i32
  }
  func.func @transform_20(%arg0: i32, %arg1: i32) -> (i32, i32, i32) {
    %c0_i32 = arith.constant 0 : i32
    %c0_i32_0 = arith.constant 0 : i32
    return %arg0, %arg1, %c0_i32 : i32, i32, i32
  }
}

</mosaic_0001>

<bundles_post_ra>
// kernel: tpu_custom_call.1
= control target key start
LH: loop header
LB: loop body
LE: loop exit
PB: predicated region body
PF: predicated region fallthrough
CT: control target
= control target key end

     0   :  { %s7744_s0 = inlined_call_operand.vmem [shape: f32[2,8,16], index: 0, kind: input, shape index: {}]   ;;  %s7745_s1 = inlined_call_operand.vmem [shape: f32[2,8,3], index: 1, kind: input, shape index: {}]   ;;  %s7746_s2 = inlined_call_operand.vmem [shape: f32[2,3,8], index: 2, kind: input, shape index: {}]   ;;  %s7747_s3 = inlined_call_operand.vmem [shape: bf16[2,8,8], index: 3, kind: input, shape index: {}]   ;;  %s7748_s4 = inlined_call_operand.vmem [shape: f32[2,8,1], index: 4, kind: input, shape index: {}]   ;;  %s7749_s5 = inlined_call_operand.vmem [shape: f32[2,1,8], index: 5, kind: input, shape index: {}]   ;;  %s7750_s6 = inlined_call_operand.vmem [shape: f32[16,32], index: 6, kind: input, shape index: {}]   ;;  %s7751_s7 = inlined_call_operand.vmem [shape: f32[32,16], index: 7, kind: input, shape index: {}]   ;;  %s7752_s8 = inlined_call_operand.vmem [shape: f32[32,1], index: 8, kind: input, shape index: {}]   ;;  %s7753_s9 = inlined_call_operand.vmem [shape: f32[32,1], index: 9, kind: input, shape index: {}]   ;;  %s7754_s10 = inlined_call_operand.vmem [shape: f32[32,32], index: 10, kind: input, shape index: {}]   ;;  %s7755_s11 = inlined_call_operand.vmem [shape: f32[32,1], index: 11, kind: input, shape index: {}]   ;;  %s7756_s12 = inlined_call_operand.vmem [shape: f32[32,32], index: 12, kind: input, shape index: {}]   ;;  %s7757_s13 = inlined_call_operand.vmem [shape: f32[32,1], index: 13, kind: input, shape index: {}]   ;;  %s7758_s14 = inlined_call_operand.vmem [shape: f32[32,1], index: 14, kind: input, shape index: {}]   ;;  %s7759_s15 = inlined_call_operand.vmem [shape: f32[48,32], index: 15, kind: input, shape index: {}]   ;;  %s7760_s16 = inlined_call_operand.vmem [shape: f32[1,32], index: 16, kind: input, shape index: {}]   ;;  %s7761_s17 = inlined_call_operand.vmem [shape: f32[32,16], index: 17, kind: input, shape index: {}]   ;;  %s7762_s18 = inlined_call_operand.vmem [shape: f32[1,16], index: 18, kind: input, shape index: {}]   ;;  %s7763_s19 = inlined_call_operand.hbm [shape: f32[2,8,16], index: 19, kind: output, shape index: {0}]   ;;  %s7764_s20 = inlined_call_operand.vmem [shape: f32[2,8,3], index: 20, kind: output, shape index: {1}]  }
   0x1   :  { %7781 = sst [smem:[#allocation15_spill]] %s7744_s0 }
   0x2   :  { %7782 = sst [smem:[#allocation16_spill]] %s7745_s1 }
   0x3   :  { %7783 = sst [smem:[#allocation17_spill]] %s7746_s2 }
   0x4   :  { %7784 = sst [smem:[#allocation18_spill]] %s7747_s3 }
   0x5   :  { %7785 = sst [smem:[#allocation19_spill]] %s7748_s4 }
   0x6   :  { %7786 = sst [smem:[#allocation20_spill]] %s7750_s6 }
   0x7   :  { %7787 = sst [smem:[#allocation21_spill]] %s7751_s7 }
   0x8   :  { %7788 = sst [smem:[#allocation22_spill]] %s7752_s8 }
   0x9   :  { %7789 = sst [smem:[#allocation23_spill]] %s7753_s9 }
   0xa   :  { %26 = vsyncpa [#allocation3], 0 }
   0xb   :  { %28 = vsyncpa [#allocation3 + $0x1], 0  ;;  %s6027_s1 = smov 0   ;;  %s6029_s22 = smov 0  }
   0xc   :  { %s6031_s23 = smov 0   ;;  %s6033_s24 = smov 0  }
   0xd   :  { %s6035_s2 = smov 0   ;;  %s6037_s25 = smov 0  }
   0xe LB: > { %7790 = sst [smem:[#allocation5_spill]] %s5893_s1  ;;  %s4753_s3 = sadd.s32 4294967295, %s5913_s25   ;;  %s5913_s25 = sphi %s6037_s25, %s34_s25   ;;  %s5909_s2 = sphi %s6035_s2, %s7823_s2   ;;  %s5905_s24 = sphi %s6033_s24, %s7826_s24   ;;  %s5901_s23 = sphi %s6031_s23, %s7821_s23   ;;  %s5897_s22 = sphi %s6029_s22, %s7825_s22   ;;  %s5893_s1 = sphi %s6027_s1, %s7824_s1  }
   0xf   : > { %7791 = sst [smem:[#allocation6_spill]] %s5901_s23  ;;  %s4754_s26 = sadd.s32 4294967294, %s5913_s25  }
  0x10   : > { %7792 = sst [smem:[#allocation7_spill]] %s5909_s2  ;;  %s46_s27 = sadd.s32 1, %s5909_s2 }
  0x11   : > { %7793 = sst [smem:[#allocation8_spill]] %s5913_s25  ;;  %s490_s28 = sadd.s32 1, %s5901_s23 }
  0x12   : > { %p48_p0 = scmp.ge.s32.totalorder %s46_s27, 2  ;;  %p500_p1 = scmp.ne.s32.totalorder %s5901_s23, %s5897_s22 }
  0x13   : > { %p501_p2 = scmp.eq.s32.totalorder %s4753_s3, 1  ;;  %p506_p3 = scmp.ne.s32.totalorder %s5897_s22, %s5893_s1 }
  0x14   : > { %s7828_s27 = smov (%p48_p0, %s46_s27), 0  ;;  %p507_p5 = scmp.eq.s32.totalorder %s4754_s26, 1 }
  0x15   : > { %7794 = sst [smem:[#allocation9_spill]] %s7828_s27  ;;  %p6067_p4 = por %p501_p2, %p500_p1 }
  0x16   : > { %s485_s29 = ssub.s32 %s5909_s2, %s7828_s27  ;;  %p4757_p6 = scmp.ge.s32.totalorder %s5913_s25, 1 }
  0x17   : > { %p488_p7 = scmp.eq.s32.totalorder %s485_s29, 0  ;;  %p6074_p8 = por %p507_p5, %p506_p3 }
  0x18   : > { %p642_p9 = scmp.lt.s32.totalorder %s5913_s25, 3 }
  0x19   : > { %s7796_s30 = scalar_select %p6074_p8, 1, 0 }
  0x1a   : > { %s6080_s0 = scalar_select %p488_p7, %s5901_s23, %s490_s28  }
  0x1b   : > { %7797 = sst [smem:[#allocation10_spill]] %s7796_s30  ;;  %p643_p10 = pnand %p4757_p6, %p642_p9 }
  0x1c   : > { %7798 = sst [smem:[#allocation11_spill]] %s6080_s0 }
  0x1d   : > { %646 = sbr.rel (%p643_p10) target bundleno = 1304 (0x518), region = 96 }
  0x22   : > { %s7799_s6 = sld [smem:[#allocation20_spill]]  ;;  %p734_p11 = scmp.lt.s32.totalorder %s5905_s24, 1  ;;  %v7773_v1 = vmov 0.0   ;;  %vm5916_vm0 = vmmov 0   ;;  %vm841_vm1 = vcmask 130048   ;;  %v5917_v5 = vmov 1  }
  0x23   : > { %5113 = vmatprep.subr.mxu0 %v7773_v1  ;;  %5117 = vmatprep.mubr.msk.f32.mxu0 %vm5916_vm0, %v7773_v1  ;;  %s7800_s7 = sld [smem:[#allocation21_spill]]  ;;  %v5918_v6 = vmov 0   ;;  %v5919_v11 = vmov 2   ;;  %v7772_v20 = vlaneseq  ;;  %v6172_v40 = vld [vmem:[%s7754_s10] sm:$0xff]  ;;  %vm1689_vm2 = vcmask 261120   ;;  %v1666_v41 = vld [vmem:[%s7755_s11 + $0x8] sm:$0xff] }
  0x24   : > { %s6096_s21 = scalar_select %p734_p11, %s5905_s24, 1  ;;  %5439 = vset.pattern.permute.xlu0 %v5917_v5  ;;  %5441 = vset.pattern.permute.xlu1 %v5918_v6  ;;  %v1665_v42 = vld [vmem:[%s7755_s11] sm:$0xff]  ;;  %v1668_v43 = vld [vmem:[%s7755_s11 + $0x18] sm:$0xff]  ;;  %v1667_v44 = vld [vmem:[%s7755_s11 + $0x10] sm:$0xff]  ;;  %v5920_v56 = vmov 1966171168  }
  0x25   : > { %s7801_s8 = sld [smem:[#allocation22_spill]]  ;;  %v6154_v21 = vshrl.u32 %v7772_v20, 7  ;;  %v1210_v57 = vunpack.c.l.s4 %v5920_v56  ;;  %vm3606_vm3 = vcmask 64512   ;;  %vm3929_vm4 = vcmask 57344  }
  0x26   : > { %s6104_s26 = sshll.u32 %s6096_s21, 3  ;;  %s7802_s28 = sld [smem:[#allocation15_spill]]  ;;  %vm4220_vm5 = vcmask 261312   ;;  %vm4227_vm6 = vcmask 326912   ;;  %vm4234_vm7 = vcmask 392512   ;;  %vm4008_vm8 = vcmask 1041409  }
  0x27   : > { %s7803_s2 = sld [smem:[#allocation16_spill]]  ;;  %v795_v22 = vsub.s32 1, %v6154_v21  ;;  %v6158_v23 = vsub.s32 0, %v6154_v21  ;;  %v1078_v28 = vsub.s32 3, %v6154_v21  ;;  %v804_v29 = vsub.s32 2, %v6154_v21  ;;  %s4761_s23 = sshll.u32 %s6096_s21, 2 }
  0x28   : > { %v840_v0 = vld [vmem:[%s7799_s6 + $0x8] sm:$0xff]  ;;  %v839_v2 = vld [vmem:[%s7799_s6] sm:$0xff]  ;;  %s7804_s9 = sld [smem:[#allocation23_spill]]  ;;  %v1116_v32 = vsub.s32 5, %v6154_v21  ;;  %v1097_v33 = vsub.s32 4, %v6154_v21  ;;  %v1154_v36 = vsub.s32 7, %v6154_v21  ;;  %v1211_v62 = vunpack.c.0.s8 %v1210_v57 }
  0x29   : > { %v915_v3 = vld [vmem:[%s7800_s7] sm:$0xff]  ;;  %5114 = vmatpush3.msra.mxu0 %v840_v0  ;;  %v916_v9 = vld [vmem:[%s7800_s7 + $0x8] sm:$0xff]  ;;  %v917_v10 = vld [vmem:[%s7800_s7 + $0x10] sm:$0xff]  ;;  %v1135_v37 = vsub.s32 6, %v6154_v21  ;;  %s7805_s27 = sld [smem:[#allocation19_spill]]  ;;  %vm4011_vm9 = vcmask 1042434  }
  0x2a   : > { %5122 = vmatprep.mubr.msk.f32.mxu1 %vm841_vm1, %v915_v3  ;;  %5115 = vmatprep.subr.mxu0 %v7773_v1  ;;  %v918_v12 = vld [vmem:[%s7800_s7 + $0x18] sm:$0xff]  ;;  %v6222_v3 = vsub.s32 %v1211_v62, %v6154_v21  ;;  %vm4014_vm10 = vcmask 1043459   ;;  %vm4017_vm11 = vcmask 1044484   ;;  %vm4020_vm12 = vcmask 1045509  }
  0x2b   : > { %v1206_v4 = vld [vmem:[%s7801_s8 + $0x18] sm:$0xff]  ;;  %5116 = vmatpush3.msra.mxu0 %v839_v2  ;;  %v1205_v13 = vld [vmem:[%s7801_s8 + $0x10] sm:$0xff]  ;;  %v1204_v14 = vld [vmem:[%s7801_s8 + $0x8] sm:$0xff]  ;;  %vm4023_vm13 = vcmask 1046534   ;;  %vm4026_vm14 = vcmask 1047559   ;;  %vm4391_vm15 = vcmask 392192  }
  0x2c   : > { %s6110_s6 = scalar_lea.vmem %s7802_s28, %s6104_s26  ;;  %1274 = vperm.xlu1 %5441, %v1206_v4   ;;  %v1203_v17 = vld [vmem:[%s7801_s8] sm:$0xff]  ;;  %s6681_s8 = scalar_lea.vmem %s7749_s5, %s6096_s21 }
  0x2d   : > { %s744_s3 = scalar_lea.vmem %s7803_s2, %s6104_s26  ;;  %v776_v7 = vld [vmem:[%s6110_s6] sm:$0xff]  ;;  %s7810_s28 = sld [smem:[#allocation18_spill]] }
  0x2e   : > { %v777_v8 = vld [vmem:[%s744_s3] sm:$0xff]  ;;  %5118 = vmatmul.mubr.msk.f32.vlgmr.msra.gmra.mxu0 %vm841_vm1, %v776_v7  ;;  %5120 = vmatprep.subr.msk.mxu1 %vm841_vm1, %v776_v7  ;;  %v1384_v15 = vld [vmem:[%s7804_s9 + $0x18] sm:$0xff]  ;;  %v1383_v16 = vld [vmem:[%s7804_s9 + $0x10] sm:$0xff]  ;;  %s772_s3 = scalar_lea.vmem %s7764_s20, %s6104_s26 }
  0x2f   : > { %5121 = vmatpush3.xpose.msk.msra.mxu1 %vm841_vm1, %v776_v7  ;;  %790 = vperm.xlu0 %5439, %v777_v8   ;;  %v1381_v18 = vld [vmem:[%s7804_s9] sm:$0xff]  ;;  %v1382_v19 = vld [vmem:[%s7804_s9 + $0x8] sm:$0xff]  ;;  %s762_s29 = scalar_lea.vmem %s7805_s27, %s6104_s26  ;;  %s7806_s9 = sld [smem:[#allocation17_spill]] }
  0x30   : > { %5442 = vset.pattern.permute.xlu1 %v5919_v11  ;;  %5136 = vmatprep.mubr.msk.f32.mxu0 %vm1689_vm2, %v6172_v40  ;;  %v812_v45 = vld [vmem:[%s762_s29] sm:$0xff]  ;;  %s722_s27 = sand.u32 1, %s5897_s22  }
  0x31   : > { %799 = vperm.xlu1 %5442, %v777_v8   ;;  %s4758_s29 = sshll.u32 %s722_s27, 3 }
  0x32   : > { %5123 = vmatmul.mubr.msk.f32.vlgmr.msra.gmra.mxu1 %vm841_vm1, %v916_v9 }
  0x33   : > { %5125 = vmatprep.mubr.msk.f32.mxu1 %vm841_vm1, %v917_v10  ;;  %5440 = vset.pattern.permute.xlu0 %v5918_v6  ;;  %s755_s1 = scalar_lea.vmem %s7810_s28, %s4761_s23 }
  0x34   : > { %781 = vperm.xlu0 %5440, %v777_v8  }
  0x35   : > { %5443 = vset.pattern.permute.xlu1 %v5918_v6  ;;  %s748_s25 = scalar_lea.vmem %s7806_s9, %s4761_s23  ;;  %s4962_s9 = sshll.u32 %s5905_s24, 7 }
  0x36   : > { %5126 = vmatmul.mubr.msk.f32.gmra.mxu1 %vm841_vm1, %v918_v12  ;;  %1269 = vperm.xlu1 %5443, %v1205_v13   ;;  %v778_v47 = vld [vmem:[%s748_s25] sm:$0x7]  ;;  %s724_s25 = scalar_lea.vmem [#allocation2], %s4758_s29  ;;  %s4581_s21 = scalar_lea.hbm %s7763_s19, %s4962_s9 }
  0x37   : > { %5150 = vmatprep.mubr.msk.f32.mxu1 %vm1689_vm2, %v6172_v40  ;;  %v796_v49 = vrot.slane %v778_v47, %v795_v22  ;;  %v787_v50 = vrot.slane %v778_v47, %v6158_v23  ;;  %v805_v54 = vrot.slane %v778_v47, %v804_v29  ;;  %s4583_s28 = sshll.u32 %s724_s25, 4  ;;  %s4562_s23 = scalar_lea.sflag [#allocation3], %s722_s27  ;;  %s4584_s28 = int_to_ptr.vmem [resolvable:$true] %s4583_s28 }
  0x38   : > { %1264 = vperm.xlu0 %5440, %v1204_v14   ;;  %s5837_s30 = scalar_lea.vmem %s4584_s28, 128  ;;  %s5921_s24 = smov [#allocation2]  }
  0x39   : > { %p5838_p12 = scmp.ne.s32.totalorder %s4584_s28, %s5837_s30  ;;  %s5841_s2 = sshll.u32 %s5921_s24, 4  ;;  %s5842_s2 = int_to_ptr.vmem [resolvable:$false] %s5841_s2 }
  0x3a   : > { %1402 = vperm.xlu1 %5443, %v1384_v15   ;;  %p5844_p1 = scmp.lt.s32.totalorder %s4584_s28, %s5842_s2 }
  0x3b   : > { %p5839_p13 = pnand %p5838_p12, %p6067_p4 }
  0x3c   : > { %1397 = vperm.xlu0 %5440, %v1383_v16  }
  0x3d   : > { %p5840_p0 = pneg %p5839_p13 }
  0x3e   : > { %1259 = vperm.xlu1 %5443, %v1203_v17  }
  0x40   : > { %1387 = vperm.xlu0 %5440, %v1381_v18  }
  0x42   : > { %1392 = vperm.xlu1 %5443, %v1382_v19  }
  0xa7   : > { %v6200_v48 = vpop.permute.xlu1 %1274 }
  0xaa   : > { %v791_v46 = vpop.permute.xlu0 %790 }
  0xab   : > { %v6205_v52 = vsub.f32 %v791_v46, %v796_v49 }
  0xac   : > { %v800_v55 = vpop.permute.xlu1 %799 }
  0xad   : > { %7807 = vst [vmem:[#allocation12_spill] sm:$0xff] %v6205_v52  ;;  %v6209_v58 = vsub.f32 %v800_v55, %v805_v54  ;;  %v808_v60 = vmul.f32 %v6205_v52, %v6205_v52 }
  0xaf   : > { %v782_v51 = vpop.permute.xlu0 %781  ;;  %7809 = vst [vmem:[#allocation14_spill] sm:$0xff] %v6209_v58  ;;  %v810_v0 = vmul.f32 %v6209_v58, %v6209_v58 }
  0xb0   : > { %v6207_v53 = vsub.f32 %v782_v51, %v787_v50 }
  0xb1   : > { %v6215_v61 = vpop.permute.xlu1 %1269 }
  0xb2   : > { %7808 = vst [vmem:[#allocation13_spill] sm:$0xff] %v6207_v53  ;;  %v807_v59 = vmul.f32 %v6207_v53, %v6207_v53 }
  0xb3   : > { %v6219_v2 = vpop.permute.xlu0 %1264 }
  0xb4   : > { %v809_v63 = vadd.f32 %v808_v60, %v807_v59 }
  0xb5   : > { %v6224_v4 = vpop.permute.xlu1 %1402 }
  0xb6   : > { %v811_v5 = vadd.f32 %v810_v0, %v809_v63 }
  0xb7   : > { %v6227_v7 = vpop.permute.xlu0 %1397 }
  0xb8   : > { %v1215_v6 = vrot.slane %v811_v5, %v6222_v3  ;;  %v1208_v12 = vcombine.high %v811_v5, %v811_v5 }
  0xb9   : > { %v6229_v8 = vpop.permute.xlu1 %1259 }
  0xba   : > { %v1223_v10 = vcombine.high %v1215_v6, %v1215_v6  ;;  %v1231_v13 = vrot.slane %v1215_v6, %v6222_v3 }
  0xbb   : > { %v6237_v15 = vpop.permute.xlu0 %1387 }
  0xbc   : > { %v1245_v14 = vrot.slane %v1223_v10, %v6222_v3  ;;  %v1280_v17 = vrot.slane %v1231_v13, %v6158_v23 }
  0xbd   : > { %v6239_v16 = vpop.permute.xlu1 %1392 }
  0xbe   : > { %v1284_v18 = vrot.slane %v1245_v14, %v6158_v23  ;;  %v1318_v50 = vmul.f32 %v1280_v17, %v6219_v2 }
  0xc0   : > { %v1322_v54 = vmul.f32 %v1284_v18, %v6219_v2  ;;  %v1323_v5 = vmul.f32 %v1284_v18, %v6215_v61 }
  0xee   : > { %v911_v24 = vpop.f32.mrf.mxu0 }
  0xef   : > { %v1041_v25 = vrot.slane %v911_v24, %v795_v22  ;;  %v1022_v26 = vrot.slane %v911_v24, %v6158_v23  ;;  %v1079_v30 = vrot.slane %v911_v24, %v1078_v28  ;;  %v1060_v31 = vrot.slane %v911_v24, %v804_v29 }
  0xf0   : > { %v5119_v27 = vpop.f32.mrf.mxu0  ;;  %v1117_v34 = vrot.slane %v911_v24, %v1116_v32  ;;  %v1098_v35 = vrot.slane %v911_v24, %v1097_v33  ;;  %v1155_v38 = vrot.slane %v911_v24, %v1154_v36  ;;  %v1136_v39 = vrot.slane %v911_v24, %v1135_v37 }
  0xf1   : > { %1055 = vbcast.lane.b32.xlu0 %v1041_v25, 280  ;;  %1036 = vbcast.lane.b32.xlu1 %v1022_v26, 280  ;;  %v1222_v22 = vrot.slane %v1208_v12, %v6222_v3  ;;  %v1320_v27 = vmul.f32 %v1280_v17, %v6200_v48  ;;  %v1324_v29 = vmul.f32 %v1284_v18, %v6200_v48 }
  0xf2   : > { %v6231_v9 = vpop.f32.mrf.mxu1  ;;  %v1255_v32 = vcombine.high %v1245_v14, %v1245_v14  ;;  %v1253_v37 = vcombine.high %v1231_v13, %v1231_v13  ;;  %v1321_v13 = vmul.f32 %v1284_v18, %v6229_v8 }
  0xf4   : > { %v6233_v11 = vpop.f32.mrf.mxu1  ;;  %v1288_v56 = vrot.slane %v1253_v37, %v6158_v23 }
  0xf5   : > { %1051 = vbcast.lane.b32.xlu0 %v1041_v25, 272  ;;  %1032 = vbcast.lane.b32.xlu1 %v1022_v26, 272 }
  0xf6   : > { %v6243_v19 = vpop.f32.mrf.mxu1 }
  0xf9   : > { %1028 = vbcast.lane.b32.xlu0 %v1022_v26, 264  ;;  %1047 = vbcast.lane.b32.xlu1 %v1041_v25, 264 }
  0xfd   : > { %1043 = vbcast.lane.b32.xlu0 %v1041_v25, 256  ;;  %1024 = vbcast.lane.b32.xlu1 %v1022_v26, 256 }
 0x101   : > { %1093 = vbcast.lane.b32.xlu0 %v1079_v30, 280  ;;  %1074 = vbcast.lane.b32.xlu1 %v1060_v31, 280 }
 0x105   : > { %1089 = vbcast.lane.b32.xlu0 %v1079_v30, 272  ;;  %1070 = vbcast.lane.b32.xlu1 %v1060_v31, 272 }
 0x109   : > { %1085 = vbcast.lane.b32.xlu0 %v1079_v30, 264  ;;  %1066 = vbcast.lane.b32.xlu1 %v1060_v31, 264 }
 0x10d   : > { %1081 = vbcast.lane.b32.xlu0 %v1079_v30, 256  ;;  %1062 = vbcast.lane.b32.xlu1 %v1060_v31, 256  ;;  %v6250_v30 = vpop.f32.mrf.mxu1  ;;  %v1224_v31 = vcombine.high %v1222_v22, %v1222_v22 }
 0x111   : > { %1131 = vbcast.lane.b32.xlu0 %v1117_v34, 280  ;;  %1112 = vbcast.lane.b32.xlu1 %v1098_v35, 280 }
 0x115   : > { %1127 = vbcast.lane.b32.xlu0 %v1117_v34, 272  ;;  %1108 = vbcast.lane.b32.xlu1 %v1098_v35, 272 }
 0x119   : > { %1123 = vbcast.lane.b32.xlu0 %v1117_v34, 264  ;;  %1104 = vbcast.lane.b32.xlu1 %v1098_v35, 264 }
 0x11d   : > { %1119 = vbcast.lane.b32.xlu0 %v1117_v34, 256  ;;  %1100 = vbcast.lane.b32.xlu1 %v1098_v35, 256 }
 0x121   : > { %1169 = vbcast.lane.b32.xlu0 %v1155_v38, 280  ;;  %1150 = vbcast.lane.b32.xlu1 %v1136_v39, 280 }
 0x125   : > { %1165 = vbcast.lane.b32.xlu0 %v1155_v38, 272  ;;  %1146 = vbcast.lane.b32.xlu1 %v1136_v39, 272 }
 0x129   : > { %1161 = vbcast.lane.b32.xlu0 %v1155_v38, 264  ;;  %1142 = vbcast.lane.b32.xlu1 %v1136_v39, 264 }
 0x12d   : > { %1157 = vbcast.lane.b32.xlu0 %v1155_v38, 256  ;;  %1138 = vbcast.lane.b32.xlu1 %v1136_v39, 256 }
 0x131   : > { %1676 = vperm.xlu0 %5440, %v1666_v41   ;;  %1671 = vperm.xlu1 %5443, %v1665_v42   ;;  %v1319_v42 = vmul.f32 %v1280_v17, %v6215_v61 }
 0x135   : > { %1686 = vperm.xlu0 %5440, %v1668_v43   ;;  %1681 = vperm.xlu1 %5443, %v1667_v44   ;;  %v6261_v43 = vrot.slane %v1224_v31, %v6222_v3  ;;  %v6264_v44 = vrot.slane %v1222_v22, %v6222_v3  ;;  %v1317_v22 = vmul.f32 %v1280_v17, %v6229_v8 }
 0x137   : > { %v6280_v63 = vrot.slane %v6261_v43, %v6158_v23  ;;  %v6284_v0 = vrot.slane %v6264_v44, %v6158_v23 }
 0x139   : > { %816 = vperm.xlu1 %5443, %v812_v45   ;;  %v1292_v45 = vrot.slane %v1255_v32, %v6158_v23  ;;  %v1328_v32 = vmul.f32 %v1288_v56, %v6200_v48  ;;  %v6302_v18 = vmul.f32 %v6280_v63, %v6200_v48  ;;  %v6306_v17 = vmul.f32 %v6284_v0, %v6200_v48 }
 0x163   : > { %v1056_v24 = vpop.permute.xlu0 %1055  ;;  %v1037_v25 = vpop.permute.xlu1 %1036 }
 0x164   : > { %v1174_v26 = vadd.f32 %v6243_v19, %v1037_v25  ;;  %v1178_v28 = vadd.f32 %v6243_v19, %v1056_v24  ;;  %v1332_v25 = vmul.f32 %v1292_v45, %v6200_v48 }
 0x166   : > { %v1352_v33 = vadd.f32 %v1320_v27, %v1174_v26  ;;  %v1356_v34 = vadd.f32 %v1324_v29, %v1178_v28 }
 0x167   : > { %v1052_v35 = vpop.permute.xlu0 %1051  ;;  %v1033_v36 = vpop.permute.xlu1 %1032 }
 0x168   : > { %v6253_v38 = vadd.f32 %v6224_v4, %v1352_v33  ;;  %v6256_v39 = vadd.f32 %v6224_v4, %v1356_v34  ;;  %v1173_v41 = vadd.f32 %v1033_v36, %v6250_v30  ;;  %v1177_v57 = vadd.f32 %v1052_v35, %v6250_v30 }
 0x16a   : > { %v4775_v46 = vmul.f32 -1.442695, %v6253_v38  ;;  %v4779_v47 = vmul.f32 -1.442695, %v6256_v39  ;;  %v1351_v49 = vadd.f32 %v1319_v42, %v1173_v41  ;;  %v1355_v26 = vadd.f32 %v1323_v5, %v1177_v57 }
 0x16b   : > { %v1029_v51 = vpop.permute.xlu0 %1028  ;;  %v1048_v55 = vpop.permute.xlu1 %1047  ;;  %v1331_v42 = vmul.f32 %v1292_v45, %v6215_v61  ;;  %v1327_v57 = vmul.f32 %v1288_v56, %v6215_v61 }
 0x16c   : > { %v1172_v59 = vadd.f32 %v6231_v9, %v1029_v51  ;;  %v1176_v60 = vadd.f32 %v6231_v9, %v1048_v55  ;;  %5444 = vpow2.f32 %v4775_v46  ;;  %v6276_v62 = vadd.f32 %v6227_v7, %v1351_v49 }
 0x16d   : > { %5446 = vpow2.f32 %v4779_v47  ;;  %v1330_v46 = vmul.f32 %v1292_v45, %v6219_v2  ;;  %v1326_v47 = vmul.f32 %v1288_v56, %v6219_v2  ;;  %v6314_v49 = vadd.f32 %v6227_v7, %v1355_v26 }
 0x16e   : > { %v1350_v6 = vadd.f32 %v1318_v50, %v1172_v59  ;;  %v1354_v10 = vadd.f32 %v1322_v54, %v1176_v60  ;;  %v4774_v12 = vmul.f32 -1.442695, %v6276_v62  ;;  %v6327_v59 = vmul.f32 %v6280_v63, %v6219_v2 }
 0x16f   : > { %v1044_v14 = vpop.permute.xlu0 %1043  ;;  %v1025_v24 = vpop.permute.xlu1 %1024  ;;  %v4778_v26 = vmul.f32 -1.442695, %v6314_v49 }
 0x170   : > { %v6292_v27 = vadd.f32 %v6239_v16, %v1350_v6  ;;  %v6295_v28 = vadd.f32 %v6239_v16, %v1354_v10  ;;  %v1175_v29 = vadd.f32 %v1044_v14, %v6233_v11  ;;  %v1171_v31 = vadd.f32 %v1025_v24, %v6233_v11 }
 0x171   : > { %5448 = vpow2.f32 %v4774_v12  ;;  %v6333_v10 = vmul.f32 %v6284_v0, %v6219_v2  ;;  %v1325_v24 = vmul.f32 %v1288_v56, %v6229_v8  ;;  %v6352_v56 = vmul.f32 %v6284_v0, %v6215_v61 }
 0x172   : > { %v4773_v33 = vmul.f32 -1.442695, %v6292_v27  ;;  %v4777_v34 = vmul.f32 -1.442695, %v6295_v28  ;;  %v1353_v35 = vadd.f32 %v1321_v13, %v1175_v29  ;;  %v1349_v36 = vadd.f32 %v1317_v22, %v1171_v31 }
 0x173   : > { %v1094_v37 = vpop.permute.xlu0 %1093  ;;  %v1075_v41 = vpop.permute.xlu1 %1074  ;;  %v1329_v22 = vmul.f32 %v1292_v45, %v6229_v8  ;;  %v6348_v45 = vmul.f32 %v6280_v63, %v6215_v61 }
 0x174   : > { %5450 = vpow2.f32 %v4773_v33  ;;  %v6317_v50 = vadd.f32 %v6237_v15, %v1353_v35  ;;  %v6320_v51 = vadd.f32 %v6237_v15, %v1349_v36  ;;  %v1186_v54 = vadd.f32 %v6243_v19, %v1094_v37 }
 0x175   : > { %5452 = vpow2.f32 %v4777_v34  ;;  %v1182_v55 = vadd.f32 %v6243_v19, %v1075_v41 }
 0x176   : > { %v4776_v60 = vmul.f32 -1.442695, %v6317_v50  ;;  %v4772_v5 = vmul.f32 -1.442695, %v6320_v51  ;;  %v1364_v6 = vadd.f32 %v1332_v25, %v1186_v54 }
 0x177   : > { %v1360_v12 = vadd.f32 %v1328_v32, %v1182_v55  ;;  %v1090_v13 = vpop.permute.xlu0 %1089  ;;  %v1071_v14 = vpop.permute.xlu1 %1070 }
 0x178   : > { %5454 = vpow2.f32 %v4776_v60  ;;  %v6339_v29 = vadd.f32 %v6224_v4, %v1364_v6  ;;  %v1185_v31 = vadd.f32 %v1090_v13, %v6250_v30  ;;  %v1181_v25 = vadd.f32 %v1071_v14, %v6250_v30 }
 0x179   : > { %v5445_v33 = vpop.eup %5444  ;;  %5456 = vpow2.f32 %v4772_v5  ;;  %v6344_v32 = vadd.f32 %v6224_v4, %v1360_v12  ;;  %v1256_v6 = vcombine.high %v6261_v43, %v6261_v43  ;;  %v6368_v14 = vmul.f32 %v6280_v63, %v6229_v8 }
 0x17a   : > { %v5447_v34 = vpop.eup %5446  ;;  %v4787_v35 = vmul.f32 -1.442695, %v6339_v29  ;;  %v1363_v36 = vadd.f32 %v1331_v42, %v1185_v31  ;;  %v1359_v37 = vadd.f32 %v1327_v57, %v1181_v25  ;;  %v1536_v41 = vadd.f32 1.0, %v5445_v33 }
 0x17b   : > { %v4783_v54 = vmul.f32 -1.442695, %v6344_v32  ;;  %v1086_v55 = vpop.permute.xlu0 %1085  ;;  %v1067_v60 = vpop.permute.xlu1 %1066  ;;  %v1540_v5 = vadd.f32 1.0, %v5447_v34  ;;  %5458 = vpow2.f32 %v4778_v26  ;;  %v1254_v26 = vcombine.high %v6264_v44, %v6264_v44 }
 0x17c   : > { %5460 = vpow2.f32 %v4787_v35  ;;  %v6359_v12 = vadd.f32 %v6227_v7, %v1363_v36  ;;  %v6362_v13 = vadd.f32 %v6227_v7, %v1359_v37  ;;  %v1184_v42 = vadd.f32 %v6231_v9, %v1086_v55 }
 0x17d   : > { %5462 = vpow2.f32 %v4783_v54  ;;  %v1180_v57 = vadd.f32 %v6231_v9, %v1067_v60  ;;  %v6375_v54 = vrot.slane %v1256_v6, %v6158_v23 }
 0x17e   : > { %v5449_v43 = vpop.eup %5448  ;;  %v4786_v31 = vmul.f32 -1.442695, %v6359_v12  ;;  %v4782_v25 = vmul.f32 -1.442695, %v6362_v13  ;;  %v1362_v33 = vadd.f32 %v1330_v46, %v1184_v42  ;;  %5464 = vrcp.f32 %v1536_v41 }
 0x17f   : > { %v1358_v34 = vadd.f32 %v1326_v47, %v1180_v57  ;;  %v1082_v35 = vpop.permute.xlu0 %1081  ;;  %v1063_v36 = vpop.permute.xlu1 %1062  ;;  %5466 = vrcp.f32 %v1540_v5  ;;  %v1535_v37 = vadd.f32 1.0, %v5449_v43  ;;  %v6387_v47 = vmul.f32 %v6284_v0, %v6229_v8 }
 0x180   : > { %5468 = vpow2.f32 %v4786_v31  ;;  %v6378_v63 = vadd.f32 %v6239_v16, %v1362_v33  ;;  %v1183_v44 = vadd.f32 %v1082_v35, %v6233_v11  ;;  %v1179_v55 = vadd.f32 %v1063_v36, %v6233_v11 }
 0x181   : > { %v5451_v60 = vpop.eup %5450  ;;  %5470 = vpow2.f32 %v4782_v25  ;;  %v6383_v46 = vadd.f32 %v6239_v16, %v1358_v34  ;;  %v6390_v41 = vrot.slane %v1254_v26, %v6158_v23  ;;  %v6396_v34 = vmul.f32 %v6375_v54, %v6200_v48 }
 0x182   : > { %v5453_v5 = vpop.eup %5452  ;;  %v1534_v6 = vadd.f32 1.0, %v5451_v60  ;;  %v4785_v42 = vmul.f32 -1.442695, %v6378_v63  ;;  %v1361_v57 = vadd.f32 %v1329_v22, %v1183_v44  ;;  %v1357_v43 = vadd.f32 %v1325_v24, %v1179_v55 }
 0x183   : > { %v1538_v31 = vadd.f32 1.0, %v5453_v5  ;;  %v4781_v33 = vmul.f32 -1.442695, %v6383_v46  ;;  %v1132_v25 = vpop.permute.xlu0 %1131  ;;  %v1113_v35 = vpop.permute.xlu1 %1112  ;;  %5472 = vrcp.f32 %v1535_v37  ;;  %v6408_v37 = vmul.f32 %v6390_v41, %v6200_v48 }
 0x184   : > { %5474 = vrcp.f32 %v1534_v6  ;;  %v6399_v0 = vadd.f32 %v6237_v15, %v1361_v57  ;;  %v6402_v26 = vadd.f32 %v6237_v15, %v1357_v43  ;;  %v1194_v22 = vadd.f32 %v6243_v19, %v1132_v25 }
 0x185   : > { %v5455_v24 = vpop.eup %5454  ;;  %5476 = vrcp.f32 %v1538_v31  ;;  %v1190_v36 = vadd.f32 %v6243_v19, %v1113_v35  ;;  %v6412_v44 = vmul.f32 %v6375_v54, %v6219_v2 }
 0x186   : > { %v5457_v55 = vpop.eup %5456  ;;  %v1537_v60 = vadd.f32 1.0, %v5455_v24  ;;  %5478 = vpow2.f32 %v4785_v42  ;;  %v4784_v5 = vmul.f32 -1.442695, %v6399_v0  ;;  %v4780_v6 = vmul.f32 -1.442695, %v6402_v26 }
 0x187   : > { %v1533_v57 = vadd.f32 1.0, %v5457_v55  ;;  %5480 = vpow2.f32 %v4781_v33  ;;  %v1372_v43 = vadd.f32 %v6302_v18, %v1194_v22  ;;  %v1368_v31 = vadd.f32 %v6306_v17, %v1190_v36  ;;  %v1128_v25 = vpop.permute.xlu0 %1127  ;;  %v1109_v48 = vpop.permute.xlu1 %1108 }
 0x188   : > { %v5459_v35 = vpop.eup %5458  ;;  %5482 = vrcp.f32 %v1537_v60  ;;  %v1193_v20 = vadd.f32 %v1128_v25, %v6250_v30  ;;  %v1189_v1 = vadd.f32 %v1109_v48, %v6250_v30  ;;  %v6422_v42 = vmul.f32 %v6390_v41, %v6219_v2 }
 0x189   : > { %v5461_v24 = vpop.eup %5460  ;;  %5484 = vrcp.f32 %v1533_v57  ;;  %v6425_v33 = vadd.f32 %v6224_v4, %v1372_v43  ;;  %v6428_v18 = vadd.f32 %v6224_v4, %v1368_v31  ;;  %v6432_v17 = vmul.f32 %v6375_v54, %v6215_v61 }
 0x18a   : > { %v5463_v22 = vpop.eup %5462  ;;  %v1548_v36 = vadd.f32 1.0, %v5461_v24  ;;  %5486 = vpow2.f32 %v4784_v5  ;;  %v1371_v55 = vadd.f32 %v6348_v45, %v1193_v20  ;;  %v1367_v2 = vadd.f32 %v6352_v56, %v1189_v1 }
 0x18b   : > { %v5465_v60 = vpop.eup %5464  ;;  %v1544_v25 = vadd.f32 1.0, %v5463_v22  ;;  %5488 = vpow2.f32 %v4780_v6  ;;  %v4795_v57 = vmul.f32 -1.442695, %v6425_v33  ;;  %v4791_v43 = vmul.f32 -1.442695, %v6428_v18  ;;  %v1124_v31 = vpop.permute.xlu0 %1123 }
 0x18c   : > { %v1105_v48 = vpop.permute.xlu1 %1104  ;;  %v5467_v58 = vpop.eup %5466  ;;  %5490 = vrcp.f32 %v1548_v36  ;;  %v6439_v53 = vadd.f32 %v6227_v7, %v1371_v55  ;;  %v6442_v5 = vadd.f32 %v6227_v7, %v1367_v2  ;;  %v1192_v20 = vadd.f32 %v6231_v9, %v1124_v31 }
 0x18d   : > { %v5469_v1 = vpop.eup %5468  ;;  %5492 = vrcp.f32 %v1544_v25  ;;  %v1188_v45 = vadd.f32 %v6231_v9, %v1105_v48  ;;  %v1632_v56 = vmul.f32 %v5465_v60, %v6253_v38  ;;  %v1636_v6 = vmul.f32 %v5467_v58, %v6256_v39 }
 0x18e   : > { %v5471_v24 = vpop.eup %5470  ;;  %v1547_v22 = vadd.f32 1.0, %v5469_v1  ;;  %5494 = vpow2.f32 %v4795_v57  ;;  %v4794_v36 = vmul.f32 -1.442695, %v6439_v53  ;;  %v4790_v55 = vmul.f32 -1.442695, %v6442_v5 }
 0x18f   : > { %v1543_v52 = vadd.f32 1.0, %v5471_v24  ;;  %5496 = vpow2.f32 %v4791_v43  ;;  %v1370_v2 = vadd.f32 %v6327_v59, %v1192_v20  ;;  %v1366_v31 = vadd.f32 %v6333_v10, %v1188_v45  ;;  %5128 = vmatprep.subr.mxu0 %v1632_v56  ;;  %5142 = vmatprep.subr.mxu1 %v1636_v6  ;;  %v1120_v25 = vpop.permute.xlu0 %1119 }
 0x190   : > { %v1101_v48 = vpop.permute.xlu1 %1100  ;;  %v5473_v38 = vpop.eup %5472  ;;  %5498 = vrcp.f32 %v1547_v22  ;;  %5129 = vmatpush3.msra.mxu0 %v1632_v56  ;;  %5143 = vmatpush3.msra.mxu1 %v1636_v6  ;;  %v1191_v58 = vadd.f32 %v1120_v25, %v6233_v11  ;;  %v1539_v60 = vadd.f32 1.0, %v5459_v35 }
 0x191   : > { %v1187_v39 = vadd.f32 %v1101_v48, %v6233_v11  ;;  %v5475_v57 = vpop.eup %5474  ;;  %5500 = vrcp.f32 %v1543_v52  ;;  %v6455_v43 = vadd.f32 %v6239_v16, %v1370_v2  ;;  %v6458_v59 = vadd.f32 %v6239_v16, %v1366_v31 }
 0x192   : > { %v1631_v10 = vmul.f32 %v5473_v38, %v6276_v62  ;;  %v6461_v20 = vpop.eup %5476  ;;  %5502 = vpow2.f32 %v4794_v36  ;;  %v1369_v1 = vadd.f32 %v6368_v14, %v1191_v58  ;;  %v1630_v56 = vmul.f32 %v5475_v57, %v6292_v27 }
 0x193   : > { %v1365_v45 = vadd.f32 %v6387_v47, %v1187_v39  ;;  %v5479_v35 = vpop.eup %5478  ;;  %5504 = vpow2.f32 %v4790_v55  ;;  %v4793_v52 = vmul.f32 -1.442695, %v6455_v43  ;;  %v4789_v6 = vmul.f32 -1.442695, %v6458_v59  ;;  %v1170_v24 = vpop.permute.xlu0 %1169 }
 0x194   : > { %5130 = vmatprep.subr.mxu0 %v1631_v10  ;;  %v1151_v22 = vpop.permute.xlu1 %1150  ;;  %v1343_v62 = vmul.f32 %v6390_v41, %v6215_v61  ;;  %v5481_v2 = vpop.eup %5480  ;;  %v1546_v36 = vadd.f32 1.0, %v5479_v35  ;;  %v6471_v14 = vadd.f32 %v6237_v15, %v1369_v1  ;;  %5506 = vrcp.f32 %v1539_v60 }
 0x195   : > { %v6474_v47 = vadd.f32 %v6237_v15, %v1365_v45  ;;  %5131 = vmatpush3.msra.mxu0 %v1631_v10  ;;  %v6476_v27 = vpop.eup %5482  ;;  %v1542_v55 = vadd.f32 1.0, %v5481_v2  ;;  %5508 = vpow2.f32 %v4793_v52  ;;  %v1202_v31 = vadd.f32 %v6243_v19, %v1170_v24 }
 0x196   : > { %v1198_v25 = vadd.f32 %v6243_v19, %v1151_v22  ;;  %5132 = vmatprep.subr.mxu0 %v1630_v56  ;;  %v5485_v61 = vpop.eup %5484  ;;  %5510 = vrcp.f32 %v1546_v36  ;;  %v4792_v48 = vmul.f32 -1.442695, %v6471_v14  ;;  %v6484_v58 = vmul.f32 %v6375_v54, %v6229_v8  ;;  %v6494_v54 = vld [vmem:[%s7754_s10 + $0x8] sm:$0xff] }
 0x197   : > { %v4788_v38 = vmul.f32 -1.442695, %v6474_v47  ;;  %5133 = vmatpush3.msra.mxu0 %v1630_v56  ;;  %v5487_v39 = vpop.eup %5486  ;;  %5512 = vrcp.f32 %v1542_v55  ;;  %v1380_v60 = vadd.f32 %v6396_v34, %v1202_v31  ;;  %v1166_v10 = vpop.permute.xlu0 %1165  ;;  %v1629_v1 = vmul.f32 %v5485_v61, %v6320_v51 }
 0x198   : > { %v1376_v57 = vadd.f32 %v6408_v37, %v1198_v25  ;;  %v1147_v19 = vpop.permute.xlu1 %1146  ;;  %v5489_v45 = vpop.eup %5488  ;;  %v1545_v35 = vadd.f32 1.0, %v5487_v39  ;;  %5514 = vpow2.f32 %v4789_v6  ;;  %v1201_v52 = vadd.f32 %v1166_v10, %v6250_v30 }
 0x199   : > { %v1197_v56 = vadd.f32 %v1147_v19, %v6250_v30  ;;  %v6496_v24 = vpop.eup %5490  ;;  %v1541_v34 = vadd.f32 1.0, %v5489_v45  ;;  %5516 = vpow2.f32 %v4792_v48  ;;  %v6499_v37 = vadd.f32 %v6224_v4, %v1380_v60  ;;  %5134 = vmatprep.subr.mxu0 %v1629_v1  ;;  %v6507_v30 = vld [vmem:[%s7754_s10 + $0x10] sm:$0xff] }
 0x19a   : > { %v6502_v51 = vadd.f32 %v6224_v4, %v1376_v57  ;;  %v5493_v6 = vpop.eup %5492  ;;  %5518 = vrcp.f32 %v1545_v35  ;;  %v1379_v22 = vadd.f32 %v6432_v17, %v1201_v52  ;;  %5135 = vmatpush3.msra.mxu0 %v1629_v1  ;;  %v1341_v36 = vmul.f32 %v6390_v41, %v6229_v8  ;;  %v6528_v41 = vld [vmem:[%s7754_s10 + $0x18] sm:$0xff] }
 0x19b   : > { %v1375_v2 = vadd.f32 %v1343_v62, %v1197_v56  ;;  %v5495_v55 = vpop.eup %5494  ;;  %5520 = vrcp.f32 %v1541_v34  ;;  %v4803_v4 = vmul.f32 -1.442695, %v6499_v37  ;;  %5137 = vmatmul.mubr.msk.f32.vlgmr.msra.gmra.mxu0 %vm1689_vm2, %v6494_v54  ;;  %v1162_v25 = vpop.permute.xlu0 %1161  ;;  %v1640_v48 = vmul.f32 %v5493_v6, %v6344_v32 }
 0x19c   : > { %v4799_v31 = vmul.f32 -1.442695, %v6502_v51  ;;  %v1143_v61 = vpop.permute.xlu1 %1142  ;;  %v5497_v39 = vpop.eup %5496  ;;  %v1556_v17 = vadd.f32 1.0, %v5495_v55  ;;  %5522 = vpow2.f32 %v4788_v38  ;;  %v6518_v62 = vadd.f32 %v6227_v7, %v1379_v22  ;;  %5139 = vmatprep.mubr.msk.f32.mxu0 %vm1689_vm2, %v6507_v30 }
 0x19d   : > { %v6521_v8 = vadd.f32 %v6227_v7, %v1375_v2  ;;  %v6530_v60 = vpop.eup %5498  ;;  %v1552_v32 = vadd.f32 1.0, %v5497_v39  ;;  %5524 = vpow2.f32 %v4803_v4  ;;  %v1200_v38 = vadd.f32 %v6231_v9, %v1162_v25  ;;  %5156 = vmatprep.subr.mxu0 %v1640_v48 }
 0x19e   : > { %v1196_v57 = vadd.f32 %v6231_v9, %v1143_v61  ;;  %v5501_v10 = vpop.eup %5500  ;;  %5526 = vrcp.f32 %v1556_v17  ;;  %v1634_v7 = vmul.f32 %v6461_v20, %v6295_v28  ;;  %v4802_v19 = vmul.f32 -1.442695, %v6518_v62  ;;  %5157 = vmatpush3.msra.mxu0 %v1640_v48 }
 0x19f   : > { %v4798_v1 = vmul.f32 -1.442695, %v6521_v8  ;;  %v5503_v45 = vpop.eup %5502  ;;  %5528 = vrcp.f32 %v1552_v32  ;;  %v1378_v35 = vadd.f32 %v6412_v44, %v1200_v38  ;;  %5140 = vmatmul.mubr.msk.f32.gmra.mxu0 %vm1689_vm2, %v6528_v41  ;;  %v1158_v9 = vpop.permute.xlu0 %1157  ;;  %v1639_v34 = vmul.f32 %v5501_v10, %v6362_v13 }
 0x1a0   : > { %v1374_v52 = vadd.f32 %v6422_v42, %v1196_v57  ;;  %v1139_v56 = vpop.permute.xlu1 %1138  ;;  %v5505_v6 = vpop.eup %5504  ;;  %v1555_v28 = vadd.f32 1.0, %v5503_v45  ;;  %5530 = vpow2.f32 %v4799_v31  ;;  %v1199_v20 = vadd.f32 %v1158_v9, %v6233_v11  ;;  %5164 = vmatprep.mubr.msk.f32.mxu0 %vm1689_vm2, %v6172_v40 }
 0x1a1   : > { %v1195_v22 = vadd.f32 %v1139_v56, %v6233_v11  ;;  %v5507_v44 = vpop.eup %5506  ;;  %v1551_v2 = vadd.f32 1.0, %v5505_v6  ;;  %5532 = vpow2.f32 %v4802_v19  ;;  %v6548_v42 = vadd.f32 %v6239_v16, %v1378_v35  ;;  %5158 = vmatprep.subr.mxu0 %v1639_v34 }
 0x1a2   : > { %v6551_v55 = vadd.f32 %v6239_v16, %v1374_v52  ;;  %v5509_v13 = vpop.eup %5508  ;;  %5534 = vrcp.f32 %v1555_v28  ;;  %v1635_v4 = vmul.f32 %v5507_v44, %v6314_v49  ;;  %v1377_v31 = vadd.f32 %v6484_v58, %v1199_v20  ;;  %5159 = vmatpush3.msra.mxu0 %v1639_v34 }
 0x1a3   : > { %v1373_v11 = vadd.f32 %v1341_v36, %v1195_v22  ;;  %v5511_v25 = vpop.eup %5510  ;;  %5536 = vrcp.f32 %v1551_v2  ;;  %v1554_v61 = vadd.f32 1.0, %v5509_v13  ;;  %v4801_v48 = vmul.f32 -1.442695, %v6548_v42 }
 0x1a4   : > { %v4797_v39 = vmul.f32 -1.442695, %v6551_v55  ;;  %v5513_v17 = vpop.eup %5512  ;;  %5144 = vmatprep.subr.mxu1 %v1635_v4  ;;  %5538 = vpow2.f32 %v4798_v1  ;;  %v1633_v16 = vmul.f32 %v6476_v27, %v6317_v50  ;;  %v6560_v32 = vadd.f32 %v6237_v15, %v1377_v31 }
 0x1a5   : > { %v6563_v49 = vadd.f32 %v6237_v15, %v1373_v11  ;;  %v5515_v58 = vpop.eup %5514  ;;  %5540 = vrcp.f32 %v1554_v61  ;;  %5145 = vmatpush3.msra.mxu1 %v1635_v4  ;;  %v1638_v36 = vmul.f32 %v5513_v17, %v6383_v46  ;;  %v1644_v10 = vmul.f32 %v6496_v24, %v6339_v29 }
 0x1a6   : > { %v5517_v38 = vpop.eup %5516  ;;  %v1550_v57 = vadd.f32 1.0, %v5515_v58  ;;  %5146 = vmatprep.subr.mxu1 %v1634_v7  ;;  %5542 = vpow2.f32 %v4801_v48  ;;  %v4800_v50 = vmul.f32 -1.442695, %v6560_v32  ;;  %v1643_v46 = vmul.f32 %v6530_v60, %v6359_v12 }
 0x1a7   : > { %v5519_v27 = vpop.eup %5518  ;;  %v1553_v19 = vadd.f32 1.0, %v5517_v38  ;;  %5147 = vmatpush3.msra.mxu1 %v1634_v7  ;;  %5544 = vpow2.f32 %v4797_v39  ;;  %v4796_v15 = vmul.f32 -1.442695, %v6563_v49  ;;  %5160 = vmatprep.subr.mxu0 %v1638_v36  ;;  %v1642_v7 = vmul.f32 %v5511_v25, %v6378_v63 }
 0x1a8   : > { %v5521_v1 = vpop.eup %5520  ;;  %5546 = vrcp.f32 %v1550_v57  ;;  %5148 = vmatprep.subr.mxu1 %v1633_v16  ;;  %5161 = vmatpush3.msra.mxu0 %v1638_v36 }
 0x1a9   : > { %v5523_v45 = vpop.eup %5522  ;;  %5548 = vrcp.f32 %v1553_v19  ;;  %5149 = vmatpush3.msra.mxu1 %v1633_v16  ;;  %v1637_v29 = vmul.f32 %v5521_v1, %v6402_v26  ;;  %v1641_v26 = vmul.f32 %v5519_v27, %v6399_v0 }
 0x1aa   : > { %v5525_v24 = vpop.eup %5524  ;;  %v1549_v35 = vadd.f32 1.0, %v5523_v45  ;;  %5151 = vmatmul.mubr.msk.f32.vlgmr.msra.gmra.mxu1 %vm1689_vm2, %v6494_v54  ;;  %5170 = vmatprep.subr.mxu1 %v1644_v10  ;;  %5550 = vpow2.f32 %v4800_v50  ;;  %v5832_v50 = vld [vmem:[%s7754_s10] sm:$0xff] }
 0x1ab   : > { %v5527_v52 = vpop.eup %5526  ;;  %v1564_v9 = vadd.f32 1.0, %v5525_v24  ;;  %5153 = vmatprep.mubr.msk.f32.mxu1 %vm1689_vm2, %v6507_v30  ;;  %5171 = vmatpush3.msra.mxu1 %v1644_v10  ;;  %5552 = vpow2.f32 %v4796_v15 }
 0x1ac   : > { %v5529_v12 = vpop.eup %5528  ;;  %5554 = vrcp.f32 %v1549_v35  ;;  %5172 = vmatprep.subr.mxu1 %v1643_v46  ;;  %5162 = vmatprep.subr.mxu0 %v1637_v29  ;;  %v1652_v6 = vmul.f32 %v5527_v52, %v6425_v33 }
 0x1ad   : > { %v5531_v60 = vpop.eup %5530  ;;  %5556 = vrcp.f32 %v1564_v9  ;;  %5173 = vmatpush3.msra.mxu1 %v1643_v46  ;;  %5163 = vmatpush3.msra.mxu0 %v1637_v29  ;;  %v1648_v56 = vmul.f32 %v5529_v12, %v6428_v18 }
 0x1ae   : > { %v5533_v63 = vpop.eup %5532  ;;  %v1560_v34 = vadd.f32 1.0, %v5531_v60  ;;  %5154 = vmatmul.mubr.msk.f32.gmra.mxu1 %vm1689_vm2, %v6528_v41  ;;  %5174 = vmatprep.subr.mxu1 %v1642_v7 }
 0x1af   : > { %v5535_v28 = vpop.eup %5534  ;;  %v1563_v20 = vadd.f32 1.0, %v5533_v63  ;;  %5175 = vmatpush3.msra.mxu1 %v1642_v7  ;;  %5178 = vmatprep.mubr.msk.f32.mxu1 %vm1689_vm2, %v6172_v40 }
 0x1b0   : > { %v5537_v0 = vpop.eup %5536  ;;  %5558 = vrcp.f32 %v1560_v34  ;;  %5176 = vmatprep.subr.mxu1 %v1641_v26  ;;  %5165 = vmatmul.mubr.msk.f32.vlgmr.msra.gmra.mxu0 %vm1689_vm2, %v6494_v54  ;;  %v1651_v2 = vmul.f32 %v5535_v28, %v6439_v53 }
 0x1b1   : > { %v5539_v18 = vpop.eup %5538  ;;  %5560 = vrcp.f32 %v1563_v20  ;;  %5177 = vmatpush3.msra.mxu1 %v1641_v26  ;;  %5184 = vmatprep.subr.mxu0 %v1648_v56  ;;  %v1647_v22 = vmul.f32 %v5537_v0, %v6442_v5  ;;  %v836_v20 = vld [vmem:[%s755_s1] sm:$0xf] }
 0x1b2   : > { %v5541_v44 = vpop.eup %5540  ;;  %v1559_v33 = vadd.f32 1.0, %v5539_v18  ;;  %5179 = vmatmul.mubr.msk.f32.vlgmr.msra.gmra.mxu1 %vm1689_vm2, %v6494_v54  ;;  %5198 = vmatprep.subr.mxu1 %v1652_v6 }
 0x1b3   : > { %v5543_v13 = vpop.eup %5542  ;;  %5167 = vmatprep.mubr.msk.f32.mxu0 %vm1689_vm2, %v6507_v30  ;;  %5181 = vmatprep.mubr.msk.f32.mxu1 %vm1689_vm2, %v6507_v30  ;;  %v1650_v5 = vmul.f32 %v5541_v44, %v6455_v43 }
 0x1b4   : > { %v5545_v4 = vpop.eup %5544  ;;  %5562 = vrcp.f32 %v1559_v33  ;;  %v1562_v31 = vadd.f32 1.0, %v5543_v13  ;;  %5185 = vmatpush3.msra.mxu0 %v1648_v56  ;;  %5199 = vmatpush3.msra.mxu1 %v1652_v6  ;;  %v5836_v56 = vld [vmem:[%s6681_s8] ss:$0 sm:$0xff] }
 0x1b5   : > { %v5547_v11 = vpop.eup %5546  ;;  %v1558_v25 = vadd.f32 1.0, %v5545_v4  ;;  %5168 = vmatmul.mubr.msk.f32.gmra.mxu0 %vm1689_vm2, %v6528_v41  ;;  %5186 = vmatprep.subr.mxu0 %v1647_v22 }
 0x1b6   : > { %v5549_v53 = vpop.eup %5548  ;;  %5564 = vrcp.f32 %v1562_v31  ;;  %5182 = vmatmul.mubr.msk.f32.gmra.mxu1 %vm1689_vm2, %v6528_v41  ;;  %5200 = vmatprep.subr.mxu1 %v1651_v2  ;;  %v1646_v61 = vmul.f32 %v5547_v11, %v6458_v59  ;;  %v837_v31 = vunpack.c.l.bf16 %v836_v20 }
 0x1b7   : > { %v5551_v48 = vpop.eup %5550  ;;  %5566 = vrcp.f32 %v1558_v25  ;;  %5187 = vmatpush3.msra.mxu0 %v1647_v22  ;;  %5201 = vmatpush3.msra.mxu1 %v1651_v2  ;;  %v1649_v43 = vmul.f32 %v5549_v53, %v6471_v14 }
 0x1b8   : > { %v5553_v39 = vpop.eup %5552  ;;  %v1561_v17 = vadd.f32 1.0, %v5551_v48  ;;  %5188 = vmatprep.subr.mxu0 %v1646_v61  ;;  %5202 = vmatprep.subr.mxu1 %v1650_v5 }
 0x1b9   : > { %v5555_v16 = vpop.eup %5554  ;;  %v1557_v58 = vadd.f32 1.0, %v5553_v39  ;;  %5189 = vmatpush3.msra.mxu0 %v1646_v61  ;;  %5203 = vmatpush3.msra.mxu1 %v1650_v5 }
 0x1ba   : > { %v5557_v36 = vpop.eup %5556  ;;  %5568 = vrcp.f32 %v1561_v17  ;;  %v1645_v38 = vmul.f32 %v5555_v16, %v6474_v47  ;;  %5204 = vmatprep.subr.mxu1 %v1649_v43  ;;  %5192 = vmatprep.mubr.msk.f32.mxu0 %vm1689_vm2, %v6172_v40 }
 0x1bb   : > { %5570 = vrcp.f32 %v1557_v58  ;;  %5205 = vmatpush3.msra.mxu1 %v1649_v43  ;;  %5206 = vmatprep.mubr.msk.f32.mxu1 %vm1689_vm2, %v6172_v40  ;;  %v1660_v59 = vmul.f32 %v5557_v36, %v6499_v37 }
 0x1bc   : > { %5190 = vmatprep.subr.mxu0 %v1645_v38  ;;  %5207 = vmatmul.mubr.msk.f32.vlgmr.msra.gmra.mxu1 %vm1689_vm2, %v6494_v54 }
 0x1bd   : > { %v5559_v14 = vpop.eup %5558  ;;  %5191 = vmatpush3.msra.mxu0 %v1645_v38  ;;  %5226 = vmatprep.subr.mxu1 %v1660_v59 }
 0x1be   : > { %v5561_v57 = vpop.eup %5560  ;;  %5193 = vmatmul.mubr.msk.f32.vlgmr.msra.gmra.mxu0 %vm1689_vm2, %v6494_v54  ;;  %v1656_v47 = vmul.f32 %v5559_v14, %v6502_v51  ;;  %5209 = vmatprep.mubr.msk.f32.mxu1 %vm1689_vm2, %v6507_v30 }
 0x1bf   : > { %5195 = vmatprep.mubr.msk.f32.mxu0 %vm1689_vm2, %v6507_v30  ;;  %v1659_v40 = vmul.f32 %v5561_v57, %v6518_v62  ;;  %5227 = vmatpush3.msra.mxu1 %v1660_v59 }
 0x1c0   : > { %5212 = vmatprep.subr.mxu0 %v1656_v47  ;;  %5210 = vmatmul.mubr.msk.f32.gmra.mxu1 %vm1689_vm2, %v6528_v41 }
 0x1c1   : > { %v5563_v37 = vpop.eup %5562  ;;  %5213 = vmatpush3.msra.mxu0 %v1656_v47  ;;  %5228 = vmatprep.subr.mxu1 %v1659_v40 }
 0x1c2   : > { %5196 = vmatmul.mubr.msk.f32.gmra.mxu0 %vm1689_vm2, %v6528_v41  ;;  %v1655_v51 = vmul.f32 %v5563_v37, %v6521_v8  ;;  %5229 = vmatpush3.msra.mxu1 %v1659_v40 }
 0x1c3   : > { %v5565_v10 = vpop.eup %5564  ;;  %5220 = vmatprep.mubr.msk.f32.mxu0 %vm1689_vm2, %v5832_v50  ;;  %5234 = vmatprep.mubr.msk.f32.mxu1 %vm1689_vm2, %v5832_v50 }
 0x1c4   : > { %v5567_v62 = vpop.eup %5566  ;;  %5214 = vmatprep.subr.mxu0 %v1655_v51  ;;  %v1658_v27 = vmul.f32 %v5565_v10, %v6548_v42  ;;  %v6647_v42 = vld [vmem:[%s7756_s12] sm:$0xff] }
 0x1c5   : > { %5215 = vmatpush3.msra.mxu0 %v1655_v51  ;;  %v1654_v19 = vmul.f32 %v5567_v62, %v6551_v55 }
 0x1c6   : > { %5230 = vmatprep.subr.mxu1 %v1658_v27 }
 0x1c7   : > { %v5569_v8 = vpop.eup %5568  ;;  %5216 = vmatprep.subr.mxu0 %v1654_v19  ;;  %5231 = vmatpush3.msra.mxu1 %v1658_v27 }
 0x1c8   : > { %v5571_v15 = vpop.eup %5570  ;;  %5217 = vmatpush3.msra.mxu0 %v1654_v19  ;;  %v1657_v1 = vmul.f32 %v5569_v8, %v6560_v32 }
 0x1c9   : > { %v1653_v46 = vmul.f32 %v5571_v15, %v6563_v49 }
 0x1ca   : > { %5232 = vmatprep.subr.mxu1 %v1657_v1 }
 0x1cb   : > { %5218 = vmatprep.subr.mxu0 %v1653_v46  ;;  %5233 = vmatpush3.msra.mxu1 %v1657_v1 }
 0x1cc   : > { %5219 = vmatpush3.msra.mxu0 %v1653_v46  ;;  %5235 = vmatmul.mubr.msk.f32.vlgmr.msra.gmra.mxu1 %vm1689_vm2, %v6494_v54 }
 0x1cd   : > { %5221 = vmatmul.mubr.msk.f32.vlgmr.msra.gmra.mxu0 %vm1689_vm2, %v6494_v54  ;;  %5237 = vmatprep.mubr.msk.f32.mxu1 %vm1689_vm2, %v6507_v30  ;;  %v6653_v54 = vpop.permute.xlu0 %1676 }
 0x1ce   : > { %5223 = vmatprep.mubr.msk.f32.mxu0 %vm1689_vm2, %v6507_v30  ;;  %v6655_v30 = vpop.permute.xlu1 %1671 }
 0x1d0   : > { %5238 = vmatmul.mubr.msk.f32.gmra.mxu1 %vm1689_vm2, %v6528_v41 }
 0x1d1   : > { %5224 = vmatmul.mubr.msk.f32.gmra.mxu0 %vm1689_vm2, %v6528_v41  ;;  %5262 = vmatprep.mubr.msk.f32.mxu1 %vm1689_vm2, %v6647_v42  ;;  %v6664_v29 = vpop.permute.xlu0 %1686 }
 0x1d2   : > { %5248 = vmatprep.mubr.msk.f32.mxu0 %vm1689_vm2, %v6647_v42  ;;  %v6670_v52 = vpop.permute.xlu1 %1681 }
 0x1d6   : > { %v6692_v0 = vpop.permute.xlu1 %816 }
 0x1d7   : > { %v6703_v5 = vmul.f32 %v5836_v56, %v6692_v0 }
 0x1d9   : > { %v6718_v57 = vmul.f32 %v837_v31, %v6703_v5 }
 0x1db   : > { %v3719_v46 = vrot.slane %v6718_v57, %v6222_v3 }
 0x1dd   : > { %v6748_v56 = vrot.slane %v3719_v46, %v6222_v3 }
 0x25b   : > { %v5138_v55 = vpop.f32.mrf.mxu0 }
 0x25c   : > { %v6658_v32 = vadd.f32 %v5138_v55, %v6653_v54 }
 0x25d   : > { %v1768_v41 = vpop.f32.mrf.mxu0 }
 0x25e   : > { %v4837_v49 = vmul.f32 -1.442695, %v6658_v32  ;;  %v6662_v45 = vadd.f32 %v1768_v41, %v6655_v30 }
 0x25f   : > { %v5141_v24 = vpop.f32.mrf.mxu0 }
 0x260   : > { %5572 = vpow2.f32 %v4837_v49  ;;  %v4836_v35 = vmul.f32 -1.442695, %v6662_v45  ;;  %v6668_v7 = vadd.f32 %v5141_v24, %v6664_v29 }
 0x261   : > { %v1778_v9 = vpop.f32.mrf.mxu0 }
 0x262   : > { %5574 = vpow2.f32 %v4836_v35  ;;  %v4839_v12 = vmul.f32 -1.442695, %v6668_v7  ;;  %v6674_v26 = vadd.f32 %v1778_v9, %v6670_v52 }
 0x264   : > { %5576 = vpow2.f32 %v4839_v12  ;;  %v4838_v60 = vmul.f32 -1.442695, %v6674_v26 }
 0x266   : > { %5578 = vpow2.f32 %v4838_v60 }
 0x26a   : > { %v5152_v63 = vpop.f32.mrf.mxu1 }
 0x26b   : > { %v6690_v34 = vadd.f32 %v5152_v63, %v6653_v54 }
 0x26c   : > { %v1853_v6 = vpop.f32.mrf.mxu1 }
 0x26d   : > { %v5573_v28 = vpop.eup %5572  ;;  %v4841_v18 = vmul.f32 -1.442695, %v6690_v34  ;;  %v6696_v22 = vadd.f32 %v1853_v6, %v6655_v30 }
 0x26e   : > { %v2479_v44 = vadd.f32 1.0, %v5573_v28  ;;  %v5155_v33 = vpop.f32.mrf.mxu1 }
 0x26f   : > { %v5575_v2 = vpop.eup %5574  ;;  %5580 = vpow2.f32 %v4841_v18  ;;  %v4840_v13 = vmul.f32 -1.442695, %v6696_v22  ;;  %v6700_v4 = vadd.f32 %v5155_v33, %v6664_v29 }
 0x270   : > { %5582 = vrcp.f32 %v2479_v44  ;;  %v2478_v11 = vadd.f32 1.0, %v5575_v2  ;;  %v1863_v25 = vpop.f32.mrf.mxu1  ;;  %v5166_v53 = vpop.f32.mrf.mxu0  ;;  %v3727_v44 = vcombine.high %v3719_v46, %v3719_v46 }
 0x271   : > { %v5577_v61 = vpop.eup %5576  ;;  %5584 = vpow2.f32 %v4840_v13  ;;  %v4843_v48 = vmul.f32 -1.442695, %v6700_v4  ;;  %v6707_v43 = vadd.f32 %v1863_v25, %v6670_v52  ;;  %v6710_v39 = vadd.f32 %v5166_v53, %v6653_v54 }
 0x272   : > { %5586 = vrcp.f32 %v2478_v11  ;;  %v2481_v17 = vadd.f32 1.0, %v5577_v61  ;;  %v5180_v16 = vpop.f32.mrf.mxu1  ;;  %v1938_v58 = vpop.f32.mrf.mxu0 }
 0x273   : > { %v5579_v36 = vpop.eup %5578  ;;  %5588 = vpow2.f32 %v4843_v48  ;;  %v4842_v38 = vmul.f32 -1.442695, %v6707_v43  ;;  %v4845_v59 = vmul.f32 -1.442695, %v6710_v39  ;;  %v6715_v14 = vadd.f32 %v5180_v16, %v6653_v54 }
 0x274   : > { %5590 = vrcp.f32 %v2481_v17  ;;  %v2480_v47 = vadd.f32 1.0, %v5579_v36  ;;  %v6721_v40 = vadd.f32 %v1938_v58, %v6655_v30  ;;  %v2023_v37 = vpop.f32.mrf.mxu1  ;;  %v6762_v17 = vrot.slane %v6748_v56, %v6158_v23 }
 0x275   : > { %5592 = vpow2.f32 %v4842_v38  ;;  %v4849_v51 = vmul.f32 -1.442695, %v6715_v14  ;;  %v6725_v10 = vadd.f32 %v2023_v37, %v6655_v30  ;;  %v5169_v50 = vpop.f32.mrf.mxu0 }
 0x276   : > { %5594 = vrcp.f32 %v2480_v47  ;;  %v4844_v62 = vmul.f32 -1.442695, %v6721_v40  ;;  %v6729_v27 = vadd.f32 %v5169_v50, %v6664_v29  ;;  %v5183_v19 = vpop.f32.mrf.mxu1 }
 0x277   : > { %5596 = vpow2.f32 %v4845_v59  ;;  %v4848_v8 = vmul.f32 -1.442695, %v6725_v10  ;;  %v6733_v15 = vadd.f32 %v5183_v19, %v6664_v29  ;;  %v1948_v1 = vpop.f32.mrf.mxu0  ;;  %v6769_v59 = vrot.slane %v3727_v44, %v6222_v3 }
 0x278   : > { %5598 = vpow2.f32 %v4849_v51  ;;  %v4847_v55 = vmul.f32 -1.442695, %v6729_v27  ;;  %v6739_v41 = vadd.f32 %v1948_v1, %v6670_v52  ;;  %v2033_v49 = vpop.f32.mrf.mxu1 }
 0x279   : > { %5600 = vpow2.f32 %v4844_v62  ;;  %v4851_v24 = vmul.f32 -1.442695, %v6733_v15  ;;  %v6743_v35 = vadd.f32 %v2033_v49, %v6670_v52  ;;  %v3757_v49 = vcombine.high %v6748_v56, %v6748_v56 }
 0x27a   : > { %5602 = vpow2.f32 %v4848_v8  ;;  %v4846_v9 = vmul.f32 -1.442695, %v6739_v41 }
 0x27b   : > { %5604 = vpow2.f32 %v4847_v55  ;;  %v4850_v12 = vmul.f32 -1.442695, %v6743_v35 }
 0x27c   : > { %v5581_v60 = vpop.eup %5580  ;;  %5606 = vpow2.f32 %v4851_v24  ;;  %v5208_v63 = vpop.f32.mrf.mxu1 }
 0x27d   : > { %v5583_v6 = vpop.eup %5582  ;;  %v2483_v28 = vadd.f32 1.0, %v5581_v60  ;;  %5608 = vpow2.f32 %v4846_v9  ;;  %v6751_v20 = vadd.f32 %v5208_v63, %v6653_v54  ;;  %v6782_v60 = vrot.slane %v6769_v59, %v6158_v23 }
 0x27e   : > { %v5585_v18 = vpop.eup %5584  ;;  %v6754_v33 = vmul.f32 %v5583_v6, %v6658_v32  ;;  %5610 = vpow2.f32 %v4850_v12  ;;  %v5194_v2 = vpop.f32.mrf.mxu0 }
 0x27f   : > { %v5587_v13 = vpop.eup %5586  ;;  %5612 = vrcp.f32 %v2483_v28  ;;  %v2482_v31 = vadd.f32 1.0, %v5585_v18  ;;  %v6757_v11 = vadd.f32 %v5194_v2, %v6653_v54  ;;  %v4857_v25 = vmul.f32 -1.442695, %v6751_v20  ;;  %v2193_v53 = vpop.f32.mrf.mxu1 }
 0x280   : > { %v5589_v61 = vpop.eup %5588  ;;  %v2108_v48 = vpop.f32.mrf.mxu0  ;;  %v3802_v37 = vmul.f32 %v6762_v17, %v6754_v33  ;;  %v6786_v28 = vadd.f32 %v2193_v53, %v6655_v30  ;;  %v2574_v2 = vmul.f32 %v5587_v13, %v6662_v45  ;;  %v6802_v45 = vld [vmem:[%s7756_s12 + $0x8] sm:$0xff] }
 0x281   : > { %v5591_v16 = vpop.eup %5590  ;;  %5614 = vrcp.f32 %v2482_v31  ;;  %v2485_v32 = vadd.f32 1.0, %v5589_v61  ;;  %v4853_v58 = vmul.f32 -1.442695, %v6757_v11  ;;  %v6766_v36 = vadd.f32 %v2108_v48, %v6655_v30  ;;  %v5211_v19 = vpop.f32.mrf.mxu1 }
 0x282   : > { %v5593_v38 = vpop.eup %5592  ;;  %v2577_v47 = vmul.f32 %v5591_v16, %v6668_v7  ;;  %5616 = vpow2.f32 %v4857_v25  ;;  %v5197_v46 = vpop.f32.mrf.mxu0  ;;  %v3712_v7 = vcombine.high %v6718_v57, %v6718_v57  ;;  %v6795_v16 = vadd.f32 %v5211_v19, %v6664_v29 }
 0x283   : > { %v5595_v51 = vpop.eup %5594  ;;  %5618 = vrcp.f32 %v2485_v32  ;;  %v2484_v50 = vadd.f32 1.0, %v5593_v38  ;;  %v4852_v62 = vmul.f32 -1.442695, %v6766_v36  ;;  %v2203_v56 = vpop.f32.mrf.mxu1  ;;  %v6791_v25 = vadd.f32 %v5197_v46, %v6664_v29 }
 0x284   : > { %v5597_v8 = vpop.eup %5596  ;;  %v2576_v1 = vmul.f32 %v5595_v51, %v6674_v26  ;;  %5620 = vpow2.f32 %v4853_v58  ;;  %5240 = vmatprep.subr.mxu0 %v2577_v47  ;;  %v3836_v26 = vsel %vm3606_vm3, %v3802_v37, 0.0  ;;  %v3804_v18 = vmul.f32 %v6762_v17, %v2577_v47  ;;  %v2118_v61 = vpop.f32.mrf.mxu0  ;;  %v6811_v37 = vld [vmem:[%s7756_s12 + $0x10] sm:$0xff] }
 0x285   : > { %v5599_v55 = vpop.eup %5598  ;;  %5622 = vrcp.f32 %v2484_v50  ;;  %v2487_v24 = vadd.f32 1.0, %v5597_v8  ;;  %5241 = vmatpush3.msra.mxu0 %v2577_v47  ;;  %3837 = vadd.xlane.f32.xlu1 %v3836_v26  ;;  %v6805_v38 = vadd.f32 %v2203_v56, %v6670_v52  ;;  %v4856_v50 = vmul.f32 -1.442695, %v6786_v28  ;;  %v6831_v26 = vld [vmem:[%s7756_s12 + $0x18] sm:$0xff] }
 0x286   : > { %v5601_v9 = vpop.eup %5600  ;;  %v2491_v12 = vadd.f32 1.0, %v5599_v55  ;;  %5624 = vpow2.f32 %v4852_v62  ;;  %5242 = vmatprep.subr.mxu0 %v2576_v1  ;;  %v3842_v32 = vsel %vm3606_vm3, %v3804_v18, 0.0  ;;  %v3803_v47 = vmul.f32 %v6762_v17, %v2576_v1 }
 0x287   : > { %v5603_v63 = vpop.eup %5602  ;;  %5626 = vrcp.f32 %v2487_v24  ;;  %v2486_v6 = vadd.f32 1.0, %v5601_v9  ;;  %5243 = vmatpush3.msra.mxu0 %v2576_v1  ;;  %v6815_v62 = vadd.f32 %v2118_v61, %v6670_v52  ;;  %v4855_v1 = vmul.f32 -1.442695, %v6791_v25 }
 0x288   : > { %v5605_v44 = vpop.eup %5604  ;;  %5628 = vrcp.f32 %v2491_v12  ;;  %v2490_v31 = vadd.f32 1.0, %v5603_v63  ;;  %5244 = vmatprep.subr.mxu0 %v6754_v33  ;;  %v3759_v55 = vcombine.high %v6769_v59, %v6769_v59  ;;  %v4859_v9 = vmul.f32 -1.442695, %v6795_v16 }
 0x289   : > { %v5607_v48 = vpop.eup %5606  ;;  %5630 = vrcp.f32 %v2486_v6  ;;  %v2489_v53 = vadd.f32 1.0, %v5605_v44  ;;  %5245 = vmatpush3.msra.mxu0 %v6754_v33  ;;  %3843 = vadd.xlane.f32.xlu1 %v3842_v32  ;;  %v6834_v63 = vrot.slane %v3757_v49, %v6158_v23  ;;  %v3839_v56 = vsel %vm3606_vm3, %v3803_v47, 0.0 }
 0x28a   : > { %v5609_v13 = vpop.eup %5608  ;;  %5632 = vrcp.f32 %v2490_v31  ;;  %v2493_v58 = vadd.f32 1.0, %v5607_v48  ;;  %5246 = vmatprep.subr.mxu0 %v2574_v2  ;;  %v4854_v31 = vmul.f32 -1.442695, %v6815_v62 }
 0x28b   : > { %v5611_v33 = vpop.eup %5610  ;;  %5634 = vrcp.f32 %v2489_v53  ;;  %v2488_v51 = vadd.f32 1.0, %v5609_v13  ;;  %5247 = vmatpush3.msra.mxu0 %v2574_v2 }
 0x28c   : > { %v5613_v19 = vpop.eup %5612  ;;  %5636 = vrcp.f32 %v2493_v58  ;;  %v2492_v8 = vadd.f32 1.0, %v5611_v33  ;;  %v5236_v46 = vpop.f32.mrf.mxu1  ;;  %5249 = vmatmul.mubr.msk.f32.vlgmr.msra.gmra.mxu0 %vm1689_vm2, %v6802_v45  ;;  %v3801_v58 = vmul.f32 %v6762_v17, %v2574_v2 }
 0x28d   : > { %v6823_v24 = vmul.f32 %v5613_v19, %v6690_v34  ;;  %5638 = vrcp.f32 %v2488_v51  ;;  %v5222_v12 = vpop.f32.mrf.mxu0  ;;  %5251 = vmatprep.mubr.msk.f32.mxu0 %vm1689_vm2, %v6811_v37  ;;  %v4858_v34 = vmul.f32 -1.442695, %v6805_v38  ;;  %v6838_v59 = vadd.f32 %v5236_v46, %v6653_v54  ;;  %3840 = vadd.xlane.f32.xlu1 %v3839_v56 }
 0x28e   : > { %v5615_v6 = vpop.eup %5614  ;;  %5640 = vrcp.f32 %v2492_v8  ;;  %v2363_v18 = vpop.f32.mrf.mxu1  ;;  %v6845_v49 = vadd.f32 %v5222_v12, %v6653_v54 }
 0x28f   : > { %v5617_v44 = vpop.eup %5616  ;;  %5642 = vpow2.f32 %v4856_v50  ;;  %v3806_v61 = vmul.f32 %v6782_v60, %v6823_v24  ;;  %v2278_v48 = vpop.f32.mrf.mxu0  ;;  %v6848_v32 = vmul.f32 %v5615_v6, %v6696_v22  ;;  %v4865_v17 = vmul.f32 -1.442695, %v6838_v59 }
 0x290   : > { %v5619_v53 = vpop.eup %5618  ;;  %v2499_v13 = vadd.f32 1.0, %v5617_v44  ;;  %5644 = vpow2.f32 %v4855_v1  ;;  %v5239_v47 = vpop.f32.mrf.mxu1  ;;  %5252 = vmatmul.mubr.msk.f32.gmra.mxu0 %vm1689_vm2, %v6831_v26  ;;  %v6856_v50 = vadd.f32 %v2278_v48, %v6655_v30  ;;  %v6862_v2 = vadd.f32 %v2363_v18, %v6655_v30 }
 0x291   : > { %v5621_v33 = vpop.eup %5620  ;;  %v2581_v51 = vmul.f32 %v5619_v53, %v6700_v4  ;;  %5646 = vpow2.f32 %v4859_v9  ;;  %v3848_v54 = vsel %vm3606_vm3, %v3806_v61, 0.0  ;;  %v5225_v19 = vpop.f32.mrf.mxu0  ;;  %5276 = vmatprep.mubr.msk.f32.mxu0 %vm1689_vm2, %v6647_v42  ;;  %v4861_v46 = vmul.f32 -1.442695, %v6845_v49 }
 0x292   : > { %v5623_v22 = vpop.eup %5622  ;;  %v2495_v8 = vadd.f32 1.0, %v5621_v33  ;;  %5648 = vrcp.f32 %v2499_v13  ;;  %3849 = vadd.xlane.f32.xlu0 %v3848_v54  ;;  %v6869_v9 = vadd.f32 %v5225_v19, %v6664_v29  ;;  %v3805_v30 = vmul.f32 %v6782_v60, %v6848_v32 }
 0x293   : > { %v5625_v4 = vpop.eup %5624  ;;  %v6865_v1 = vmul.f32 %v5623_v22, %v6707_v43  ;;  %5650 = vpow2.f32 %v4854_v31  ;;  %5254 = vmatprep.subr.mxu1 %v2581_v51  ;;  %v2288_v12 = vpop.f32.mrf.mxu0  ;;  %v6874_v18 = vadd.f32 %v5239_v47, %v6664_v29  ;;  %v3833_v31 = vsel %vm3606_vm3, %v3801_v58, 0.0 }
 0x294   : > { %v5627_v6 = vpop.eup %5626  ;;  %5652 = vrcp.f32 %v2495_v8  ;;  %v2494_v56 = vadd.f32 1.0, %v5625_v4  ;;  %5255 = vmatpush3.msra.mxu1 %v2581_v51  ;;  %v2373_v43 = vpop.f32.mrf.mxu1  ;;  %v4860_v61 = vmul.f32 -1.442695, %v6856_v50  ;;  %v6880_v48 = vrot.slane %v3759_v55, %v6158_v23 }
 0x295   : > { %v5629_v44 = vpop.eup %5628  ;;  %5654 = vpow2.f32 %v4858_v34  ;;  %5256 = vmatprep.subr.mxu1 %v6865_v1  ;;  %v4864_v29 = vmul.f32 -1.442695, %v6862_v2  ;;  %v6888_v34 = vadd.f32 %v2288_v12, %v6670_v52  ;;  %v4863_v55 = vmul.f32 -1.442695, %v6869_v9 }
 0x296   : > { %v5631_v53 = vpop.eup %5630  ;;  %v6883_v13 = vmul.f32 %v5629_v44, %v6715_v14  ;;  %5656 = vrcp.f32 %v2494_v56  ;;  %5257 = vmatpush3.msra.mxu1 %v6865_v1  ;;  %3834 = vadd.xlane.f32.xlu0 %v3833_v31  ;;  %v6896_v14 = vadd.f32 %v2373_v43, %v6670_v52  ;;  %v3845_v54 = vsel %vm3606_vm3, %v3805_v30, 0.0 }
 0x297   : > { %v5633_v47 = vpop.eup %5632  ;;  %v6891_v58 = vmul.f32 %v5631_v53, %v6721_v40  ;;  %5258 = vmatprep.subr.mxu1 %v6823_v24  ;;  %5658 = vpow2.f32 %v4861_v46  ;;  %v4867_v19 = vmul.f32 -1.442695, %v6874_v18  ;;  %v3808_v52 = vmul.f32 %v6782_v60, %v2581_v51 }
 0x298   : > { %v5635_v33 = vpop.eup %5634  ;;  %5259 = vmatpush3.msra.mxu1 %v6823_v24  ;;  %5660 = vpow2.f32 %v4865_v17  ;;  %v3814_v40 = vmul.f32 %v6880_v48, %v6883_v13  ;;  %v4862_v4 = vmul.f32 -1.442695, %v6888_v34  ;;  %v4866_v46 = vmul.f32 -1.442695, %v6896_v14 }
 0x299   : > { %v5637_v22 = vpop.eup %5636  ;;  %v6904_v8 = vmul.f32 %v5635_v33, %v6729_v27  ;;  %5260 = vmatprep.subr.mxu1 %v6848_v32  ;;  %5662 = vpow2.f32 %v4860_v61  ;;  %v3854_v44 = vsel %vm3606_vm3, %v3808_v52, 0.0  ;;  %v3807_v31 = vmul.f32 %v6782_v60, %v6865_v1 }
 0x29a   : > { %v5639_v24 = vpop.eup %5638  ;;  %v6910_v17 = vmul.f32 %v5637_v22, %v6733_v15  ;;  %5261 = vmatpush3.msra.mxu1 %v6848_v32  ;;  %3846 = vadd.xlane.f32.xlu0 %v3845_v54  ;;  %5664 = vpow2.f32 %v4864_v29  ;;  %v3872_v27 = vsel %vm3606_vm3, %v3814_v40, 0.0  ;;  %v3809_v15 = vmul.f32 %v6834_v63, %v6891_v58 }
 0x29b   : > { %v5641_v12 = vpop.eup %5640  ;;  %v2584_v56 = vmul.f32 %v5639_v24, %v6739_v41  ;;  %5263 = vmatmul.mubr.msk.f32.vlgmr.msra.gmra.mxu1 %vm1689_vm2, %v6802_v45  ;;  %5666 = vpow2.f32 %v4863_v55  ;;  %3873 = vadd.xlane.f32.xlu1 %v3872_v27  ;;  %v2583_v32 = vmul.f32 %v5627_v6, %v6710_v39  ;;  %v2586_v29 = vmul.f32 %v5633_v47, %v6725_v10 }
 0x29c   : > { %v5643_v51 = vpop.eup %5642  ;;  %v2588_v30 = vmul.f32 %v5641_v12, %v6743_v35  ;;  %5668 = vpow2.f32 %v4867_v19  ;;  %5265 = vmatprep.mubr.msk.f32.mxu1 %vm1689_vm2, %v6811_v37  ;;  %5268 = vmatprep.subr.mxu0 %v6904_v8  ;;  %v3726_v35 = vrot.slane %v3712_v7, %v6222_v3  ;;  %v3857_v60 = vsel %vm3606_vm3, %v3809_v15, 0.0 }
 0x29d   : > { %v5645_v41 = vpop.eup %5644  ;;  %v2498_v43 = vadd.f32 1.0, %v5643_v51  ;;  %5670 = vpow2.f32 %v4862_v4  ;;  %5282 = vmatprep.subr.mxu1 %v6910_v17  ;;  %5269 = vmatpush3.msra.mxu0 %v6904_v8  ;;  %v3851_v55 = vsel %vm3606_vm3, %v3807_v31, 0.0  ;;  %v3810_v33 = vmul.f32 %v6834_v63, %v2583_v32 }
 0x29e   : > { %v5647_v39 = vpop.eup %5646  ;;  %v2497_v6 = vadd.f32 1.0, %v5645_v41  ;;  %3855 = vadd.xlane.f32.xlu0 %v3854_v44  ;;  %5672 = vpow2.f32 %v4866_v46  ;;  %5283 = vmatpush3.msra.mxu1 %v6910_v17  ;;  %v6944_v19 = vrot.slane %v3726_v35, %v6222_v3  ;;  %v3811_v10 = vmul.f32 %v6834_v63, %v2584_v56 }
 0x29f   : > { %v6935_v61 = vpop.eup %5648  ;;  %5674 = vrcp.f32 %v2498_v43  ;;  %v2501_v53 = vadd.f32 1.0, %v5647_v39  ;;  %5266 = vmatmul.mubr.msk.f32.gmra.mxu1 %vm1689_vm2, %v6831_v26  ;;  %5270 = vmatprep.subr.mxu0 %v2584_v56  ;;  %v3728_v40 = vcombine.high %v3726_v35, %v3726_v35  ;;  %v3860_v27 = vsel %vm3606_vm3, %v3810_v33, 0.0 }
 0x2a0   : > { %v5651_v1 = vpop.eup %5650  ;;  %5676 = vrcp.f32 %v2497_v6  ;;  %5284 = vmatprep.subr.mxu1 %v2588_v30  ;;  %3858 = vadd.xlane.f32.xlu1 %v3857_v60  ;;  %v3813_v12 = vmul.f32 %v6880_v48, %v2586_v29  ;;  %v6961_v51 = vrot.slane %v6944_v19, %v6158_v23  ;;  %v6982_v6 = vmul.f32 %v6935_v61, %v6751_v20 }
 0x2a1   : > { %v5653_v57 = vpop.eup %5652  ;;  %5678 = vrcp.f32 %v2501_v53  ;;  %v2496_v7 = vadd.f32 1.0, %v5651_v1  ;;  %5285 = vmatpush3.msra.mxu1 %v2588_v30  ;;  %5271 = vmatpush3.msra.mxu0 %v2584_v56  ;;  %v6965_v41 = vrot.slane %v3728_v40, %v6222_v3  ;;  %v3812_v3 = vmul.f32 %v6834_v63, %v6904_v8 }
 0x2a2   : > { %v5655_v54 = vpop.eup %5654  ;;  %3852 = vadd.xlane.f32.xlu0 %v3851_v55  ;;  %5272 = vmatprep.subr.mxu0 %v2583_v32  ;;  %v6949_v4 = vmul.f32 %v5653_v57, %v6757_v11  ;;  %v3863_v11 = vsel %vm3606_vm3, %v3811_v10, 0.0  ;;  %v3869_v35 = vsel %vm3606_vm3, %v3813_v12, 0.0  ;;  %v3816_v61 = vmul.f32 %v6880_v48, %v6910_v17 }
 0x2a3   : > { %v5657_v47 = vpop.eup %5656  ;;  %5680 = vrcp.f32 %v2496_v7  ;;  %v2500_v22 = vadd.f32 1.0, %v5655_v54  ;;  %5286 = vmatprep.subr.mxu1 %v6883_v13  ;;  %5273 = vmatpush3.msra.mxu0 %v2583_v32  ;;  %v6987_v57 = vrot.slane %v6965_v41, %v6158_v23  ;;  %v3866_v54 = vsel %vm3606_vm3, %v3812_v3, 0.0 }
 0x2a4   : > { %v5659_v52 = vpop.eup %5658  ;;  %5287 = vmatpush3.msra.mxu1 %v6883_v13  ;;  %5274 = vmatprep.subr.mxu0 %v6891_v58  ;;  %v3815_v13 = vmul.f32 %v6880_v48, %v2588_v30  ;;  %v3818_v30 = vmul.f32 %v6961_v51, %v6949_v4  ;;  %v6997_v55 = vmul.f32 %v5657_v47, %v6766_v36  ;;  %v3878_v47 = vsel %vm3606_vm3, %v3816_v61, 0.0 }
 0x2a5   : > { %v5661_v24 = vpop.eup %5660  ;;  %5682 = vrcp.f32 %v2500_v22  ;;  %v2503_v46 = vadd.f32 1.0, %v5659_v52  ;;  %5288 = vmatprep.subr.mxu1 %v2586_v29  ;;  %5290 = vmatprep.mubr.msk.f32.mxu1 %vm1689_vm2, %v6647_v42  ;;  %v3822_v48 = vmul.f32 %v6987_v57, %v6982_v6  ;;  %v3758_v12 = vcombine.high %v6944_v19, %v6944_v19 }
 0x2a6   : > { %v5663_v56 = vpop.eup %5662  ;;  %v2507_v15 = vadd.f32 1.0, %v5661_v24  ;;  %3861 = vadd.xlane.f32.xlu0 %v3860_v27  ;;  %5289 = vmatpush3.msra.mxu1 %v2586_v29  ;;  %v3875_v60 = vsel %vm3606_vm3, %v3815_v13, 0.0  ;;  %v3884_v20 = vsel %vm3606_vm3, %v3818_v30, 0.0 }
 0x2a7   : > { %v5665_v32 = vpop.eup %5664  ;;  %5684 = vrcp.f32 %v2503_v46  ;;  %3864 = vadd.xlane.f32.xlu1 %v3863_v11  ;;  %5275 = vmatpush3.msra.mxu0 %v6891_v58  ;;  %v2502_v31 = vadd.f32 1.0, %v5663_v56  ;;  %v3760_v46 = vcombine.high %v6965_v41, %v6965_v41 }
 0x2a8   : > { %v5667_v43 = vpop.eup %5666  ;;  %5686 = vrcp.f32 %v2507_v15  ;;  %5277 = vmatmul.mubr.msk.f32.vlgmr.msra.gmra.mxu0 %vm1689_vm2, %v6802_v45  ;;  %5291 = vmatmul.mubr.msk.f32.vlgmr.msra.gmra.mxu1 %vm1689_vm2, %v6802_v45  ;;  %v2506_v33 = vadd.f32 1.0, %v5665_v32 }
 0x2a9   : > { %v5669_v44 = vpop.eup %5668  ;;  %v2505_v39 = vadd.f32 1.0, %v5667_v43  ;;  %5293 = vmatprep.mubr.msk.f32.mxu1 %vm1689_vm2, %v6811_v37  ;;  %5279 = vmatprep.mubr.msk.f32.mxu0 %vm1689_vm2, %v6811_v37  ;;  %v7034_v32 = vrot.slane %v3760_v46, %v6158_v23  ;;  %v3550_v46 = vld [vmem:[%s7758_s14] sm:$0xff] }
 0x2aa   : > { %v5671_v58 = vpop.eup %5670  ;;  %v2509_v53 = vadd.f32 1.0, %v5669_v44  ;;  %3870 = vadd.xlane.f32.xlu0 %v3869_v35 }
 0x2ab   : > { %v5673_v1 = vpop.eup %5672  ;;  %5688 = vrcp.f32 %v2505_v39  ;;  %v2504_v29 = vadd.f32 1.0, %v5671_v58  ;;  %3876 = vadd.xlane.f32.xlu1 %v3875_v60 }
 0x2ac   : > { %v5675_v63 = vpop.eup %5674  ;;  %5690 = vrcp.f32 %v2509_v53  ;;  %v2508_v8 = vadd.f32 1.0, %v5673_v1  ;;  %5280 = vmatmul.mubr.msk.f32.gmra.mxu0 %vm1689_vm2, %v6831_v26  ;;  %5294 = vmatmul.mubr.msk.f32.gmra.mxu1 %vm1689_vm2, %v6831_v26 }
 0x2ad   : > { %v5677_v7 = vpop.eup %5676  ;;  %5692 = vrcp.f32 %v2502_v31  ;;  %5318 = vmatprep.mubr.msk.f32.mxu1 %vm1689_vm2, %v6647_v42  ;;  %5304 = vmatprep.mubr.msk.f32.mxu0 %vm1689_vm2, %v6647_v42  ;;  %v2594_v22 = vmul.f32 %v5675_v63, %v6786_v28 }
 0x2ae   : > { %v5679_v10 = vpop.eup %5678  ;;  %v2593_v40 = vmul.f32 %v5677_v7, %v6791_v25  ;;  %5694 = vrcp.f32 %v2504_v29  ;;  %3867 = vadd.xlane.f32.xlu0 %v3866_v54  ;;  %v3817_v25 = vmul.f32 %v6961_v51, %v6997_v55 }
 0x2af   : > { %v7008_v36 = vmul.f32 %v5679_v10, %v6795_v16  ;;  %5696 = vrcp.f32 %v2508_v8  ;;  %3885 = vadd.xlane.f32.xlu1 %v3884_v20  ;;  %v3896_v16 = vsel %vm3606_vm3, %v3822_v48, 0.0  ;;  %v3821_v11 = vmul.f32 %v6987_v57, %v2594_v22  ;;  %v4382_v48 = vld [vmem:[%s7759_s15 + $0x20] sm:$0xff] }
 0x2b0   : > { %v5681_v17 = vpop.eup %5680  ;;  %5296 = vmatprep.subr.mxu0 %v2593_v40  ;;  %5698 = vrcp.f32 %v2506_v33  ;;  %v3881_v15 = vsel %vm3606_vm3, %v3817_v25, 0.0  ;;  %v3820_v44 = vmul.f32 %v6961_v51, %v2593_v40  ;;  %v4378_v25 = vld [vmem:[%s7759_s15] sm:$0xff] }
 0x2b1   : > { %v2592_v52 = vmul.f32 %v5681_v17, %v6815_v62  ;;  %5310 = vmatprep.subr.mxu1 %v7008_v36  ;;  %5297 = vmatpush3.msra.mxu0 %v2593_v40  ;;  %v2612_v17 = vld [vmem:[%s7757_s13 + $0x10] sm:$0xff] }
 0x2b2   : > { %v5683_v24 = vpop.eup %5682  ;;  %3879 = vadd.xlane.f32.xlu0 %v3878_v47  ;;  %5311 = vmatpush3.msra.mxu1 %v7008_v36  ;;  %v3890_v53 = vsel %vm3606_vm3, %v3820_v44, 0.0  ;;  %v4380_v47 = vld [vmem:[%s7759_s15 + $0x10] sm:$0xff] }
 0x2b3   : > { %v2596_v28 = vmul.f32 %v5683_v24, %v6805_v38  ;;  %5298 = vmatprep.subr.mxu0 %v2592_v52  ;;  %3897 = vadd.xlane.f32.xlu1 %v3896_v16  ;;  %v3819_v27 = vmul.f32 %v6961_v51, %v2592_v52  ;;  %v2611_v24 = vld [vmem:[%s7757_s13 + $0x8] sm:$0xff] }
 0x2b4   : > { %v5685_v62 = vpop.eup %5684  ;;  %5299 = vmatpush3.msra.mxu0 %v2592_v52  ;;  %v2613_v52 = vld [vmem:[%s7757_s13 + $0x18] sm:$0xff]  ;;  %v3551_v16 = vld [vmem:[%s7758_s14 + $0x8] sm:$0xff] }
 0x2b5   : > { %v5687_v56 = vpop.eup %5686  ;;  %5312 = vmatprep.subr.mxu1 %v2596_v28  ;;  %5300 = vmatprep.subr.mxu0 %v6949_v4  ;;  %v7028_v13 = vmul.f32 %v5685_v62, %v6845_v49  ;;  %v3887_v49 = vsel %vm3606_vm3, %v3819_v27, 0.0  ;;  %v3823_v41 = vmul.f32 %v6987_v57, %v2596_v28  ;;  %v3552_v62 = vld [vmem:[%s7758_s14 + $0x10] sm:$0xff]  ;;  %v5833_v27 = vld [vmem:[%s6681_s8] sm:$0x1] }
 0x2b6   : > { %v7031_v38 = vmul.f32 %v5687_v56, %v6838_v59  ;;  %5313 = vmatpush3.msra.mxu1 %v2596_v28  ;;  %3882 = vadd.xlane.f32.xlu0 %v3881_v15  ;;  %v7043_v59 = vrot.slane %v3758_v12, %v6158_v23  ;;  %v3553_v28 = vld [vmem:[%s7758_s14 + $0x18] sm:$0xff]  ;;  %v3930_v12 = vsel %vm3929_vm4, %v5833_v27, 0.0  ;;  %vm4166_vm4 = vcmask 15360  }
 0x2b7   : > { %5314 = vmatprep.subr.mxu1 %v6982_v6  ;;  %5301 = vmatpush3.msra.mxu0 %v6949_v4  ;;  %v3893_v4 = vsel %vm3606_vm3, %v3821_v11, 0.0 }
 0x2b8   : > { %v5689_v19 = vpop.eup %5688  ;;  %5315 = vmatpush3.msra.mxu1 %v6982_v6  ;;  %5302 = vmatprep.subr.mxu0 %v6997_v55  ;;  %v3830_v43 = vmul.f32 %v7034_v32, %v7031_v38  ;;  %v3826_v35 = vmul.f32 %v7043_v59, %v7028_v13 }
 0x2b9   : > { %v5691_v30 = vpop.eup %5690  ;;  %5316 = vmatprep.subr.mxu1 %v2594_v22  ;;  %3888 = vadd.xlane.f32.xlu1 %v3887_v49  ;;  %v2601_v39 = vmul.f32 %v5689_v19, %v6869_v9  ;;  %v3899_v9 = vsel %vm3606_vm3, %v3823_v41, 0.0 }
 0x2ba   : > { %v5693_v31 = vpop.eup %5692  ;;  %5317 = vmatpush3.msra.mxu1 %v2594_v22  ;;  %3894 = vadd.xlane.f32.xlu0 %v3893_v4  ;;  %v2605_v58 = vmul.f32 %v5691_v30, %v6874_v18  ;;  %v3824_v18 = vmul.f32 %v6987_v57, %v7008_v36  ;;  %v3908_v29 = vsel %vm3606_vm3, %v3826_v35, 0.0  ;;  %v4381_v36 = vld [vmem:[%s7759_s15 + $0x18] sm:$0xff]  ;;  %v4379_v22 = vld [vmem:[%s7759_s15 + $0x8] sm:$0xff] }
 0x2bb   : > { %v5695_v3 = vpop.eup %5694  ;;  %5303 = vmatpush3.msra.mxu0 %v6997_v55  ;;  %5319 = vmatmul.mubr.msk.f32.vlgmr.msra.gmra.mxu1 %vm1689_vm2, %v6802_v45  ;;  %v2598_v51 = vmul.f32 %v5693_v31, %v6856_v50  ;;  %v3828_v33 = vmul.f32 %v7043_v59, %v2601_v39 }
 0x2bc   : > { %v5697_v6 = vpop.eup %5696  ;;  %5305 = vmatmul.mubr.msk.f32.vlgmr.msra.gmra.mxu0 %vm1689_vm2, %v6802_v45  ;;  %5321 = vmatprep.mubr.msk.f32.mxu1 %vm1689_vm2, %v6811_v37  ;;  %v2600_v1 = vmul.f32 %v5695_v3, %v6888_v34  ;;  %v3902_v57 = vsel %vm3606_vm3, %v3824_v18, 0.0  ;;  %v3832_v40 = vmul.f32 %v7034_v32, %v2605_v58 }
 0x2bd   : > { %3900 = vadd.xlane.f32.xlu1 %v3899_v9  ;;  %5307 = vmatprep.mubr.msk.f32.mxu0 %vm1689_vm2, %v6811_v37  ;;  %v5699_v60 = vpop.eup %5698  ;;  %v2604_v63 = vmul.f32 %v5697_v6, %v6896_v14  ;;  %v3825_v34 = vmul.f32 %v7043_v59, %v2598_v51  ;;  %v3920_v14 = vsel %vm3606_vm3, %v3830_v43, 0.0  ;;  %v3914_v10 = vsel %vm3606_vm3, %v3828_v33, 0.0 }
 0x2be   : > { %3891 = vadd.xlane.f32.xlu0 %v3890_v53  ;;  %5324 = vmatprep.subr.mxu0 %v2601_v39  ;;  %v2602_v50 = vmul.f32 %v5699_v60, %v6862_v2  ;;  %v3827_v8 = vmul.f32 %v7043_v59, %v2600_v1 }
 0x2bf   : > { %5322 = vmatmul.mubr.msk.f32.gmra.mxu1 %vm1689_vm2, %v6831_v26  ;;  %5338 = vmatprep.subr.mxu1 %v2605_v58  ;;  %v3905_v2 = vsel %vm3606_vm3, %v3825_v34, 0.0  ;;  %v3831_v7 = vmul.f32 %v7034_v32, %v2604_v63 }
 0x2c0   : > { %5308 = vmatmul.mubr.msk.f32.gmra.mxu0 %vm1689_vm2, %v6831_v26  ;;  %5339 = vmatpush3.msra.mxu1 %v2605_v58  ;;  %v3829_v20 = vmul.f32 %v7034_v32, %v2602_v50  ;;  %v3911_v61 = vsel %vm3606_vm3, %v3827_v8, 0.0  ;;  %v7812_v58 = vlaneseq }
 0x2c1   : > { %3909 = vadd.xlane.f32.xlu1 %v3908_v29  ;;  %5325 = vmatpush3.msra.mxu0 %v2601_v39  ;;  %v3923_v54 = vsel %vm3606_vm3, %v3831_v7, 0.0 }
 0x2c2   : > { %3903 = vadd.xlane.f32.xlu0 %v3902_v57  ;;  %5326 = vmatprep.subr.mxu0 %v2600_v1  ;;  %v3917_v55 = vsel %vm3606_vm3, %v3829_v20, 0.0  ;;  %v7180_v6 = vand.u32 127, %v7812_v58 }
 0x2c3   : > { %5340 = vmatprep.subr.mxu1 %v2604_v63  ;;  %5327 = vmatpush3.msra.mxu0 %v2600_v1 }
 0x2c4   : > { %5341 = vmatpush3.msra.mxu1 %v2604_v63  ;;  %5328 = vmatprep.subr.mxu0 %v7028_v13  ;;  %v4210_v53 = vadd.s32 4294967280, %v7180_v6  ;;  %v4222_v18 = vadd.s32 4294967264, %v7180_v6  ;;  %v4229_v34 = vadd.s32 4294967256, %v7180_v6 }
 0x2c5   : > { %3921 = vadd.xlane.f32.xlu1 %v3920_v14  ;;  %5342 = vmatprep.subr.mxu1 %v7031_v38 }
 0x2c6   : > { %3906 = vadd.xlane.f32.xlu0 %v3905_v2  ;;  %5329 = vmatpush3.msra.mxu0 %v7028_v13  ;;  %v7195_v63 = vsub.s32 %v4210_v53, %v6154_v21 }
 0x2c7   : > { %5343 = vmatpush3.msra.mxu1 %v7031_v38  ;;  %5330 = vmatprep.subr.mxu0 %v2598_v51 }
 0x2c8   : > { %5344 = vmatprep.subr.mxu1 %v2602_v50  ;;  %5346 = vmatprep.mubr.msk.f32.mxu1 %vm1689_vm2, %v6647_v42 }
 0x2c9   : > { %5345 = vmatpush3.msra.mxu1 %v2602_v50  ;;  %3912 = vadd.xlane.f32.xlu1 %v3911_v61  ;;  %v7198_v50 = vsub.s32 %v4222_v18, %v6154_v21 }
 0x2ca   : > { %3918 = vadd.xlane.f32.xlu0 %v3917_v55  ;;  %5331 = vmatpush3.msra.mxu0 %v2598_v51  ;;  %v4215_v51 = vadd.s32 4294967272, %v7180_v6 }
 0x2cb   : > { %5332 = vmatprep.mubr.msk.f32.mxu0 %vm1689_vm2, %v6647_v42  ;;  %5347 = vmatmul.mubr.msk.f32.vlgmr.msra.gmra.mxu1 %vm1689_vm2, %v6802_v45  ;;  %v7811_v42 = vmov 0.0  }
 0x2cc   : > { %5333 = vmatmul.mubr.msk.f32.vlgmr.msra.gmra.mxu0 %vm1689_vm2, %v6802_v45  ;;  %5349 = vmatprep.mubr.msk.f32.mxu1 %vm1689_vm2, %v6811_v37  ;;  %v3926_v45 = vsel %vm3606_vm3, %v3832_v40, 0.0  ;;  %v7192_v29 = vsub.s32 %v4215_v51, %v6154_v21 }
 0x2cd   : > { %3924 = vadd.xlane.f32.xlu1 %v3923_v54  ;;  %5335 = vmatprep.mubr.msk.f32.mxu0 %vm1689_vm2, %v6811_v37  ;;  %v4383_v37 = vld [vmem:[%s7759_s15 + $0x28] sm:$0xff]  ;;  %v7214_v54 = vsub.s32 %v4229_v34, %v6154_v21 }
 0x2ce   : > { %3915 = vadd.xlane.f32.xlu0 %v3914_v10  ;;  %5352 = vmatprep.subr.mxu0 %v7811_v42 }
 0x2cf   : > { %5350 = vmatmul.mubr.msk.f32.gmra.mxu1 %vm1689_vm2, %v6831_v26  ;;  %5367 = vmatprep.subr.mxu1 %v7811_v42 }
 0x2d0   : > { %5336 = vmatmul.mubr.msk.f32.gmra.mxu0 %vm1689_vm2, %v6831_v26  ;;  %5375 = vmatprep.mubr.msk.f32.mxu1 %vm5916_vm0, %v7811_v42  ;;  %v2610_v26 = vld [vmem:[%s7757_s13] sm:$0xff] }
 0x2d1   : > { %5364 = vmatprep.mubr.msk.f32.mxu0 %vm5916_vm0, %v7811_v42  ;;  %5353 = vmatpush3.msra.mxu0 %v4383_v37  ;;  %vm832_vm0 = vcmp.ne.s32.totalorder %v6154_v21, %v7180_v6 }
 0x2d2   : > { %3927 = vadd.xlane.f32.xlu0 %v3926_v45  ;;  %5354 = vmatprep.subr.mxu0 %v7811_v42 }
 0x2d3   : > { %5355 = vmatpush3.msra.mxu0 %v4382_v48 }
 0x2d4   : > { %5356 = vmatprep.subr.mxu0 %v7811_v42 }
 0x2d5   : > { %5357 = vmatpush3.msra.mxu0 %v4381_v36 }
 0x2d6   : > { %5358 = vmatprep.subr.mxu0 %v7811_v42 }
 0x2d7   : > { %5359 = vmatpush3.msra.mxu0 %v4380_v47 }
 0x2d8   : > { %5360 = vmatprep.subr.mxu0 %v7811_v42 }
 0x2d9   : > { %5361 = vmatpush3.msra.mxu0 %v4379_v22 }
 0x2da   : > { %5362 = vmatprep.subr.mxu0 %v7811_v42 }
 0x2db   : > { %5363 = vmatpush3.msra.mxu0 %v4378_v25 }
 0x2de   : > { %2616 = vperm.xlu1 %5443, %v2610_v26  }
 0x2e2   : > { %2626 = vperm.xlu1 %5443, %v2612_v17  }
 0x2e6   : > { %2631 = vperm.xlu1 %5443, %v2613_v52  }
 0x2e8   : > { %2621 = vperm.xlu0 %5440, %v2611_v24  }
 0x2ea   : > { %3561 = vperm.xlu1 %5443, %v3551_v16  }
 0x2ec   : > { %3556 = vperm.xlu0 %5440, %v3550_v46  }
 0x2ee   : > { %3571 = vperm.xlu1 %5443, %v3553_v28  }
 0x2f0   : > { %3566 = vperm.xlu0 %5440, %v3552_v62  }
 0x30e   : > { %v3838_v56 = vpop.xlane.xlu1 %3837 }
 0x30f   : > { %3931 = vadd.xlane.f32.xlu0 %v3930_v12  ;;  %v4219_v33 = vrot.slane %v3838_v56, %v7192_v29 }
 0x312   : > { %v3844_v15 = vpop.xlane.xlu1 %3843 }
 0x313   : > { %v4233_v17 = vrot.slane %v3844_v15, %v7214_v54 }
 0x316   : > { %v3841_v38 = vpop.xlane.xlu1 %3840 }
 0x317   : > { %v4226_v7 = vrot.slane %v3841_v38, %v7198_v50 }
 0x31b   : > { %v3850_v11 = vpop.xlane.xlu0 %3849 }
 0x31c   : > { %v4243_v20 = vrot.slane %v3850_v11, %v7192_v29 }
 0x31f   : > { %v3835_v13 = vpop.xlane.xlu0 %3834 }
 0x320   : > { %v4214_v61 = vrot.slane %v3835_v13, %v7195_v63 }
 0x322   : > { %v4221_v37 = vsel %vm4220_vm5, %v4219_v33, %v4214_v61 }
 0x323   : > { %v3847_v32 = vpop.xlane.xlu0 %3846  ;;  %v4228_v48 = vsel %vm4227_vm6, %v4226_v7, %v4221_v37 }
 0x324   : > { %v7163_v19 = vpop.xlane.xlu1 %3873  ;;  %v4239_v14 = vrot.slane %v3847_v32, %v7195_v63  ;;  %v4235_v28 = vsel %vm4234_vm7, %v4233_v17, %v4228_v48 }
 0x325   : > { %v4281_v62 = vrot.slane %v7163_v19, %v7192_v29 }
 0x326   : > { %v4244_v10 = vsel %vm4220_vm5, %v4243_v20, %v4239_v14 }
 0x327   : > { %v3856_v49 = vpop.xlane.xlu0 %3855 }
 0x328   : > { %v4253_v26 = vrot.slane %v3856_v49, %v7214_v54 }
 0x329   : > { %v3859_v41 = vpop.xlane.xlu1 %3858 }
 0x32a   : > { %v4258_v22 = vrot.slane %v3859_v41, %v7195_v63 }
 0x32b   : > { %v3853_v59 = vpop.xlane.xlu0 %3852 }
 0x32c   : > { %v4248_v2 = vrot.slane %v3853_v59, %v7198_v50 }
 0x32e   : > { %v4249_v45 = vsel %vm4227_vm6, %v4248_v2, %v4244_v10 }
 0x32f   : > { %v3862_v43 = vpop.xlane.xlu0 %3861  ;;  %v4254_v47 = vsel %vm4234_vm7, %v4253_v26, %v4249_v45 }
 0x330   : > { %v7165_v30 = vpop.xlane.xlu1 %3864  ;;  %v4262_v52 = vrot.slane %v3862_v43, %v7192_v29  ;;  %v4369_v12 = vsel %vm4008_vm8, %v4254_v47, %v4235_v28 }
 0x331   : > { %v4267_v24 = vrot.slane %v7165_v30, %v7198_v50 }
 0x332   : > { %v4263_v15 = vsel %vm4220_vm5, %v4262_v52, %v4258_v22 }
 0x333   : > { %v7167_v4 = vpop.xlane.xlu0 %3870  ;;  %v4268_v19 = vsel %vm4227_vm6, %v4267_v24, %v4263_v15 }
 0x334   : > { %v7169_v44 = vpop.xlane.xlu1 %3876  ;;  %v4277_v16 = vrot.slane %v7167_v4, %v7195_v63 }
 0x335   : > { %v4286_v27 = vrot.slane %v7169_v44, %v7198_v50 }
 0x336   : > { %v4282_v49 = vsel %vm4220_vm5, %v4281_v62, %v4277_v16 }
 0x337   : > { %v7171_v31 = vpop.xlane.xlu0 %3867 }
 0x338   : > { %v7173_v39 = vpop.xlane.xlu1 %3885  ;;  %v4272_v11 = vrot.slane %v7171_v31, %v7214_v54 }
 0x339   : > { %v4300_v30 = vrot.slane %v7173_v39, %v7192_v29 }
 0x33a   : > { %v4273_v39 = vsel %vm4234_vm7, %v4272_v11, %v4268_v19 }
 0x33b   : > { %v7175_v35 = vpop.xlane.xlu0 %3879 }
 0x33c   : > { %v7177_v3 = vpop.xlane.xlu1 %3897  ;;  %v4291_v13 = vrot.slane %v7175_v35, %v7214_v54  ;;  %v4287_v35 = vsel %vm4227_vm6, %v4286_v27, %v4282_v49 }
 0x33d   : > { %v4319_v58 = vrot.slane %v7177_v3, %v7192_v29 }
 0x33e   : > { %v4292_v18 = vsel %vm4234_vm7, %v4291_v13, %v4287_v35  ;;  %v5834_v13 = vld [vmem:[%s6110_s6] sm:$0xff] }
 0x33f   : > { %v7182_v9 = vpop.xlane.xlu0 %3882 }
 0x340   : > { %v4296_v38 = vrot.slane %v7182_v9, %v7195_v63 }
 0x342   : > { %v7187_v60 = vpop.xlane.xlu1 %3888 }
 0x343   : > { %v7189_v1 = vpop.xlane.xlu0 %3894  ;;  %v4305_v41 = vrot.slane %v7187_v60, %v7198_v50  ;;  %v4301_v60 = vsel %vm4220_vm5, %v4300_v30, %v4296_v38 }
 0x344   : > { %v4315_v59 = vrot.slane %v7189_v1, %v7195_v63 }
 0x345   : > { %v4306_v34 = vsel %vm4227_vm6, %v4305_v41, %v4301_v60 }
 0x346   : > { %v7200_v57 = vpop.xlane.xlu1 %3900  ;;  %v4320_v14 = vsel %vm4220_vm5, %v4319_v58, %v4315_v59 }
 0x347   : > { %v7204_v8 = vpop.xlane.xlu0 %3891  ;;  %v4324_v4 = vrot.slane %v7200_v57, %v7198_v50 }
 0x348   : > { %v4310_v44 = vrot.slane %v7204_v8, %v7214_v54 }
 0x349   : > { %v4325_v20 = vsel %vm4227_vm6, %v4324_v4, %v4320_v14 }
 0x34a   : > { %v7210_v55 = vpop.xlane.xlu1 %3909  ;;  %v4311_v61 = vsel %vm4234_vm7, %v4310_v44, %v4306_v34 }
 0x34b   : > { %v3904_v40 = vpop.xlane.xlu0 %3903  ;;  %v4338_v1 = vrot.slane %v7210_v55, %v7192_v29  ;;  %v4370_v55 = vsel %vm4011_vm9, %v4273_v39, %v4369_v12 }
 0x34c   : > { %v7231_v46 = vpop.f32.mrf.mxu0  ;;  %v4329_v9 = vrot.slane %v3904_v40, %v7214_v54  ;;  %v4371_v37 = vsel %vm4014_vm10, %v4292_v18, %v4370_v55 }
 0x34d   : > { %v4372_v47 = vsel %vm4017_vm11, %v4311_v61, %v4371_v37 }
 0x34e   : > { %v7221_v36 = vpop.xlane.xlu1 %3921  ;;  %v2712_v43 = vpop.f32.mrf.mxu0  ;;  %v4330_v10 = vsel %vm4234_vm7, %v4329_v9, %v4325_v20 }
 0x34f   : > { %v3907_v25 = vpop.xlane.xlu0 %3906  ;;  %v4357_v40 = vrot.slane %v7221_v36, %v7192_v29  ;;  %v4373_v52 = vsel %vm4020_vm12, %v4330_v10, %v4372_v47 }
 0x350   : > { %v4334_v31 = vrot.slane %v3907_v25, %v7195_v63  ;;  %v5253_v2 = vpop.f32.mrf.mxu0 }
 0x352   : > { %v3913_v56 = vpop.xlane.xlu1 %3912  ;;  %v4339_v7 = vsel %vm4220_vm5, %v4338_v1, %v4334_v31  ;;  %v2722_v36 = vpop.f32.mrf.mxu0 }
 0x353   : > { %v3919_v32 = vpop.xlane.xlu0 %3918  ;;  %v4343_v51 = vrot.slane %v3913_v56, %v7198_v50 }
 0x354   : > { %v4353_v3 = vrot.slane %v3919_v32, %v7195_v63 }
 0x355   : > { %v4344_v63 = vsel %vm4227_vm6, %v4343_v51, %v4339_v7 }
 0x356   : > { %v3925_v53 = vpop.xlane.xlu1 %3924  ;;  %v4358_v22 = vsel %vm4220_vm5, %v4357_v40, %v4353_v3  ;;  %vm4559_vm5 = vcmask 23552  }
 0x357   : > { %v3916_v57 = vpop.xlane.xlu0 %3915  ;;  %v4362_v33 = vrot.slane %v3925_v53, %v7198_v50 }
 0x358   : > { %v4348_v8 = vrot.slane %v3916_v57, %v7214_v54 }
 0x359   : > { %v4363_v25 = vsel %vm4227_vm6, %v4362_v33, %v4358_v22 }
 0x35a   : > { %v7282_v45 = vpop.permute.xlu1 %2616  ;;  %v4349_v26 = vsel %vm4234_vm7, %v4348_v8, %v4344_v63 }
 0x35b   : > { %v5264_v48 = vpop.f32.mrf.mxu1  ;;  %v3928_v17 = vpop.xlane.xlu0 %3927  ;;  %v7287_v50 = vadd.f32 %v2712_v43, %v7282_v45  ;;  %v4374_v28 = vsel %vm4023_vm13, %v4349_v26, %v4373_v52 }
 0x35c   : > { %v4367_v29 = vrot.slane %v3928_v17, %v7214_v54 }
 0x35d   : > { %v4900_v24 = vmul.f32 -1.442695, %v7287_v50  ;;  %v2797_v16 = vpop.f32.mrf.mxu1 }
 0x35e   : > { %v4368_v62 = vsel %vm4234_vm7, %v4367_v29, %v4363_v25  ;;  %v7298_v27 = vadd.f32 %v2797_v16, %v7282_v45  ;;  %v7300_v12 = vpop.permute.xlu1 %2626 }
 0x35f   : > { %v4375_v54 = vsel %vm4026_vm14, %v4368_v62, %v4374_v28  ;;  %5700 = vpow2.f32 %v4900_v24  ;;  %v5267_v56 = vpop.f32.mrf.mxu1  ;;  %v7304_v15 = vadd.f32 %v2722_v36, %v7300_v12 }
 0x360   : > { %v4904_v11 = vmul.f32 -1.442695, %v7298_v27  ;;  %v4377_v38 = vsel %vm841_vm1, %v5834_v13, %v4375_v54 }
 0x361   : > { %v4902_v32 = vmul.f32 -1.442695, %v7304_v15  ;;  %v2807_v19 = vpop.f32.mrf.mxu1  ;;  %5365 = vmatmul.mubr.msk.f32.vlgmr.msra.gmra.mxu0 %vm4391_vm15, %v4377_v38 }
 0x362   : > { %5702 = vpow2.f32 %v4904_v11  ;;  %v7311_v49 = vadd.f32 %v2807_v19, %v7300_v12  ;;  %v7313_v41 = vpop.permute.xlu1 %2631 }
 0x363   : > { %5704 = vpow2.f32 %v4902_v32  ;;  %v7316_v59 = vadd.f32 %v5253_v2, %v7313_v41  ;;  %v7319_v43 = vadd.f32 %v5267_v56, %v7313_v41  ;;  %v7321_v30 = vpop.permute.xlu0 %2621 }
 0x364   : > { %v4906_v4 = vmul.f32 -1.442695, %v7311_v49  ;;  %v7326_v44 = vadd.f32 %v7231_v46, %v7321_v30  ;;  %v7329_v31 = vadd.f32 %v5264_v48, %v7321_v30 }
 0x365   : > { %v4903_v35 = vmul.f32 -1.442695, %v7316_v59  ;;  %v4907_v58 = vmul.f32 -1.442695, %v7319_v43 }
 0x366   : > { %5706 = vpow2.f32 %v4906_v4  ;;  %v4901_v9 = vmul.f32 -1.442695, %v7326_v44  ;;  %v4905_v51 = vmul.f32 -1.442695, %v7329_v31 }
 0x367   : > { %5708 = vpow2.f32 %v4903_v35 }
 0x368   : > { %5710 = vpow2.f32 %v4907_v58  ;;  %v5292_v53 = vpop.f32.mrf.mxu1  ;;  %v5278_v39 = vpop.f32.mrf.mxu0 }
 0x369   : > { %5712 = vpow2.f32 %v4901_v9  ;;  %v7336_v46 = vadd.f32 %v5292_v53, %v7321_v30  ;;  %v7339_v18 = vadd.f32 %v5278_v39, %v7321_v30 }
 0x36a   : > { %5714 = vpow2.f32 %v4905_v51  ;;  %v2882_v60 = vpop.f32.mrf.mxu0  ;;  %v2967_v14 = vpop.f32.mrf.mxu1 }
 0x36b   : > { %v4913_v1 = vmul.f32 -1.442695, %v7336_v46  ;;  %v4909_v57 = vmul.f32 -1.442695, %v7339_v18  ;;  %v7344_v34 = vadd.f32 %v2882_v60, %v7282_v45  ;;  %v7347_v8 = vadd.f32 %v2967_v14, %v7282_v45 }
 0x36c   : > { %v5701_v3 = vpop.eup %5700  ;;  %v5281_v2 = vpop.f32.mrf.mxu0 }
 0x36d   : > { %v3422_v20 = vadd.f32 1.0, %v5701_v3  ;;  %5716 = vpow2.f32 %v4913_v1  ;;  %v4908_v61 = vmul.f32 -1.442695, %v7344_v34  ;;  %v7351_v7 = vadd.f32 %v5281_v2, %v7313_v41  ;;  %v5295_v33 = vpop.f32.mrf.mxu1 }
 0x36e   : > { %5718 = vpow2.f32 %v4909_v57  ;;  %v4912_v55 = vmul.f32 -1.442695, %v7347_v8  ;;  %v7355_v10 = vadd.f32 %v5295_v33, %v7313_v41  ;;  %v2892_v48 = vpop.f32.mrf.mxu0  ;;  %v7371_v57 = vpop.permute.xlu0 %3556 }
 0x36f   : > { %v5703_v40 = vpop.eup %5702  ;;  %5720 = vrcp.f32 %v3422_v20  ;;  %v4911_v26 = vmul.f32 -1.442695, %v7351_v7  ;;  %v2977_v22 = vpop.f32.mrf.mxu1  ;;  %v7360_v36 = vadd.f32 %v2892_v48, %v7300_v12 }
 0x370   : > { %v5705_v63 = vpop.eup %5704  ;;  %v3426_v37 = vadd.f32 1.0, %v5703_v40  ;;  %5722 = vpow2.f32 %v4908_v61  ;;  %v4915_v47 = vmul.f32 -1.442695, %v7355_v10  ;;  %v7363_v24 = vadd.f32 %v2977_v22, %v7300_v12 }
 0x371   : > { %v3424_v17 = vadd.f32 1.0, %v5705_v63  ;;  %5724 = vpow2.f32 %v4912_v55  ;;  %v4910_v13 = vmul.f32 -1.442695, %v7360_v36 }
 0x372   : > { %5726 = vrcp.f32 %v3426_v37  ;;  %v4914_v32 = vmul.f32 -1.442695, %v7363_v24 }
 0x373   : > { %v5707_v29 = vpop.eup %5706  ;;  %5728 = vrcp.f32 %v3424_v17 }
 0x374   : > { %v5709_v52 = vpop.eup %5708  ;;  %v3428_v25 = vadd.f32 1.0, %v5707_v29  ;;  %5730 = vpow2.f32 %v4911_v26 }
 0x375   : > { %v5711_v16 = vpop.eup %5710  ;;  %v3425_v28 = vadd.f32 1.0, %v5709_v52  ;;  %5732 = vpow2.f32 %v4915_v47 }
 0x376   : > { %v5713_v62 = vpop.eup %5712  ;;  %5734 = vrcp.f32 %v3428_v25  ;;  %v3429_v54 = vadd.f32 1.0, %v5711_v16 }
 0x377   : > { %v5715_v56 = vpop.eup %5714  ;;  %5736 = vrcp.f32 %v3425_v28  ;;  %v3423_v11 = vadd.f32 1.0, %v5713_v62  ;;  %v7391_v62 = vpop.permute.xlu1 %3561 }
 0x378   : > { %5738 = vrcp.f32 %v3429_v54  ;;  %v3427_v38 = vadd.f32 1.0, %v5715_v56 }
 0x379   : > { %5740 = vrcp.f32 %v3423_v11 }
 0x37a   : > { %v5717_v19 = vpop.eup %5716  ;;  %5742 = vrcp.f32 %v3427_v38  ;;  %v7397_v38 = vpop.permute.xlu0 %3566 }
 0x37b   : > { %v5719_v4 = vpop.eup %5718  ;;  %v3435_v35 = vadd.f32 1.0, %v5717_v19  ;;  %5744 = vpow2.f32 %v4910_v13  ;;  %v5320_v58 = vpop.f32.mrf.mxu1 }
 0x37c   : > { %v5721_v9 = vpop.eup %5720  ;;  %v3431_v51 = vadd.f32 1.0, %v5719_v4  ;;  %5746 = vpow2.f32 %v4914_v32  ;;  %v5306_v53 = vpop.f32.mrf.mxu0  ;;  %v7368_v39 = vadd.f32 %v5320_v58, %v7321_v30 }
 0x37d   : > { %v5723_v60 = vpop.eup %5722  ;;  %v3518_v1 = vmul.f32 %v5721_v9, %v7287_v50  ;;  %5748 = vrcp.f32 %v3435_v35  ;;  %v7374_v14 = vadd.f32 %v5306_v53, %v7321_v30  ;;  %v3137_v3 = vpop.f32.mrf.mxu1 }
 0x37e   : > { %v5725_v2 = vpop.eup %5724  ;;  %5750 = vrcp.f32 %v3431_v51  ;;  %v3430_v20 = vadd.f32 1.0, %v5723_v60  ;;  %v4921_v61 = vmul.f32 -1.442695, %v7368_v39  ;;  %v3052_v33 = vpop.f32.mrf.mxu0  ;;  %v7382_v50 = vadd.f32 %v3137_v3, %v7282_v45 }
 0x37f   : > { %v5727_v55 = vpop.eup %5726  ;;  %v3434_v40 = vadd.f32 1.0, %v5725_v2  ;;  %v4917_v63 = vmul.f32 -1.442695, %v7374_v14  ;;  %v7379_v37 = vadd.f32 %v3052_v33, %v7282_v45  ;;  %v5323_v26 = vpop.f32.mrf.mxu1  ;;  %v3574_v47 = vmul.f32 %v7371_v57, %v3518_v1 }
 0x380   : > { %v5729_v48 = vpop.eup %5728  ;;  %v3522_v17 = vmul.f32 %v5727_v55, %v7298_v27  ;;  %5752 = vrcp.f32 %v3430_v20  ;;  %v5309_v22 = vpop.f32.mrf.mxu0  ;;  %v7389_v16 = vadd.f32 %v5323_v26, %v7313_v41  ;;  %v4920_v32 = vmul.f32 -1.442695, %v7382_v50 }
 0x381   : > { %v5731_v29 = vpop.eup %5730  ;;  %v3520_v52 = vmul.f32 %v5729_v48, %v7304_v15  ;;  %5754 = vrcp.f32 %v3434_v40  ;;  %v4916_v25 = vmul.f32 -1.442695, %v7379_v37  ;;  %v7395_v27 = vadd.f32 %v5309_v22, %v7313_v41  ;;  %v3147_v9 = vpop.f32.mrf.mxu1 }
 0x382   : > { %v5733_v28 = vpop.eup %5732  ;;  %v3578_v54 = vmul.f32 %v7371_v57, %v3522_v17  ;;  %v3433_v56 = vadd.f32 1.0, %v5731_v29  ;;  %5756 = vpow2.f32 %v4917_v63  ;;  %v3062_v11 = vpop.f32.mrf.mxu0  ;;  %v4923_v60 = vmul.f32 -1.442695, %v7389_v16 }
 0x383   : > { %v5735_v13 = vpop.eup %5734  ;;  %v3437_v15 = vadd.f32 1.0, %v5733_v28  ;;  %5758 = vpow2.f32 %v4921_v61  ;;  %v3576_v35 = vmul.f32 %v7397_v38, %v3520_v52  ;;  %v4919_v58 = vmul.f32 -1.442695, %v7395_v27  ;;  %v7417_v26 = vpop.permute.xlu1 %3571 }
 0x384   : > { %v5737_v19 = vpop.eup %5736  ;;  %v3524_v4 = vmul.f32 %v5735_v13, %v7311_v49  ;;  %5760 = vrcp.f32 %v3433_v56  ;;  %v7406_v1 = vadd.f32 %v3062_v11, %v7300_v12  ;;  %v3607_v2 = vsel %vm3606_vm3, %v3574_v47, 0.0 }
 0x385   : > { %v5739_v51 = vpop.eup %5738  ;;  %v3521_v53 = vmul.f32 %v5737_v19, %v7316_v59  ;;  %5762 = vrcp.f32 %v3437_v15  ;;  %v3620_v49 = vsel %vm3606_vm3, %v3578_v54, 0.0  ;;  %v7414_v55 = vadd.f32 %v3147_v9, %v7300_v12 }
 0x386   : > { %v5741_v3 = vpop.eup %5740  ;;  %v3525_v20 = vmul.f32 %v5739_v51, %v7319_v43  ;;  %5764 = vpow2.f32 %v4916_v25  ;;  %v4918_v59 = vmul.f32 -1.442695, %v7406_v1  ;;  %v3580_v48 = vmul.f32 %v7397_v38, %v3524_v4 }
 0x387   : > { %v5743_v61 = vpop.eup %5742  ;;  %v3519_v33 = vmul.f32 %v5741_v3, %v7326_v44  ;;  %5766 = vpow2.f32 %v4920_v32  ;;  %v3610_v17 = vsel %vm3606_vm3, %v3576_v35, 0.0  ;;  %v3577_v44 = vmul.f32 %v7417_v26, %v3521_v53 }
 0x388   : > { %v5745_v40 = vpop.eup %5744  ;;  %v3523_v63 = vmul.f32 %v5743_v61, %v7329_v31  ;;  %5768 = vpow2.f32 %v4919_v58  ;;  %v3581_v25 = vmul.f32 %v7417_v26, %v3525_v20  ;;  %v4922_v11 = vmul.f32 -1.442695, %v7414_v55 }
 0x389   : > { %v5747_v43 = vpop.eup %5746  ;;  %v3575_v47 = vmul.f32 %v7391_v62, %v3519_v33  ;;  %v3432_v22 = vadd.f32 1.0, %v5745_v40  ;;  %5770 = vpow2.f32 %v4923_v60  ;;  %v3623_v58 = vsel %vm3606_vm3, %v3580_v48, 0.0 }
 0x38a   : > { %v5749_v29 = vpop.eup %5748  ;;  %v3579_v52 = vmul.f32 %v7391_v62, %v3523_v63  ;;  %v3436_v31 = vadd.f32 1.0, %v5747_v43  ;;  %5772 = vpow2.f32 %v4918_v59  ;;  %v3625_v53 = vsel %vm3606_vm3, %v3581_v25, 0.0 }
 0x38b   : > { %v5751_v28 = vpop.eup %5750  ;;  %v3608_v54 = vsel %vm3606_vm3, %v3575_v47, 0.0  ;;  %v3531_v56 = vmul.f32 %v5749_v29, %v7336_v46  ;;  %5774 = vrcp.f32 %v3432_v22  ;;  %v3612_v46 = vsel %vm3606_vm3, %v3577_v44, 0.0 }
 0x38c   : > { %v3621_v13 = vsel %vm3606_vm3, %v3579_v52, 0.0  ;;  %v3609_v15 = vadd.f32 %v3608_v54, %v3607_v2  ;;  %v3527_v32 = vmul.f32 %v5751_v28, %v7339_v18  ;;  %5776 = vrcp.f32 %v3436_v31  ;;  %v5334_v19 = vpop.f32.mrf.mxu0  ;;  %v5348_v2 = vpop.f32.mrf.mxu1 }
 0x38d   : > { %v5753_v4 = vpop.eup %5752  ;;  %v3622_v35 = vadd.f32 %v3621_v13, %v3620_v49  ;;  %5778 = vpow2.f32 %v4922_v11  ;;  %v7432_v9 = vadd.f32 %v5334_v19, %v7321_v30  ;;  %v3587_v20 = vmul.f32 %v7391_v62, %v3531_v56  ;;  %v7813_v13 = vld [vmem:[#allocation12_spill] sm:$0xff] }
 0x38e   : > { %v5755_v51 = vpop.eup %5754  ;;  %v3611_v60 = vadd.f32 %v3610_v17, %v3609_v15  ;;  %v3526_v3 = vmul.f32 %v5753_v4, %v7344_v34  ;;  %v3583_v63 = vmul.f32 %v7391_v62, %v3527_v32  ;;  %v3222_v22 = vpop.f32.mrf.mxu0  ;;  %v7447_v11 = vadd.f32 %v5348_v2, %v7321_v30 }
 0x38f   : > { %v5757_v18 = vpop.eup %5756  ;;  %v3624_v61 = vadd.f32 %v3623_v58, %v3622_v35  ;;  %v3530_v49 = vmul.f32 %v5755_v51, %v7347_v8  ;;  %v4925_v33 = vmul.f32 -1.442695, %v7432_v9  ;;  %v3307_v31 = vpop.f32.mrf.mxu1  ;;  %v4033_v15 = vrot.slane %v7813_v13, 1 }
 0x390   : > { %v5759_v59 = vpop.eup %5758  ;;  %v3613_v40 = vadd.f32 %v3612_v46, %v3611_v60  ;;  %v3582_v48 = vmul.f32 %v7371_v57, %v3526_v3  ;;  %v3439_v43 = vadd.f32 1.0, %v5757_v18  ;;  %v3647_v19 = vsel %vm3606_vm3, %v3587_v20, 0.0  ;;  %v5337_v60 = vpop.f32.mrf.mxu0 }
 0x391   : > { %v5761_v47 = vpop.eup %5760  ;;  %v3626_v17 = vadd.f32 %v3625_v53, %v3624_v61  ;;  %v3586_v34 = vmul.f32 %v7371_v57, %v3530_v49  ;;  %v3443_v44 = vadd.f32 1.0, %v5759_v59  ;;  %5780 = vpow2.f32 %v4925_v33  ;;  %v5351_v49 = vpop.f32.mrf.mxu1 }
 0x392   : > { %v5763_v29 = vpop.eup %5762  ;;  %v3614_v52 = vrot.slane %v3613_v40, 4  ;;  %v3633_v8 = vsel %vm3606_vm3, %v3582_v48, 0.0  ;;  %v3529_v25 = vmul.f32 %v5761_v47, %v7351_v7  ;;  %5782 = vrcp.f32 %v3439_v43 }
 0x393   : > { %v5765_v28 = vpop.eup %5764  ;;  %v3627_v54 = vrot.slane %v3626_v17, 4  ;;  %v3646_v56 = vsel %vm3606_vm3, %v3586_v34, 0.0  ;;  %v3634_v4 = vsel %vm3606_vm3, %v3583_v63, 0.0  ;;  %5784 = vrcp.f32 %v3443_v44 }
 0x394   : > { %v5767_v32 = vpop.eup %5766  ;;  %v4034_v35 = vrot.slane %v7813_v13, 2  ;;  %v3635_v58 = vadd.f32 %v3634_v4, %v3633_v8  ;;  %v3533_v51 = vmul.f32 %v5763_v29, %v7355_v10  ;;  %v3438_v46 = vadd.f32 1.0, %v5765_v28  ;;  %v3232_v29 = vpop.f32.mrf.mxu0 }
 0x395   : > { %v5769_v7 = vpop.eup %5768  ;;  %v3442_v53 = vadd.f32 1.0, %v5767_v32  ;;  %v3615_v30 = vadd.f32 %v3614_v52, %v3613_v40  ;;  %v3648_v2 = vadd.f32 %v3647_v19, %v3646_v56  ;;  %v3585_v18 = vmul.f32 %v7417_v26, %v3529_v25 }
 0x396   : > { %v5771_v3 = vpop.eup %5770  ;;  %v3441_v61 = vadd.f32 1.0, %v5769_v7  ;;  %v7455_v33 = vadd.f32 %v3627_v54, %v3626_v17  ;;  %5786 = vrcp.f32 %v3438_v46  ;;  %v4929_v63 = vmul.f32 -1.442695, %v7447_v11 }
 0x397   : > { %v5773_v20 = vpop.eup %5772  ;;  %v3445_v59 = vadd.f32 1.0, %v5771_v3  ;;  %5788 = vrcp.f32 %v3442_v53  ;;  %v7459_v43 = vadd.f32 %v3222_v22, %v7282_v45  ;;  %v7462_v40 = vadd.f32 %v3307_v31, %v7282_v45  ;;  %v3317_v45 = vpop.f32.mrf.mxu1 }
 0x398   : > { %v5775_v48 = vpop.eup %5774  ;;  %v3440_v10 = vadd.f32 1.0, %v5773_v20  ;;  %v3589_v34 = vmul.f32 %v7417_v26, %v3533_v51  ;;  %5790 = vrcp.f32 %v3441_v61  ;;  %v7467_v17 = vadd.f32 %v5337_v60, %v7313_v41 }
 0x399   : > { %v5777_v47 = vpop.eup %5776  ;;  %v3528_v44 = vmul.f32 %v5775_v48, %v7360_v36  ;;  %5792 = vrcp.f32 %v3445_v59  ;;  %v4924_v22 = vmul.f32 -1.442695, %v7459_v43  ;;  %v4928_v25 = vmul.f32 -1.442695, %v7462_v40 }
 0x39a   : > { %v5779_v52 = vpop.eup %5778  ;;  %v3532_v8 = vmul.f32 %v5777_v47, %v7363_v24  ;;  %5794 = vrcp.f32 %v3440_v10  ;;  %v4927_v36 = vmul.f32 -1.442695, %v7467_v17  ;;  %v7476_v56 = vadd.f32 %v5351_v49, %v7313_v41 }
 0x39b   : > { %v3584_v31 = vmul.f32 %v7397_v38, %v3528_v44  ;;  %v3444_v28 = vadd.f32 1.0, %v5779_v52  ;;  %5796 = vpow2.f32 %v4929_v63  ;;  %v7479_v24 = vadd.f32 %v3232_v29, %v7300_v12 }
 0x39c   : > { %v3588_v54 = vmul.f32 %v7397_v38, %v3532_v8  ;;  %v3616_v32 = vrot.slane %v3615_v30, 2  ;;  %v7483_v4 = vadd.f32 %v3317_v45, %v7300_v12  ;;  %v4931_v53 = vmul.f32 -1.442695, %v7476_v56 }
 0x39d   : > { %v3636_v19 = vsel %vm3606_vm3, %v3584_v31, 0.0  ;;  %5798 = vrcp.f32 %v3444_v28  ;;  %v3638_v41 = vsel %vm3606_vm3, %v3585_v18, 0.0  ;;  %v4926_v61 = vmul.f32 -1.442695, %v7479_v24 }
 0x39e   : > { %v5781_v7 = vpop.eup %5780  ;;  %v3637_v51 = vadd.f32 %v3636_v19, %v3635_v58  ;;  %v3649_v46 = vsel %vm3606_vm3, %v3588_v54, 0.0  ;;  %5800 = vpow2.f32 %v4924_v22  ;;  %v3651_v49 = vsel %vm3606_vm3, %v3589_v34, 0.0 }
 0x39f   : > { %v5783_v60 = vpop.eup %5782  ;;  %v3650_v3 = vadd.f32 %v3649_v46, %v3648_v2  ;;  %5802 = vpow2.f32 %v4928_v25  ;;  %v4930_v12 = vmul.f32 -1.442695, %v7483_v4  ;;  %v3629_v58 = vrot.slane %v7455_v33, 2 }
 0x3a0   : > { %v3639_v20 = vadd.f32 %v3638_v41, %v3637_v51  ;;  %5804 = vpow2.f32 %v4927_v36  ;;  %v5785_v59 = vpop.eup %5784  ;;  %v3447_v48 = vadd.f32 1.0, %v5781_v7  ;;  %v3535_v2 = vmul.f32 %v5783_v60, %v7374_v14 }
 0x3a1   : > { %v3652_v63 = vadd.f32 %v3651_v49, %v3650_v3  ;;  %5806 = vpow2.f32 %v4931_v53  ;;  %v3617_v18 = vadd.f32 %v3616_v32, %v3615_v30  ;;  %v3539_v34 = vmul.f32 %v5785_v59, %v7368_v39 }
 0x3a2   : > { %v3640_v10 = vrot.slane %v3639_v20, 4  ;;  %5808 = vpow2.f32 %v4926_v61  ;;  %v4035_v44 = vrot.slane %v7813_v13, 3  ;;  %v4765_v52 = vsel %vm832_vm0, 1.0, %v7811_v42 }
 0x3a3   : > { %v3653_v47 = vrot.slane %v3652_v63, 4  ;;  %v5787_v29 = vpop.eup %5786  ;;  %5810 = vpow2.f32 %v4930_v12  ;;  %v4036_v21 = vrot.slane %v7813_v13, 4  ;;  %v7500_v22 = vadd.f32 %v3629_v58, %v7455_v33 }
 0x3a4   : > { %v3641_v8 = vadd.f32 %v3640_v10, %v3639_v20  ;;  %v5789_v6 = vpop.eup %5788  ;;  %v3534_v30 = vmul.f32 %v5787_v29, %v7379_v37  ;;  %5812 = vrcp.f32 %v3447_v48  ;;  %v3591_v45 = vmul.f32 %v7391_v62, %v3535_v2 }
 0x3a5   : > { %v3654_v14 = vadd.f32 %v3653_v47, %v3652_v63  ;;  %v5791_v25 = vpop.eup %5790  ;;  %v3538_v31 = vmul.f32 %v5789_v6, %v7382_v50  ;;  %v3618_v28 = vrot.slane %v3617_v18, 1  ;;  %v3595_v32 = vmul.f32 %v7391_v62, %v3539_v34 }
 0x3a6   : > { %v3642_v39 = vrot.slane %v3641_v8, 2  ;;  %v5793_v36 = vpop.eup %5792  ;;  %v3590_v19 = vmul.f32 %v7371_v57, %v3534_v30  ;;  %v3537_v33 = vmul.f32 %v5791_v25, %v7395_v27  ;;  %v4037_v37 = vrot.slane %v7813_v13, 5 }
 0x3a7   : > { %v3655_v54 = vrot.slane %v3654_v14, 2  ;;  %v5795_v7 = vpop.eup %5794  ;;  %v3594_v51 = vmul.f32 %v7371_v57, %v3538_v31  ;;  %v4038_v46 = vrot.slane %v7813_v13, 6  ;;  %v4039_v53 = vrot.slane %v7813_v13, 7 }
 0x3a8   : > { %v5797_v60 = vpop.eup %5796  ;;  %v7513_v50 = vmul.f32 %v4765_v52, %v6703_v5  ;;  %v3643_v41 = vadd.f32 %v3642_v39, %v3641_v8  ;;  %v3659_v3 = vsel %vm3606_vm3, %v3590_v19, 0.0  ;;  %v3536_v61 = vmul.f32 %v5795_v7, %v7406_v1 }
 0x3a9   : > { %v3660_v27 = vsel %vm3606_vm3, %v3591_v45, 0.0  ;;  %v3541_v20 = vmul.f32 %v5793_v36, %v7389_v16  ;;  %v3619_v12 = vadd.f32 %v3618_v28, %v3617_v18  ;;  %v3631_v59 = vrot.slane %v7500_v22, 1 }
 0x3aa   : > { %v5799_v49 = vpop.eup %5798  ;;  %v3656_v63 = vadd.f32 %v3655_v54, %v3654_v14  ;;  %v3673_v48 = vsel %vm3606_vm3, %v3595_v32, 0.0  ;;  %v3593_v5 = vmul.f32 %v7417_v26, %v3537_v33  ;;  %v3592_v10 = vmul.f32 %v7397_v38, %v3536_v61 }
 0x3ab   : > { %v5801_v58 = vpop.eup %5800  ;;  %v3661_v47 = vadd.f32 %v3660_v27, %v3659_v3  ;;  %v3672_v1 = vsel %vm3606_vm3, %v3594_v51, 0.0  ;;  %v3540_v34 = vmul.f32 %v5799_v49, %v7414_v55  ;;  %v3451_v29 = vadd.f32 1.0, %v5797_v60 }
 0x3ac   : > { %v5803_v2 = vpop.eup %5802  ;;  %v3644_v16 = vrot.slane %v3643_v41, 1  ;;  %v3662_v18 = vsel %vm3606_vm3, %v3592_v10, 0.0  ;;  %v3446_v8 = vadd.f32 1.0, %v5801_v58  ;;  %v3597_v14 = vmul.f32 %v7417_v26, %v3541_v20  ;;  %v7814_v58 = vld [vmem:[#allocation13_spill] sm:$0xff] }
 0x3ad   : > { %v5805_v52 = vpop.eup %5804  ;;  %v3450_v6 = vadd.f32 1.0, %v5803_v2  ;;  %v3663_v30 = vadd.f32 %v3662_v18, %v3661_v47  ;;  %v3596_v25 = vmul.f32 %v7397_v38, %v3540_v34  ;;  %5814 = vrcp.f32 %v3451_v29 }
 0x3ae   : > { %v5807_v39 = vpop.eup %5806  ;;  %v3674_v45 = vadd.f32 %v3673_v48, %v3672_v1  ;;  %v3664_v31 = vsel %vm3606_vm3, %v3593_v5, 0.0  ;;  %5816 = vrcp.f32 %v3446_v8  ;;  %v3449_v28 = vadd.f32 1.0, %v5805_v52 }
 0x3af   : > { %v5809_v55 = vpop.eup %5808  ;;  %v3665_v36 = vadd.f32 %v3664_v31, %v3663_v30  ;;  %v3675_v54 = vsel %vm3606_vm3, %v3596_v25, 0.0  ;;  %5818 = vrcp.f32 %v3450_v6  ;;  %v3453_v32 = vadd.f32 1.0, %v5807_v39 }
 0x3b0   : > { %v5811_v19 = vpop.eup %5810  ;;  %v3657_v33 = vrot.slane %v3656_v63, 1  ;;  %v3676_v7 = vadd.f32 %v3675_v54, %v3674_v45  ;;  %5820 = vrcp.f32 %v3449_v28  ;;  %v3448_v51 = vadd.f32 1.0, %v5809_v55 }
 0x3b1   : > { %v5813_v60 = vpop.eup %5812  ;;  %v3677_v3 = vsel %vm3606_vm3, %v3597_v14, 0.0  ;;  %v3666_v61 = vrot.slane %v3665_v36, 4  ;;  %5822 = vrcp.f32 %v3453_v32  ;;  %v3452_v49 = vadd.f32 1.0, %v5811_v19 }
 0x3b2   : > { %v3678_v27 = vadd.f32 %v3677_v3, %v3676_v7  ;;  %5824 = vrcp.f32 %v3448_v51  ;;  %v3632_v20 = vadd.f32 %v3631_v59, %v7500_v22  ;;  %v3960_v48 = vrot.slane %v7814_v58, 1 }
 0x3b3   : > { %v3645_v5 = vadd.f32 %v3644_v16, %v3643_v41  ;;  %v3667_v10 = vadd.f32 %v3666_v61, %v3665_v36  ;;  %5826 = vrcp.f32 %v3452_v49  ;;  %v3961_v2 = vrot.slane %v7814_v58, 2 }
 0x3b4   : > { %v3658_v47 = vadd.f32 %v3657_v33, %v3656_v63  ;;  %v3679_v1 = vrot.slane %v3678_v27, 4  ;;  %v3936_v34 = vrot.slane %v7513_v50, 1  ;;  %v3962_v29 = vrot.slane %v7814_v58, 3 }
 0x3b5   : > { %v3937_v52 = vrot.slane %v7513_v50, 2  ;;  %v3543_v18 = vmul.f32 %v5813_v60, %v7432_v9  ;;  %v7539_v8 = vmul.f32 %v3619_v12, %v7513_v50  ;;  %v3963_v22 = vrot.slane %v7814_v58, 4  ;;  %v7815_v12 = vld [vmem:[#allocation14_spill] sm:$0xff] }
 0x3b6   : > { %v3938_v41 = vrot.slane %v7513_v50, 3  ;;  %v3668_v59 = vrot.slane %v3667_v10, 2  ;;  %v3680_v16 = vadd.f32 %v3679_v1, %v3678_v27  ;;  %v7543_v6 = vmul.f32 %v3936_v34, %v3632_v20 }
 0x3b7   : > { %v7545_v63 = vmul.f32 %v3937_v52, %v3645_v5  ;;  %v3964_v14 = vrot.slane %v7814_v58, 5  ;;  %v3965_v30 = vrot.slane %v7814_v58, 6  ;;  %v3966_v25 = vrot.slane %v7814_v58, 7 }
 0x3b8   : > { %v7550_v9 = vmul.f32 %v3938_v41, %v3658_v47  ;;  %v4099_v39 = vrot.slane %v7815_v12, 1  ;;  %v4100_v45 = vrot.slane %v7815_v12, 2  ;;  %v4101_v31 = vrot.slane %v7815_v12, 3 }
 0x3b9   : > { %v3681_v28 = vrot.slane %v3680_v16, 2  ;;  %v3599_v55 = vmul.f32 %v7391_v62, %v3543_v18  ;;  %v7558_v36 = vmul.f32 %v7539_v8, %v7813_v13  ;;  %v4102_v54 = vrot.slane %v7815_v12, 4 }
 0x3ba   : > { %v5815_v32 = vpop.eup %5814  ;;  %v3669_v19 = vadd.f32 %v3668_v59, %v3667_v10  ;;  %v4049_v33 = vmul.f32 %v4033_v15, %v7543_v6  ;;  %v4103_v7 = vrot.slane %v7815_v12, 5  ;;  %v4104_v51 = vrot.slane %v7815_v12, 6 }
 0x3bb   : > { %v5817_v60 = vpop.eup %5816  ;;  %v3939_v3 = vrot.slane %v7513_v50, 4  ;;  %v3547_v61 = vmul.f32 %v5815_v32, %v7447_v11  ;;  %v4050_v49 = vmul.f32 %v4034_v35, %v7545_v63  ;;  %v3940_v15 = vrot.slane %v7513_v50, 5 }
 0x3bc   : > { %v5819_v20 = vpop.eup %5818  ;;  %v3542_v5 = vmul.f32 %v5817_v60, %v7459_v43  ;;  %v3941_v10 = vrot.slane %v7513_v50, 6  ;;  %v4051_v47 = vmul.f32 %v4035_v44, %v7550_v9  ;;  %v3682_v34 = vadd.f32 %v3681_v28, %v3680_v16 }
 0x3bd   : > { %v5821_v1 = vpop.eup %5820  ;;  %v3686_v11 = vsel %vm3606_vm3, %v3599_v55, 0.0  ;;  %v3546_v52 = vmul.f32 %v5819_v20, %v7462_v40  ;;  %v4940_v35 = vclamps-f32 %v7558_v36, 100.0  ;;  %v3670_v41 = vrot.slane %v3669_v19, 1 }
 0x3be   : > { %v5823_v18 = vpop.eup %5822  ;;  %v3598_v43 = vmul.f32 %v7371_v57, %v3542_v5  ;;  %v3545_v59 = vmul.f32 %v5821_v1, %v7467_v17  ;;  %v4941_v32 = vclamps-f32 %v4049_v33, 100.0  ;;  %v3603_v27 = vmul.f32 %v7391_v62, %v3547_v61 }
 0x3bf   : > { %v5825_v60 = vpop.eup %5824  ;;  %v3602_v44 = vmul.f32 %v7371_v57, %v3546_v52  ;;  %v3549_v16 = vmul.f32 %v5823_v18, %v7476_v56  ;;  %v4942_v28 = vclamps-f32 %v4050_v49, 100.0  ;;  %v4943_v20 = vclamps-f32 %v4051_v47, 100.0 }
 0x3c0   : > { %v5827_v55 = vpop.eup %5826  ;;  %v3685_v40 = vsel %vm3606_vm3, %v3598_v43, 0.0  ;;  %v3544_v36 = vmul.f32 %v5825_v60, %v7479_v24  ;;  %v3976_v5 = vmul.f32 %v3960_v48, %v7543_v6  ;;  %v3683_v17 = vrot.slane %v3682_v34, 1 }
 0x3c1   : > { %v3698_v33 = vsel %vm3606_vm3, %v3602_v44, 0.0  ;;  %v3548_v62 = vmul.f32 %v5827_v55, %v7483_v4  ;;  %v3975_v57 = vmul.f32 %v7539_v8, %v7814_v58  ;;  %v3671_v56 = vadd.f32 %v3670_v41, %v3669_v19  ;;  %v4475_v4 = vld [vmem:[%s7761_s17 + $0x18] sm:$0xff]  ;;  %v4474_v19 = vld [vmem:[%s7761_s17 + $0x10] sm:$0xff] }
 0x3c2   : > { %v3601_v61 = vmul.f32 %v7417_v26, %v3545_v59  ;;  %v3600_v49 = vmul.f32 %v7397_v38, %v3544_v36  ;;  %v3977_v24 = vmul.f32 %v3961_v2, %v7545_v63  ;;  %v3699_v47 = vsel %vm3606_vm3, %v3603_v27, 0.0  ;;  %5368 = vmatpush3.msra.mxu1 %v4475_v4  ;;  %v4472_v36 = vld [vmem:[%s7761_s17] sm:$0xff] }
 0x3c3   : > { %v3687_v48 = vadd.f32 %v3686_v11, %v3685_v40  ;;  %v3605_v1 = vmul.f32 %v7417_v26, %v3549_v16  ;;  %v3604_v52 = vmul.f32 %v7397_v38, %v3548_v62  ;;  %v3700_v18 = vadd.f32 %v3699_v47, %v3698_v33  ;;  %5369 = vmatprep.subr.mxu1 %v7811_v42  ;;  %v4473_v38 = vld [vmem:[%s7761_s17 + $0x8] sm:$0xff] }
 0x3c4   : > { %v3688_v41 = vsel %vm3606_vm3, %v3600_v49, 0.0  ;;  %v4080_v43 = vrot.slane %v4941_v32, 7  ;;  %v4933_v2 = vclamps-f32 %v3976_v5, 100.0  ;;  %v3684_v27 = vadd.f32 %v3683_v17, %v3682_v34  ;;  %5370 = vmatpush3.msra.mxu1 %v4474_v19 }
 0x3c5   : > { %v3689_v11 = vadd.f32 %v3688_v41, %v3687_v48  ;;  %v3701_v26 = vsel %vm3606_vm3, %v3604_v52, 0.0  ;;  %v4082_v59 = vrot.slane %v4942_v28, 6  ;;  %v3955_v60 = vmul.f32 %v3939_v3, %v3671_v56  ;;  %5371 = vmatprep.subr.mxu1 %v7811_v42 }
 0x3c6   : > { %v3690_v44 = vsel %vm3606_vm3, %v3601_v61, 0.0  ;;  %v3702_v16 = vadd.f32 %v3701_v26, %v3700_v18  ;;  %v4084_v55 = vrot.slane %v4943_v20, 5  ;;  %v3703_v32 = vsel %vm3606_vm3, %v3605_v1, 0.0  ;;  %5372 = vmatpush3.msra.mxu1 %v4473_v38 }
 0x3c7   : > { %v3691_v40 = vadd.f32 %v3690_v44, %v3689_v11  ;;  %v3978_v34 = vmul.f32 %v3962_v29, %v7550_v9  ;;  %v4934_v28 = vclamps-f32 %v3977_v24, 100.0  ;;  %v4081_v5 = vsel %vm4008_vm8, %v4080_v43, %v4940_v35  ;;  %5373 = vmatprep.subr.mxu1 %v7811_v42 }
 0x3c8   : > { %v3704_v3 = vadd.f32 %v3703_v32, %v3702_v16  ;;  %v4007_v17 = vrot.slane %v4933_v2, 7  ;;  %v4115_v20 = vmul.f32 %v4099_v39, %v7543_v6  ;;  %v3956_v29 = vmul.f32 %v3940_v15, %v3684_v27  ;;  %5374 = vmatpush3.msra.mxu1 %v4472_v36 }
 0x3c9   : > { %v3692_v33 = vrot.slane %v3691_v40, 4  ;;  %v4932_v62 = vclamps-f32 %v3975_v57, 100.0  ;;  %v4116_v56 = vmul.f32 %v4100_v45, %v7545_v63  ;;  %v4052_v35 = vmul.f32 %v4036_v21, %v3955_v60 }
 0x3ca   : > { %v3705_v61 = vrot.slane %v3704_v3, 4  ;;  %v4083_v49 = vsel %vm4011_vm9, %v4082_v59, %v4081_v5  ;;  %v3979_v6 = vmul.f32 %v3963_v22, %v3955_v60  ;;  %v4935_v24 = vclamps-f32 %v3978_v34, 100.0 }
 0x3cb   : > { %v3693_v39 = vadd.f32 %v3692_v33, %v3691_v40  ;;  %v4010_v15 = vrot.slane %v4934_v28, 6  ;;  %v4114_v57 = vmul.f32 %v7539_v8, %v7815_v12  ;;  %v4009_v63 = vsel %vm4008_vm8, %v4007_v17, %v4932_v62 }
 0x3cc   : > { %v3706_v47 = vadd.f32 %v3705_v61, %v3704_v3  ;;  %v4117_v42 = vmul.f32 %v4101_v31, %v7550_v9  ;;  %v4949_v21 = vclamps-f32 %v4115_v20, 100.0  ;;  %v4053_v48 = vmul.f32 %v4037_v37, %v3956_v29 }
 0x3cd   : > { %v3694_v45 = vrot.slane %v3693_v39, 2  ;;  %v4118_v22 = vmul.f32 %v4102_v54, %v3955_v60  ;;  %v4950_v1 = vclamps-f32 %v4116_v56, 100.0  ;;  %v4944_v4 = vclamps-f32 %v4052_v35, 100.0 }
 0x3ce   : > { %v3707_v52 = vrot.slane %v3706_v47, 2  ;;  %v3980_v8 = vmul.f32 %v3964_v14, %v3956_v29  ;;  %v4936_v19 = vclamps-f32 %v3979_v6, 100.0  ;;  %v4012_v41 = vsel %vm4011_vm9, %v4010_v15, %v4009_v63 }
 0x3cf   : > { %v3695_v18 = vadd.f32 %v3694_v45, %v3693_v39  ;;  %v4013_v43 = vrot.slane %v4935_v24, 5  ;;  %v4119_v9 = vmul.f32 %v4103_v7, %v3956_v29  ;;  %v4948_v2 = vclamps-f32 %v4114_v57, 100.0 }
 0x3d0   : > { %v3708_v31 = vadd.f32 %v3707_v52, %v3706_v47  ;;  %v4951_v37 = vclamps-f32 %v4117_v42, 100.0  ;;  %v4146_v27 = vrot.slane %v4949_v21, 7  ;;  %v4945_v54 = vclamps-f32 %v4053_v48, 100.0 }
 0x3d1   : > { %v3696_v11 = vrot.slane %v3695_v18, 1  ;;  %v4952_v26 = vclamps-f32 %v4118_v22, 100.0  ;;  %v4148_v59 = vrot.slane %v4950_v1, 6  ;;  %v4086_v60 = vrot.slane %v4944_v4, 4 }
 0x3d2   : > { %v3709_v38 = vrot.slane %v3708_v31, 1  ;;  %v4937_v44 = vclamps-f32 %v3980_v8, 100.0  ;;  %v4016_v14 = vrot.slane %v4936_v19, 4  ;;  %v3942_v32 = vrot.slane %v7513_v50, 7 }
 0x3d3   : > { %v3697_v16 = vadd.f32 %v3696_v11, %v3695_v18  ;;  %v4085_v40 = vsel %vm4014_vm10, %v4084_v55, %v4083_v49  ;;  %v4953_v34 = vclamps-f32 %v4119_v9, 100.0  ;;  %v4015_v7 = vsel %vm4014_vm10, %v4013_v43, %v4012_v41  ;;  %v3932_v9 = vpop.xlane.xlu0 %3931 }
 0x3d4   : > { %v3710_v28 = vadd.f32 %v3709_v38, %v3708_v31  ;;  %v4147_v36 = vsel %vm4008_vm8, %v4146_v27, %v4948_v2  ;;  %v4150_v3 = vrot.slane %v4951_v37, 5  ;;  %v4088_v17 = vrot.slane %v4945_v54, 3  ;;  %v5835_v2 = vld [vmem:[%s6681_s8] sm:$0x1]  ;;  %s5843_s8 = scalar_lea.vmem %s5842_s2, 256 }
 0x3d5   : > { %v3957_v5 = vmul.f32 %v3941_v10, %v3697_v16  ;;  %v4149_v20 = vsel %vm4011_vm9, %v4148_v59, %v4147_v36  ;;  %v4152_v33 = vrot.slane %v4952_v26, 4  ;;  %v4087_v62 = vsel %vm4017_vm11, %v4086_v60, %v4085_v40  ;;  %v4956_v54 = vld [vmem:[%s7760_s16] ss:$0 sm:$0xff]  ;;  %p5845_p2 = scmp.lt.s32.totalorder %s5843_s8, %s5837_s30 }
 0x3d6   : > { %v3958_v29 = vmul.f32 %v3942_v32, %v3710_v28  ;;  %v4018_v56 = vsel %vm4017_vm11, %v4016_v14, %v4015_v7  ;;  %v4019_v55 = vrot.slane %v4937_v44, 3  ;;  %v4154_v10 = vrot.slane %v4953_v34, 3 }
 0x3d7   : > { %v4054_v61 = vmul.f32 %v4038_v46, %v3957_v5  ;;  %v3981_v35 = vmul.f32 %v3965_v30, %v3957_v5  ;;  %v4120_v50 = vmul.f32 %v4104_v51, %v3957_v5  ;;  %v7816_v39 = vrot.slane %v7815_v12, 7  ;;  %p5846_p3 = por %p5845_p2, %p5844_p1 }
 0x3d8   : > { %v4055_v49 = vmul.f32 %v4039_v53, %v3958_v29  ;;  %v3982_v6 = vmul.f32 %v3966_v25, %v3958_v29  ;;  %v4151_v15 = vsel %vm4014_vm10, %v4150_v3, %v4149_v20  ;;  %v4089_v51 = vsel %vm4020_vm12, %v4088_v17, %v4087_v62  ;;  %v4959_v17 = vld [vmem:[%s7762_s18] ss:$0 sm:$0xff] }
 0x3d9   : > { %v4121_v24 = vmul.f32 %v7816_v39, %v3958_v29  ;;  %v4946_v57 = vclamps-f32 %v4054_v61, 100.0  ;;  %v4938_v46 = vclamps-f32 %v3981_v35, 100.0  ;;  %v4954_v47 = vclamps-f32 %v4120_v50, 100.0  ;;  %p5847_p5 = pnand %p5846_p3, %p5840_p0 }
 0x3da   : > { %v4153_v30 = vsel %vm4017_vm11, %v4152_v33, %v4151_v15  ;;  %v4947_v63 = vclamps-f32 %v4055_v49, 100.0  ;;  %v4939_v42 = vclamps-f32 %v3982_v6, 100.0  ;;  %v4021_v53 = vsel %vm4020_vm12, %v4019_v55, %v4018_v56 }
 0x3db   : > { %v4955_v21 = vclamps-f32 %v4121_v24, 100.0  ;;  %v4090_v13 = vrot.slane %v4946_v57, 2  ;;  %v4022_v58 = vrot.slane %v4938_v46, 2  ;;  %v4156_v25 = vrot.slane %v4954_v47, 2 }
 0x3dc   : > { %v4092_v45 = vrot.slane %v4947_v63, 1  ;;  %v4025_v12 = vrot.slane %v4939_v42, 1  ;;  %v4155_v48 = vsel %vm4020_vm12, %v4154_v10, %v4153_v30  ;;  %v3933_v37 = vsub.f32 %v3932_v9, %v5835_v2 }
 0x3dd   : > { %v4158_v22 = vrot.slane %v4955_v21, 1  ;;  %v4091_v1 = vsel %vm4023_vm13, %v4090_v13, %v4089_v51  ;;  %v4024_v52 = vsel %vm4023_vm13, %v4022_v58, %v4021_v53  ;;  %v4157_v4 = vsel %vm4023_vm13, %v4156_v25, %v4155_v48 }
 0x3de   : > { %v4093_v8 = vsel %vm4026_vm14, %v4092_v45, %v4091_v1  ;;  %v4027_v19 = vsel %vm4026_vm14, %v4025_v12, %v4024_v52  ;;  %v3934_v27 = vmul.f32 %v5835_v2, %v3933_v37 }
 0x3df   : > { %v4095_v18 = vsel %vm3606_vm3, %v4093_v8, 0.0  ;;  %v4029_v41 = vsel %vm3606_vm3, %v4027_v19, 0.0  ;;  %v4159_v43 = vsel %vm4026_vm14, %v4158_v22, %v4157_v4 }
 0x3e0   : > { %4096 = vadd.xlane.f32.xlu0 %v4095_v18  ;;  %4030 = vadd.xlane.f32.xlu1 %v4029_v41  ;;  %v4161_v31 = vsel %vm3606_vm3, %v4159_v43, 0.0  ;;  %v4172_v11 = vrot.slane %v3934_v27, %v6158_v23  ;;  %vm4164_vm3 = vcmask 7168  }
 0x3e4   : > { %4162 = vadd.xlane.f32.xlu0 %v4161_v31 }
 0x3f1   : > { %4174 = vperm.xlu1 %5443, %v4172_v11  }
 0x421   : > { %v4461_v26 = vpop.f32.mrf.mxu0 }
 0x422   : > { %v4462_v59 = vadd.f32 %v4956_v54, %v4461_v26 }
 0x423   : > { %v5366_v38 = vpop.f32.mrf.mxu0 }
 0x424   : > { %v4958_v60 = vmul.f32 -1.442695, %v4462_v59 }
 0x426   : > { %5828 = vpow2.f32 %v4958_v60 }
 0x433   : > { %v5829_v44 = vpop.eup %5828 }
 0x434   : > { %v4468_v14 = vadd.f32 1.0, %v5829_v44 }
 0x436   : > { %5830 = vrcp.f32 %v4468_v14 }
 0x443   : > { %v5831_v16 = vpop.eup %5830 }
 0x444   : > { %v4471_v32 = vmul.f32 %v5831_v16, %v4462_v59 }
 0x446   : > { %5376 = vmatmul.mubr.msk.f32.vlgmr.msra.gmra.mxu1 %vm1689_vm2, %v4471_v32 }
 0x469   : > { %v4097_v23 = vpop.xlane.xlu0 %4096  ;;  %v4031_v40 = vpop.xlane.xlu1 %4030 }
 0x46a   : > { %v4165_v34 = vsel %vm4164_vm3, %v4031_v40, %v4097_v23 }
 0x46d   : > { %v4163_v28 = vpop.xlane.xlu0 %4162  ;;  %v4175_v7 = vpop.permute.xlu1 %4174 }
 0x46e   : > { %v4167_v36 = vsel %vm4166_vm4, %v4165_v34, %v4163_v28 }
 0x46f   : > { %v4177_v3 = vmul.f32 %v4175_v7, %v4167_v36 }
 0x471   : > { %v4558_v5 = vmul.f32 %v4177_v3, %v6692_v0 }
 0x473   : > { %4560 = vst.msk [vmem:[%s772_s3] sm:$0xff] %vm4559_vm5, %v4558_v5 }
 0x506   : > { %v4552_v20 = vpop.f32.mrf.mxu1 }
 0x507   : > { %v4553_v33 = vadd.f32 %v4959_v17, %v4552_v20 }
 0x508   : > { %v5377_v29 = vpop.f32.mrf.mxu1 }
 0x509   : > { %v4556_v62 = vmul.f32 %v4553_v33, %v6692_v0 }
 0x50b   : > { %4557 = vst.msk [vmem:[%s724_s25] sm:$0xff] %vm841_vm1, %v4556_v62 }
 0x50c   : > { %5850 = shalt.err (!%p5847_p5)
}
 0x50d   : > { %s5851_s7 = scalar_lea.hbm %s4581_s21, 128  ;;  %s5855_s29 = scalar_lea.hbm %s7763_s19, 256 }
 0x50e   : > { %p5852_p6 = scmp.ne.s32.totalorder %s4581_s21, %s5851_s7  ;;  %p5856_p10 = scmp.lt.s32.totalorder %s4581_s21, %s7763_s19 }
 0x50f   : > { %p5857_p11 = scmp.lt.s32.totalorder %s5855_s29, %s5851_s7 }
 0x510   : > { %p5853_p7 = pnand %p5852_p6, %p6067_p4 }
 0x511   : > { %p5858_p12 = por %p5857_p11, %p5856_p10 }
 0x512   : > { %p5854_p9 = pneg %p5853_p7 }
 0x514   : > { %p5859_p13 = pnand %p5858_p12, %p5854_p9 }
 0x516   : > { %5862 = shalt.err (!%p5859_p13)
}
 0x517   : > { %5378 = dma.vmem_to_hbm [thread:$0]  (%p6067_p4), %s4584_s28, 128, %s4581_s21, %s4562_s23  }
 0x518 PF: > { %s7817_s9 = sld [smem:[#allocation8_spill]] }
 0x519   : > { %s7818_s25 = sld [smem:[#allocation5_spill]] }
 0x51e   : > { %p5384_p0 = scmp.ge.s32.totalorder %s7817_s9, 2 }
 0x51f   : > { %s4598_s1 = sand.u32 1, %s7818_s25  }
 0x520   : > { %p5381_p1 = pnand %p5384_p0, %p6074_p8  ;;  %s4599_s30 = scalar_lea.sflag [#allocation3], %s4598_s1 }
 0x522   : > { %p5382_p2 = pneg %p5381_p1 }
 0x524   : > { %5888 = dma.done.wait (%p5382_p2), %s4599_s30, 128  }
 0x525   : > { %5890 = vsyncadd (%p5382_p2), %s4599_s30, 4294967168  ;;  %s34_s25 = sadd.s32 1, %s7817_s9   ;;  %s7820_s24 = sld [smem:[#allocation6_spill]] }
 0x526   : > { %p31_p3 = scmp.ge.s32.totalorder %s34_s25, 4   ;;  %s7821_s23 = sld [smem:[#allocation11_spill]] }
 0x527   : > { %s7822_s4 = sld [smem:[#allocation7_spill]]  ;;  %s7824_s1 = smov %s5897_s22 }
 0x528   : > { %s7823_s2 = sld [smem:[#allocation9_spill]] }
 0x529   :  { %33 = sbr.rel (!%p31_p3) target bundleno = 14 (0xe), region = 159 }
 0x52b   : > { %s7825_s22 = smov %s7820_s24 }
 0x52d   : > { %s7826_s24 = smov %s7822_s4 }
 0x52e   :  { %4614 = vsyncpa [#allocation3], 1 }
 0x52f   :  { %4616 = vsyncpa [#allocation3 + $0x1], 1 }

</bundles_post_ra>
